<compile_context>
chip_gen: v6e
topology: v6e:2x2x1
jax: 0.10.0
libtpu: 0.0.40
codegen_flags: <defaults>
</compile_context>

<pallas_src>
import jax
import jax.numpy as jnp
from jax import lax
from jax.experimental import pallas as pl
from jax.experimental.pallas import tpu as pltpu

IMAGENET_MEAN = (0.485, 0.456, 0.406)
IMAGENET_STD = (0.229, 0.224, 0.225)

FEAT_DIM = 2048      # each backbone emits a 2048-d descriptor
PATCH = 4            # synthetic conv-stem: PATCHxPATCH patchify conv (stride == PATCH)
RESNET_HW = 16       # scaled-down stand-in for 224x224
INCEPTION_HW = 24    # scaled-down stand-in for 299x299
K_PAD = 128          # im2col K (=3*PATCH*PATCH=48) zero-padded to a full lane width
SLAB = 16            # rows per accumulation slab inside the kernel
TN = 2048            # output-feature tile; grid = (2 backbones, FEAT_DIM // TN)


# -------------------- kernel --------------------

def _fused_stem_gap_kernel(rows_ref, x_ref, w_ref, b_ref, o_ref):
    # rows_ref: (2,) int32 SMEM      true (unpadded) row count per backbone
    # x_ref:    (R_pad, K_PAD) bf16  im2col patches (norm folded into w/b)
    # w_ref:    (K_PAD, TN)    bf16  folded + zero-padded weights
    # b_ref:    (1, TN)        f32   folded bias
    # o_ref:    (1, TN)        f32   lane-dense GAP / frame-mean output
    r_true = rows_ref[pl.program_id(0)]
    r_pad = x_ref.shape[0]
    tn = o_ref.shape[1]

    def body(s, acc):
        r0 = pl.multiple_of(s * SLAB, SLAB)
        xs = x_ref[pl.ds(r0, SLAB), :]                       # (SLAB, K_PAD) bf16
        act = jnp.dot(xs, w_ref[...],
                      preferred_element_type=jnp.float32) + b_ref[...]
        act = jnp.maximum(act, 0.0)
        # Mask padded rows (zero-input rows would otherwise contribute relu(bias)).
        row_id = r0 + lax.broadcasted_iota(jnp.int32, (SLAB, 1), 0)
        act = jnp.where(row_id < r_true, act, 0.0)
        return acc + jnp.sum(act, axis=0, keepdims=True)

    acc = lax.fori_loop(0, r_pad // SLAB, body,
                        jnp.zeros((1, tn), jnp.float32), unroll=True)
    # Mean over all true (frames x patches) rows == per-frame GAP then
    # frame-mean, since every frame contributes the same number of patch rows.
    o_ref[...] = acc / r_true.astype(jnp.float32)


def fused_stem_gap(rows, x, w, b, *, tn=TN):
    """Fused (2 backbones) patchify-conv + bias + ReLU + GAP/frame-mean."""
    nb, r_pad, k_pad = x.shape
    n = w.shape[-1]
    return pl.pallas_call(
        _fused_stem_gap_kernel,
        out_shape=jax.ShapeDtypeStruct((nb, 1, n), jnp.float32),
        grid_spec=pltpu.PrefetchScalarGridSpec(
            num_scalar_prefetch=1,
            grid=(nb, n // tn),
            in_specs=[
                pl.BlockSpec((None, r_pad, k_pad), lambda bb, j, rows: (bb, 0, 0)),
                pl.BlockSpec((None, k_pad, tn), lambda bb, j, rows: (bb, 0, j)),
                pl.BlockSpec((None, 1, tn), lambda bb, j, rows: (bb, 0, j)),
            ],
            out_specs=pl.BlockSpec((None, 1, tn), lambda bb, j, rows: (bb, 0, j)),
        ),
        compiler_params=pltpu.CompilerParams(
            dimension_semantics=("parallel", "parallel")),
    )(rows, x, w, b)


# -------------------- wrappers --------------------

def extract_patches(x, p):
    """Non-overlapping im2col: (F,H,W,C) -> (F*(H/p)*(W/p), p*p*C).  Glue.

    K ordering is (patch_row, patch_col, channel) with channel fastest — the
    normalization fold below must match this ordering exactly.
    """
    F, H, W, C = x.shape
    x = x.reshape(F, H // p, p, W // p, p, C)
    x = x.transpose(0, 1, 3, 2, 4, 5)
    return x.reshape(F * (H // p) * (W // p), p * p * C)


def _fold_backbone(w, b, scale):
    """Fold (x*scale - mean)/std into conv-as-matmul weights/bias, pad K->K_PAD.

    normalized_k = x_k * (scale/std_c(k)) - mean_c(k)/std_c(k)
    =>  w'[k,n] = (scale/std_c(k)) * w[k,n]
        b'[n]   = b[n] - sum_k (mean_c(k)/std_c(k)) * w[k,n]
    """
    mean = jnp.array(IMAGENET_MEAN, jnp.float32)
    std = jnp.array(IMAGENET_STD, jnp.float32)
    s = jnp.tile(scale / std, PATCH * PATCH)          # (K,) channel-fastest
    o = jnp.tile(mean / std, PATCH * PATCH)           # (K,)
    w_f = w * s[:, None]                              # (K, N)
    b_f = b - o[None, :] @ w                           # (1, N)
    k, n = w.shape
    w_pad = jnp.zeros((K_PAD, n), jnp.float32).at[:k, :].set(w_f)
    return w_pad.astype(jnp.bfloat16), b_f


def prepare_params(params):
    """One-time: fold normalization into frozen weights, pad K, cast to bf16."""
    # ResNet path mirrors the reference: NO /255 before (x - mean)/std.
    rw, rb = _fold_backbone(params["res_w"], params["res_b"], 1.0)
    # Inception path divides by 255 before normalize.
    iw, ib = _fold_backbone(params["inc_w"], params["inc_b"], 1.0 / 255.0)
    return {
        "w": jnp.stack([rw, iw]),   # (2, K_PAD, FEAT_DIM) bf16
        "b": jnp.stack([rb, ib]),   # (2, 1, FEAT_DIM)     f32
    }


def init_params(key):
    k_dim = 3 * PATCH * PATCH
    k1, k2, k3, k4 = jax.random.split(key, 4)
    scale = 1.0 / jnp.sqrt(jnp.float32(k_dim))
    return {
        "res_w": jax.random.normal(k1, (k_dim, FEAT_DIM), jnp.float32) * scale,
        "res_b": jax.random.normal(k2, (1, FEAT_DIM), jnp.float32) * 0.01,
        "inc_w": jax.random.normal(k3, (k_dim, FEAT_DIM), jnp.float32) * scale,
        "inc_b": jax.random.normal(k4, (1, FEAT_DIM), jnp.float32) * 0.01,
    }


def visual_feature_extractor(frames, prepared):
    """frames: (F, H, W, 3) float32 raw pixel values in [0, 255]."""
    if frames.shape[0] == 0:
        return jnp.zeros((2 * FEAT_DIM,), jnp.float32)

    f = frames.shape[0]
    # per-path resize (cv2.resize stand-in, glue)
    res_in = jax.image.resize(frames, (f, RESNET_HW, RESNET_HW, 3), "bilinear")
    inc_in = jax.image.resize(frames, (f, INCEPTION_HW, INCEPTION_HW, 3), "bilinear")

    res_p = extract_patches(res_in, PATCH)     # (f*16, 48)
    inc_p = extract_patches(inc_in, PATCH)     # (f*36, 48)
    r_res, r_inc = res_p.shape[0], inc_p.shape[0]
    k = res_p.shape[1]
    r_pad = ((max(r_res, r_inc) + SLAB - 1) // SLAB) * SLAB

    # Stack both backbones; zero-pad rows to a common multiple-of-16 count and
    # K to 128 (padded rows are masked in-kernel; padded K hits zero weights).
    x = jnp.zeros((2, r_pad, K_PAD), jnp.bfloat16)
    x = x.at[0, :r_res, :k].set(res_p.astype(jnp.bfloat16))
    x = x.at[1, :r_inc, :k].set(inc_p.astype(jnp.bfloat16))
    rows = jnp.array([r_res, r_inc], jnp.int32)

    feats = fused_stem_gap(rows, x, prepared["w"], prepared["b"])  # (2,1,2048)
    return feats.reshape(-1)   # [resnet_2048, inception_2048] -> (4096,) f32


# -------------------- pure-JAX reference (unfused, f32) --------------------

def _reference(frames, params):
    f = frames.shape[0]
    mean = jnp.array(IMAGENET_MEAN, jnp.float32)
    std = jnp.array(IMAGENET_STD, jnp.float32)

    def path(x, scale, w, b):
        x = (x * scale - mean) / std
        p = extract_patches(x, PATCH)
        act = jnp.maximum(p @ w + b, 0.0)
        return jnp.mean(act, axis=0)

    res_in = jax.image.resize(frames, (f, RESNET_HW, RESNET_HW, 3), "bilinear")
    inc_in = jax.image.resize(frames, (f, INCEPTION_HW, INCEPTION_HW, 3), "bilinear")
    r = path(res_in, 1.0, params["res_w"], params["res_b"])
    i = path(inc_in, 1.0 / 255.0, params["inc_w"], params["inc_b"])
    return jnp.concatenate([r, i])


if __name__ == "__main__":
    key = jax.random.PRNGKey(0)
    k_frames, k_params = jax.random.split(key)

    # 2 "video frames" of raw pixels in [0, 255]
    frames = jax.random.uniform(
        k_frames, (2, 20, 20, 3), jnp.float32, minval=0.0, maxval=255.0)
    params = init_params(k_params)

    # Weights are frozen: fold normalization + bf16 cast once, outside the
    # per-call path.
    prepared = prepare_params(params)
    prepared = jax.tree_util.tree_map(jax.block_until_ready, prepared)

    feats = jax.jit(visual_feature_extractor)(frames, prepared)
    feats = jax.block_until_ready(feats)

    assert feats.shape == (2 * FEAT_DIM,), feats.shape
    assert feats.dtype == jnp.float32
    assert bool(jnp.all(jnp.isfinite(feats)))

    # Validate the fused / folded / bf16 path against the unfused f32
    # reference (loose tolerance accounts for bf16 MXU operands).
    ref = _reference(frames, params)
    rel_err = jnp.max(jnp.abs(feats - ref)) / (jnp.max(jnp.abs(ref)) + 1e-6)
    assert bool(rel_err < 2e-2), float(rel_err)

    print("KERNEL_OK")
</pallas_src>

<mosaic_0001>
module attributes {stable_mosaic.version = 11 : i64} {
  func.func @_fused_stem_gap_kernel(%arg0: i32, %arg1: i32, %arg2: memref<2xi32, #tpu.memory_space<smem>>, %arg3: memref<1x80x128xbf16, #tpu.memory_space<vmem>>, %arg4: memref<1x128x2048xbf16, #tpu.memory_space<vmem>>, %arg5: memref<1x1x2048xf32, #tpu.memory_space<vmem>>, %arg6: memref<1x1x2048xf32, #tpu.memory_space<vmem>>) attributes {dimension_semantics = [#tpu.dimension_semantics<parallel>, #tpu.dimension_semantics<parallel>], iteration_bounds = array<i64: 2, 1>, scalar_prefetch = 1 : i64, scratch_operands = 0 : i64, tpu.core_type = #tpu.core_type<tc>, window_params = [{transform_indices = @transform_0, window_bounds = array<i64: 1, 80, 128>}, {transform_indices = @transform_1, window_bounds = array<i64: 1, 128, 2048>}, {transform_indices = @transform_2, window_bounds = array<i64: 1, 1, 2048>}, {transform_indices = @transform_3, window_bounds = array<i64: 1, 1, 2048>}]} {
    %0 = arith.index_cast %arg0 : i32 to index
    %1 = memref.load %arg2[%0] : memref<2xi32, #tpu.memory_space<smem>>
    %cst = arith.constant 0.000000e+00 : f32
    %2 = vector.broadcast %cst : f32 to vector<1x2048xf32>
    %c0_i32 = arith.constant 0 : i32
    %c16_i32 = arith.constant 16 : i32
    %3 = arith.muli %c0_i32, %c16_i32 : i32
    %4 = tpu.assume_multiple %3, 16 : i32
    %c0 = arith.constant 0 : index
    %5 = arith.index_cast %4 : i32 to index
    %c0_0 = arith.constant 0 : index
    %6 = vector.load %arg3[%c0, %5, %c0_0] : memref<1x80x128xbf16, #tpu.memory_space<vmem>>, vector<1x16x128xbf16>
    %7 = vector.shape_cast %6 : vector<1x16x128xbf16> to vector<16x128xbf16>
    %c0_1 = arith.constant 0 : index
    %c0_2 = arith.constant 0 : index
    %c0_3 = arith.constant 0 : index
    %8 = vector.load %arg4[%c0_1, %c0_2, %c0_3] : memref<1x128x2048xbf16, #tpu.memory_space<vmem>>, vector<1x128x2048xbf16>
    %9 = vector.shape_cast %8 : vector<1x128x2048xbf16> to vector<128x2048xbf16>
    %cst_4 = arith.constant dense<0.000000e+00> : vector<16x2048xf32>
    %10 = tpu.matmul %7, %9, %cst_4 {dimension_numbers = #tpu.dot_dimension_numbers<[1], [0], [0], [1], [0, 0, 1, 1], [], []>} : vector<16x128xbf16>, vector<128x2048xbf16>, vector<16x2048xf32> -> vector<16x2048xf32>
    %c0_5 = arith.constant 0 : index
    %c0_6 = arith.constant 0 : index
    %c0_7 = arith.constant 0 : index
    %11 = vector.load %arg5[%c0_5, %c0_6, %c0_7] : memref<1x1x2048xf32, #tpu.memory_space<vmem>>, vector<1x1x2048xf32>
    %12 = vector.shape_cast %11 : vector<1x1x2048xf32> to vector<1x2048xf32>
    %13 = vector.broadcast %12 : vector<1x2048xf32> to vector<16x2048xf32>
    %14 = arith.addf %10, %13 : vector<16x2048xf32>
    %cst_8 = arith.constant 0.000000e+00 : f32
    %15 = vector.broadcast %cst_8 : f32 to vector<16x2048xf32>
    %16 = arith.maximumf %14, %15 : vector<16x2048xf32>
    %17 = tpu.iota {dimensions = array<i32: 0>} : vector<16x1xi32>
    %18 = vector.broadcast %4 : i32 to vector<16x1xi32>
    %19 = arith.addi %18, %17 : vector<16x1xi32>
    %20 = vector.broadcast %1 : i32 to vector<16x1xi32>
    %21 = arith.cmpi slt, %19, %20 : vector<16x1xi32>
    %cst_9 = arith.constant 0.000000e+00 : f32
    %22 = vector.shape_cast %21 : vector<16x1xi1> to vector<16x1xi1>
    %23 = vector.broadcast %22 : vector<16x1xi1> to vector<16x2048xi1>
    %24 = vector.broadcast %cst_9 : f32 to vector<16x2048xf32>
    %25 = arith.select %23, %16, %24 : vector<16x2048xi1>, vector<16x2048xf32>
    %cst_10 = arith.constant dense<0.000000e+00> : vector<2048xf32>
    %26 = vector.multi_reduction <add>, %25, %cst_10 [0] : vector<16x2048xf32> to vector<2048xf32>
    %27 = vector.shape_cast %26 : vector<2048xf32> to vector<1x2048xf32>
    %28 = arith.addf %2, %27 : vector<1x2048xf32>
    %c1_i32 = arith.constant 1 : i32
    %c16_i32_11 = arith.constant 16 : i32
    %29 = arith.muli %c1_i32, %c16_i32_11 : i32
    %30 = tpu.assume_multiple %29, 16 : i32
    %c0_12 = arith.constant 0 : index
    %31 = arith.index_cast %30 : i32 to index
    %c0_13 = arith.constant 0 : index
    %32 = vector.load %arg3[%c0_12, %31, %c0_13] : memref<1x80x128xbf16, #tpu.memory_space<vmem>>, vector<1x16x128xbf16>
    %33 = vector.shape_cast %32 : vector<1x16x128xbf16> to vector<16x128xbf16>
    %c0_14 = arith.constant 0 : index
    %c0_15 = arith.constant 0 : index
    %c0_16 = arith.constant 0 : index
    %34 = vector.load %arg4[%c0_14, %c0_15, %c0_16] : memref<1x128x2048xbf16, #tpu.memory_space<vmem>>, vector<1x128x2048xbf16>
    %35 = vector.shape_cast %34 : vector<1x128x2048xbf16> to vector<128x2048xbf16>
    %cst_17 = arith.constant dense<0.000000e+00> : vector<16x2048xf32>
    %36 = tpu.matmul %33, %35, %cst_17 {dimension_numbers = #tpu.dot_dimension_numbers<[1], [0], [0], [1], [0, 0, 1, 1], [], []>} : vector<16x128xbf16>, vector<128x2048xbf16>, vector<16x2048xf32> -> vector<16x2048xf32>
    %c0_18 = arith.constant 0 : index
    %c0_19 = arith.constant 0 : index
    %c0_20 = arith.constant 0 : index
    %37 = vector.load %arg5[%c0_18, %c0_19, %c0_20] : memref<1x1x2048xf32, #tpu.memory_space<vmem>>, vector<1x1x2048xf32>
    %38 = vector.shape_cast %37 : vector<1x1x2048xf32> to vector<1x2048xf32>
    %39 = vector.broadcast %38 : vector<1x2048xf32> to vector<16x2048xf32>
    %40 = arith.addf %36, %39 : vector<16x2048xf32>
    %cst_21 = arith.constant 0.000000e+00 : f32
    %41 = vector.broadcast %cst_21 : f32 to vector<16x2048xf32>
    %42 = arith.maximumf %40, %41 : vector<16x2048xf32>
    %43 = tpu.iota {dimensions = array<i32: 0>} : vector<16x1xi32>
    %44 = vector.broadcast %30 : i32 to vector<16x1xi32>
    %45 = arith.addi %44, %43 : vector<16x1xi32>
    %46 = vector.broadcast %1 : i32 to vector<16x1xi32>
    %47 = arith.cmpi slt, %45, %46 : vector<16x1xi32>
    %cst_22 = arith.constant 0.000000e+00 : f32
    %48 = vector.shape_cast %47 : vector<16x1xi1> to vector<16x1xi1>
    %49 = vector.broadcast %48 : vector<16x1xi1> to vector<16x2048xi1>
    %50 = vector.broadcast %cst_22 : f32 to vector<16x2048xf32>
    %51 = arith.select %49, %42, %50 : vector<16x2048xi1>, vector<16x2048xf32>
    %cst_23 = arith.constant dense<0.000000e+00> : vector<2048xf32>
    %52 = vector.multi_reduction <add>, %51, %cst_23 [0] : vector<16x2048xf32> to vector<2048xf32>
    %53 = vector.shape_cast %52 : vector<2048xf32> to vector<1x2048xf32>
    %54 = arith.addf %28, %53 : vector<1x2048xf32>
    %c2_i32 = arith.constant 2 : i32
    %c16_i32_24 = arith.constant 16 : i32
    %55 = arith.muli %c2_i32, %c16_i32_24 : i32
    %56 = tpu.assume_multiple %55, 16 : i32
    %c0_25 = arith.constant 0 : index
    %57 = arith.index_cast %56 : i32 to index
    %c0_26 = arith.constant 0 : index
    %58 = vector.load %arg3[%c0_25, %57, %c0_26] : memref<1x80x128xbf16, #tpu.memory_space<vmem>>, vector<1x16x128xbf16>
    %59 = vector.shape_cast %58 : vector<1x16x128xbf16> to vector<16x128xbf16>
    %c0_27 = arith.constant 0 : index
    %c0_28 = arith.constant 0 : index
    %c0_29 = arith.constant 0 : index
    %60 = vector.load %arg4[%c0_27, %c0_28, %c0_29] : memref<1x128x2048xbf16, #tpu.memory_space<vmem>>, vector<1x128x2048xbf16>
    %61 = vector.shape_cast %60 : vector<1x128x2048xbf16> to vector<128x2048xbf16>
    %cst_30 = arith.constant dense<0.000000e+00> : vector<16x2048xf32>
    %62 = tpu.matmul %59, %61, %cst_30 {dimension_numbers = #tpu.dot_dimension_numbers<[1], [0], [0], [1], [0, 0, 1, 1], [], []>} : vector<16x128xbf16>, vector<128x2048xbf16>, vector<16x2048xf32> -> vector<16x2048xf32>
    %c0_31 = arith.constant 0 : index
    %c0_32 = arith.constant 0 : index
    %c0_33 = arith.constant 0 : index
    %63 = vector.load %arg5[%c0_31, %c0_32, %c0_33] : memref<1x1x2048xf32, #tpu.memory_space<vmem>>, vector<1x1x2048xf32>
    %64 = vector.shape_cast %63 : vector<1x1x2048xf32> to vector<1x2048xf32>
    %65 = vector.broadcast %64 : vector<1x2048xf32> to vector<16x2048xf32>
    %66 = arith.addf %62, %65 : vector<16x2048xf32>
    %cst_34 = arith.constant 0.000000e+00 : f32
    %67 = vector.broadcast %cst_34 : f32 to vector<16x2048xf32>
    %68 = arith.maximumf %66, %67 : vector<16x2048xf32>
    %69 = tpu.iota {dimensions = array<i32: 0>} : vector<16x1xi32>
    %70 = vector.broadcast %56 : i32 to vector<16x1xi32>
    %71 = arith.addi %70, %69 : vector<16x1xi32>
    %72 = vector.broadcast %1 : i32 to vector<16x1xi32>
    %73 = arith.cmpi slt, %71, %72 : vector<16x1xi32>
    %cst_35 = arith.constant 0.000000e+00 : f32
    %74 = vector.shape_cast %73 : vector<16x1xi1> to vector<16x1xi1>
    %75 = vector.broadcast %74 : vector<16x1xi1> to vector<16x2048xi1>
    %76 = vector.broadcast %cst_35 : f32 to vector<16x2048xf32>
    %77 = arith.select %75, %68, %76 : vector<16x2048xi1>, vector<16x2048xf32>
    %cst_36 = arith.constant dense<0.000000e+00> : vector<2048xf32>
    %78 = vector.multi_reduction <add>, %77, %cst_36 [0] : vector<16x2048xf32> to vector<2048xf32>
    %79 = vector.shape_cast %78 : vector<2048xf32> to vector<1x2048xf32>
    %80 = arith.addf %54, %79 : vector<1x2048xf32>
    %c3_i32 = arith.constant 3 : i32
    %c16_i32_37 = arith.constant 16 : i32
    %81 = arith.muli %c3_i32, %c16_i32_37 : i32
    %82 = tpu.assume_multiple %81, 16 : i32
    %c0_38 = arith.constant 0 : index
    %83 = arith.index_cast %82 : i32 to index
    %c0_39 = arith.constant 0 : index
    %84 = vector.load %arg3[%c0_38, %83, %c0_39] : memref<1x80x128xbf16, #tpu.memory_space<vmem>>, vector<1x16x128xbf16>
    %85 = vector.shape_cast %84 : vector<1x16x128xbf16> to vector<16x128xbf16>
    %c0_40 = arith.constant 0 : index
    %c0_41 = arith.constant 0 : index
    %c0_42 = arith.constant 0 : index
    %86 = vector.load %arg4[%c0_40, %c0_41, %c0_42] : memref<1x128x2048xbf16, #tpu.memory_space<vmem>>, vector<1x128x2048xbf16>
    %87 = vector.shape_cast %86 : vector<1x128x2048xbf16> to vector<128x2048xbf16>
    %cst_43 = arith.constant dense<0.000000e+00> : vector<16x2048xf32>
    %88 = tpu.matmul %85, %87, %cst_43 {dimension_numbers = #tpu.dot_dimension_numbers<[1], [0], [0], [1], [0, 0, 1, 1], [], []>} : vector<16x128xbf16>, vector<128x2048xbf16>, vector<16x2048xf32> -> vector<16x2048xf32>
    %c0_44 = arith.constant 0 : index
    %c0_45 = arith.constant 0 : index
    %c0_46 = arith.constant 0 : index
    %89 = vector.load %arg5[%c0_44, %c0_45, %c0_46] : memref<1x1x2048xf32, #tpu.memory_space<vmem>>, vector<1x1x2048xf32>
    %90 = vector.shape_cast %89 : vector<1x1x2048xf32> to vector<1x2048xf32>
    %91 = vector.broadcast %90 : vector<1x2048xf32> to vector<16x2048xf32>
    %92 = arith.addf %88, %91 : vector<16x2048xf32>
    %cst_47 = arith.constant 0.000000e+00 : f32
    %93 = vector.broadcast %cst_47 : f32 to vector<16x2048xf32>
    %94 = arith.maximumf %92, %93 : vector<16x2048xf32>
    %95 = tpu.iota {dimensions = array<i32: 0>} : vector<16x1xi32>
    %96 = vector.broadcast %82 : i32 to vector<16x1xi32>
    %97 = arith.addi %96, %95 : vector<16x1xi32>
    %98 = vector.broadcast %1 : i32 to vector<16x1xi32>
    %99 = arith.cmpi slt, %97, %98 : vector<16x1xi32>
    %cst_48 = arith.constant 0.000000e+00 : f32
    %100 = vector.shape_cast %99 : vector<16x1xi1> to vector<16x1xi1>
    %101 = vector.broadcast %100 : vector<16x1xi1> to vector<16x2048xi1>
    %102 = vector.broadcast %cst_48 : f32 to vector<16x2048xf32>
    %103 = arith.select %101, %94, %102 : vector<16x2048xi1>, vector<16x2048xf32>
    %cst_49 = arith.constant dense<0.000000e+00> : vector<2048xf32>
    %104 = vector.multi_reduction <add>, %103, %cst_49 [0] : vector<16x2048xf32> to vector<2048xf32>
    %105 = vector.shape_cast %104 : vector<2048xf32> to vector<1x2048xf32>
    %106 = arith.addf %80, %105 : vector<1x2048xf32>
    %c4_i32 = arith.constant 4 : i32
    %c16_i32_50 = arith.constant 16 : i32
    %107 = arith.muli %c4_i32, %c16_i32_50 : i32
    %108 = tpu.assume_multiple %107, 16 : i32
    %c0_51 = arith.constant 0 : index
    %109 = arith.index_cast %108 : i32 to index
    %c0_52 = arith.constant 0 : index
    %110 = vector.load %arg3[%c0_51, %109, %c0_52] : memref<1x80x128xbf16, #tpu.memory_space<vmem>>, vector<1x16x128xbf16>
    %111 = vector.shape_cast %110 : vector<1x16x128xbf16> to vector<16x128xbf16>
    %c0_53 = arith.constant 0 : index
    %c0_54 = arith.constant 0 : index
    %c0_55 = arith.constant 0 : index
    %112 = vector.load %arg4[%c0_53, %c0_54, %c0_55] : memref<1x128x2048xbf16, #tpu.memory_space<vmem>>, vector<1x128x2048xbf16>
    %113 = vector.shape_cast %112 : vector<1x128x2048xbf16> to vector<128x2048xbf16>
    %cst_56 = arith.constant dense<0.000000e+00> : vector<16x2048xf32>
    %114 = tpu.matmul %111, %113, %cst_56 {dimension_numbers = #tpu.dot_dimension_numbers<[1], [0], [0], [1], [0, 0, 1, 1], [], []>} : vector<16x128xbf16>, vector<128x2048xbf16>, vector<16x2048xf32> -> vector<16x2048xf32>
    %c0_57 = arith.constant 0 : index
    %c0_58 = arith.constant 0 : index
    %c0_59 = arith.constant 0 : index
    %115 = vector.load %arg5[%c0_57, %c0_58, %c0_59] : memref<1x1x2048xf32, #tpu.memory_space<vmem>>, vector<1x1x2048xf32>
    %116 = vector.shape_cast %115 : vector<1x1x2048xf32> to vector<1x2048xf32>
    %117 = vector.broadcast %116 : vector<1x2048xf32> to vector<16x2048xf32>
    %118 = arith.addf %114, %117 : vector<16x2048xf32>
    %cst_60 = arith.constant 0.000000e+00 : f32
    %119 = vector.broadcast %cst_60 : f32 to vector<16x2048xf32>
    %120 = arith.maximumf %118, %119 : vector<16x2048xf32>
    %121 = tpu.iota {dimensions = array<i32: 0>} : vector<16x1xi32>
    %122 = vector.broadcast %108 : i32 to vector<16x1xi32>
    %123 = arith.addi %122, %121 : vector<16x1xi32>
    %124 = vector.broadcast %1 : i32 to vector<16x1xi32>
    %125 = arith.cmpi slt, %123, %124 : vector<16x1xi32>
    %cst_61 = arith.constant 0.000000e+00 : f32
    %126 = vector.shape_cast %125 : vector<16x1xi1> to vector<16x1xi1>
    %127 = vector.broadcast %126 : vector<16x1xi1> to vector<16x2048xi1>
    %128 = vector.broadcast %cst_61 : f32 to vector<16x2048xf32>
    %129 = arith.select %127, %120, %128 : vector<16x2048xi1>, vector<16x2048xf32>
    %cst_62 = arith.constant dense<0.000000e+00> : vector<2048xf32>
    %130 = vector.multi_reduction <add>, %129, %cst_62 [0] : vector<16x2048xf32> to vector<2048xf32>
    %131 = vector.shape_cast %130 : vector<2048xf32> to vector<1x2048xf32>
    %132 = arith.addf %106, %131 : vector<1x2048xf32>
    %c5_i32 = arith.constant 5 : i32
    %133 = arith.sitofp %1 : i32 to f32
    %134 = vector.broadcast %133 : f32 to vector<1x2048xf32>
    %135 = arith.divf %132, %134 : vector<1x2048xf32>
    %c0_63 = arith.constant 0 : index
    %c0_64 = arith.constant 0 : index
    %c0_65 = arith.constant 0 : index
    %136 = vector.load %arg6[%c0_63, %c0_64, %c0_65] : memref<1x1x2048xf32, #tpu.memory_space<vmem>>, vector<1x1x2048xf32>
    %137 = vector.shape_cast %136 : vector<1x1x2048xf32> to vector<1x2048xf32>
    %138 = vector.shape_cast %135 : vector<1x2048xf32> to vector<1x1x2048xf32>
    tpu.vector_store %arg6[%c0_63, %c0_64, %c0_65], %138 {strides = array<i32>} : memref<1x1x2048xf32, #tpu.memory_space<vmem>>, vector<1x1x2048xf32>,
    return
  }
  func.func @transform_0(%arg0: i32, %arg1: i32, %arg2: memref<2xi32, #tpu.memory_space<smem>>) -> (i32, i32, i32) {
    %c0_i32 = arith.constant 0 : i32
    %c0_i32_0 = arith.constant 0 : i32
    %c0_i32_1 = arith.constant 0 : i32
    return %arg0, %c0_i32, %c0_i32_0 : i32, i32, i32
  }
  func.func @transform_1(%arg0: i32, %arg1: i32, %arg2: memref<2xi32, #tpu.memory_space<smem>>) -> (i32, i32, i32) {
    %c0_i32 = arith.constant 0 : i32
    %c0_i32_0 = arith.constant 0 : i32
    return %arg0, %c0_i32, %arg1 : i32, i32, i32
  }
  func.func @transform_2(%arg0: i32, %arg1: i32, %arg2: memref<2xi32, #tpu.memory_space<smem>>) -> (i32, i32, i32) {
    %c0_i32 = arith.constant 0 : i32
    %c0_i32_0 = arith.constant 0 : i32
    return %arg0, %c0_i32, %arg1 : i32, i32, i32
  }
  func.func @transform_3(%arg0: i32, %arg1: i32, %arg2: memref<2xi32, #tpu.memory_space<smem>>) -> (i32, i32, i32) {
    %c0_i32 = arith.constant 0 : i32
    %c0_i32_0 = arith.constant 0 : i32
    return %arg0, %c0_i32, %arg1 : i32, i32, i32
  }
}

</mosaic_0001>

<bundles_post_ra>
// kernel: visual_feature_extractor.1
= control target key start
LH: loop header
LB: loop body
LE: loop exit
PB: predicated region body
PF: predicated region fallthrough
CT: control target
= control target key end

     0   :  { %s6664_s0 = inlined_call_operand.vmem [shape: s32[2], index: 0, kind: input, shape index: {}]   ;;  %s6665_s1 = inlined_call_operand.vmem [shape: bf16[2,80,128], index: 1, kind: input, shape index: {}]   ;;  %s6666_s2 = inlined_call_operand.vmem [shape: bf16[2,128,2048], index: 2, kind: input, shape index: {}]   ;;  %s6667_s3 = inlined_call_operand.vmem [shape: f32[2,1,2048], index: 3, kind: input, shape index: {}]   ;;  %s6668_s4 = inlined_call_operand.hbm [shape: f32[2,1,2048], index: 4, kind: output, shape index: {}]  }
   0x1   :  { %s9_s17 = sshll.u32 %s6664_s0, 4  ;;  %s10_s17 = int_to_ptr.vmem [resolvable:$true] %s9_s17 }
   0x2   :  { %s4368_s18 = scalar_lea.vmem %s10_s17, 16  ;;  %p4373_p1 = scmp.lt.s32.totalorder %s10_s17, %s10_s17 }
   0x3   :  { %p4369_p0 = scmp.ne.s32.totalorder %s10_s17, %s4368_s18  ;;  %p4374_p2 = scmp.lt.s32.totalorder %s4368_s18, %s4368_s18 }
   0x5   :  { %p4375_p3 = por %p4374_p2, %p4373_p1 }
   0x7   :  { %p4376_p4 = pnand %p4375_p3, %p4369_p0 }
   0x9   :  { %4379 = shalt.err (!%p4376_p4)  }
   0xa   :  { %s4460_s19 = smov [#allocation3]  }
   0xb   :  { %12 = dma.vmem_to_smem %s10_s17, 16, %s4460_s19, [#allocation2] }
   0xc   :  { %4430 = dma.done.wait [#allocation2], 16 }
   0xd   :  { %4431 = vsyncadd [#allocation2], 4294967280 }
   0xe   :  { %14 = sfence }
   0xf   :  { %15 = vsyncpa [#allocation5], 0 }
  0x10   :  { %17 = vsyncpa [#allocation5 + $0x1], 0  ;;  %s4492_s20 = smov 0   ;;  %s4494_s21 = smov 0  }
  0x11   :  { %s4496_s0 = smov 0   ;;  %s4498_s22 = smov 0  }
  0x12   :  { %s4500_s23 = smov 0   ;;  %s4502_s24 = smov 0  }
  0x13 LB: > { %s4144_s25 = sadd.s32 4294967295, %s4458_s24   ;;  %s4145_s26 = sadd.s32 4294967294, %s4458_s24   ;;  %s4458_s24 = sphi %s4502_s24, %s23_s24   ;;  %s4454_s23 = sphi %s4500_s23, %s7618_s23   ;;  %s4450_s22 = sphi %s4498_s22, %s7617_s22   ;;  %s4446_s0 = sphi %s4496_s0, %s7616_s0   ;;  %s4442_s21 = sphi %s4494_s21, %s7615_s21   ;;  %s4438_s20 = sphi %s4492_s20, %s7614_s20  }
  0x14   : > { %s35_s27 = sadd.s32 1, %s4454_s23  ;;  %s126_s28 = sadd.s32 1, %s4446_s0 }
  0x15   : > { %p37_p5 = scmp.ge.s32.totalorder %s35_s27, 2  ;;  %p136_p6 = scmp.ne.s32.totalorder %s4446_s0, %s4442_s21 }
  0x16   : > { %p137_p7 = scmp.eq.s32.totalorder %s4144_s25, 1  ;;  %p142_p8 = scmp.ne.s32.totalorder %s4442_s21, %s4438_s20 }
  0x17   : > { %s7620_s27 = smov (%p37_p5, %s35_s27), 0  ;;  %p143_p10 = scmp.eq.s32.totalorder %s4145_s26, 1 }
  0x18   : > { %p4532_p9 = por %p137_p7, %p136_p6  ;;  %s121_s30 = ssub.s32 %s4454_s23, %s7620_s27 }
  0x19   : > { %p4148_p11 = scmp.ge.s32.totalorder %s4458_s24, 1  ;;  %p124_p12 = scmp.eq.s32.totalorder %s121_s30, 0 }
  0x1a   : > { %p4539_p13 = por %p143_p10, %p142_p8  ;;  %p194_p0 = scmp.lt.s32.totalorder %s4458_s24, 3 }
  0x1b   : > { %s4545_s6 = scalar_select %p124_p12, %s4446_s0, %s126_s28  }
  0x1c   : > { %p195_p1 = pnand %p4148_p11, %p194_p0 }
  0x1e   : > { %198 = sbr.rel (%p195_p1) target bundleno = 930 (0x3a2), region = 32 }
  0x23   : > { %p235_p2 = scmp.lt.s32.totalorder %s4450_s22, 1  ;;  %v6669_v0 = vmov 0   ;;  %s5254_s25 = sld [smem:[#allocation3 + %s4450_s22]] }
  0x24   : > { %1154 = vmatprep.mubr.bf16.mxu0 %v6669_v0  ;;  %1197 = vmatprep.mubr.bf16.mxu1 %v6669_v0  ;;  %s232_s28 = sand.u32 1, %s4442_s21  }
  0x25   : > { %s4551_s7 = scalar_select %p235_p2, %s4450_s22, 1 }
  0x26   : > { %s4149_s30 = sshll.u32 %s232_s28, 4  ;;  %s4025_s13 = scalar_lea.sflag [#allocation5], %s232_s28 }
  0x27   : > { %s4300_s8 = sshll.u32 %s4551_s7, 10  ;;  %s4302_s12 = smul.u32 40, %s4551_s7 }
  0x28   : > { %s4557_s11 = scalar_lea.vmem %s6666_s2, %s4300_s8  ;;  %s4153_s16 = sshll.u32 %s4551_s7, 4 }
  0x29   : > { %v376_v1 = vld [vmem:[%s4557_s11 + $0x380] sm:$0xff]  ;;  %v377_v3 = vld [vmem:[%s4557_s11 + $0x388] sm:$0xff]  ;;  %s4614_s15 = scalar_lea.vmem %s6665_s1, %s4302_s12  ;;  %v378_v63 = vld [vmem:[%s4557_s11 + $0x390] sm:$0xff]  ;;  %s5136_s19 = scalar_lea.vmem %s6667_s3, %s4153_s16 }
  0x2a   : > { %v384_v2 = vld [vmem:[%s4557_s11 + $0x3c0] sm:$0xff]  ;;  %v385_v5 = vld [vmem:[%s4557_s11 + $0x3c8] sm:$0xff]  ;;  %s3887_s26 = scvt.s32.f32 %s5254_s25  ;;  %s6558_s7 = scalar_lea.vmem [#allocation4], %s4149_s30 }
  0x2b   : > { %v4562_v4 = vcombine.high %v376_v1, %v384_v2  ;;  %v4565_v6 = vcombine.low %v376_v1, %v384_v2  ;;  %v360_v7 = vld [vmem:[%s4557_s11 + $0x300] sm:$0xff]  ;;  %v4569_v9 = vcombine.high %v377_v3, %v385_v5  ;;  %v4571_v10 = vcombine.low %v377_v3, %v385_v5  ;;  %v361_v12 = vld [vmem:[%s4557_s11 + $0x308] sm:$0xff]  ;;  %v386_v1 = vld [vmem:[%s4557_s11 + $0x3d0] sm:$0xff]  ;;  %s4301_s8 = sshll.u32 %s4450_s22, 8  ;;  %s4041_s9 = sshll.u32 %s6558_s7, 4  ;;  %s4042_s9 = int_to_ptr.vmem [resolvable:$true] %s4041_s9 }
  0x2c   : > { %v368_v8 = vld [vmem:[%s4557_s11 + $0x340] sm:$0xff]  ;;  %v369_v13 = vld [vmem:[%s4557_s11 + $0x348] sm:$0xff]  ;;  %v379_v2 = vld [vmem:[%s4557_s11 + $0x398] sm:$0xff]  ;;  %s4039_s12 = scalar_lea.hbm %s6668_s4, %s4301_s8  ;;  %s4380_s14 = scalar_lea.vmem %s4042_s9, 256 }
  0x2d   : > { %6986 = vst [vmem:[#allocation8_spill] sm:$0xff] %v4562_v4  ;;  %6987 = vst [vmem:[#allocation9_spill] sm:$0xff] %v4565_v6  ;;  %v4573_v11 = vcombine.high %v360_v7, %v368_v8  ;;  %v344_v14 = vld [vmem:[%s4557_s11 + $0x280] sm:$0xff]  ;;  %1122 = vmatprep.subr.bf16.mxu0 %v4562_v4  ;;  %v4579_v15 = vcombine.high %v361_v12, %v369_v13  ;;  %v345_v17 = vld [vmem:[%s4557_s11 + $0x288] sm:$0xff]  ;;  %1165 = vmatprep.subr.bf16.mxu1 %v4569_v9  ;;  %p4381_p3 = scmp.ne.s32.totalorder %s4042_s9, %s4380_s14  ;;  %s4463_s22 = smov [#allocation4]  }
  0x2e   : > { %6988 = vst [vmem:[#allocation10_spill] sm:$0xff] %v4569_v9  ;;  %6989 = vst [vmem:[#allocation11_spill] sm:$0xff] %v4571_v10  ;;  %v352_v16 = vld [vmem:[%s4557_s11 + $0x2c0] sm:$0xff]  ;;  %v353_v18 = vld [vmem:[%s4557_s11 + $0x2c8] sm:$0xff]  ;;  %1123 = vmatpush1.bf16.msra.mxu0 %v4565_v6  ;;  %v4586_v19 = vcombine.low %v360_v7, %v368_v8  ;;  %1166 = vmatpush1.bf16.msra.mxu1 %v4571_v10  ;;  %v4590_v20 = vcombine.low %v361_v12, %v369_v13 }
  0x2f   : > { %6990 = vst [vmem:[#allocation12_spill] sm:$0xff] %v4573_v11  ;;  %6991 = vst [vmem:[#allocation13_spill] sm:$0xff] %v4579_v15  ;;  %1124 = vmatprep.subr.bf16.mxu0 %v4573_v11  ;;  %v4592_v21 = vcombine.high %v344_v14, %v352_v16  ;;  %1167 = vmatprep.subr.bf16.mxu1 %v4579_v15  ;;  %v4596_v22 = vcombine.high %v345_v17, %v353_v18  ;;  %v328_v23 = vld [vmem:[%s4557_s11 + $0x200] sm:$0xff]  ;;  %v329_v25 = vld [vmem:[%s4557_s11 + $0x208] sm:$0xff]  ;;  %p4382_p4 = pnand %p4381_p3, %p4532_p9 }
  0x30   : > { %6992 = vst [vmem:[#allocation14_spill] sm:$0xff] %v4586_v19  ;;  %6993 = vst [vmem:[#allocation15_spill] sm:$0xff] %v4590_v20  ;;  %v336_v24 = vld [vmem:[%s4557_s11 + $0x240] sm:$0xff]  ;;  %v337_v26 = vld [vmem:[%s4557_s11 + $0x248] sm:$0xff]  ;;  %v4603_v27 = vcombine.low %v344_v14, %v352_v16  ;;  %v4607_v28 = vcombine.low %v345_v17, %v353_v18  ;;  %v4694_v8 = vcombine.high %v378_v63, %v386_v1 }
  0x31   : > { %6994 = vst [vmem:[#allocation16_spill] sm:$0xff] %v4592_v21  ;;  %6995 = vst [vmem:[#allocation17_spill] sm:$0xff] %v4596_v22  ;;  %v4609_v29 = vcombine.high %v328_v23, %v336_v24  ;;  %v4617_v30 = vcombine.high %v329_v25, %v337_v26  ;;  %v312_v31 = vld [vmem:[%s4557_s11 + $0x180] sm:$0xff]  ;;  %v313_v33 = vld [vmem:[%s4557_s11 + $0x188] sm:$0xff]  ;;  %v4624_v35 = vcombine.low %v328_v23, %v336_v24  ;;  %p4383_p5 = pneg %p4382_p4 }
  0x32   : > { %1125 = vmatpush1.bf16.msra.mxu0 %v4586_v19  ;;  %6996 = vst [vmem:[#allocation18_spill] sm:$0xff] %v4603_v27  ;;  %1168 = vmatpush1.bf16.msra.mxu1 %v4590_v20  ;;  %6997 = vst [vmem:[#allocation19_spill] sm:$0xff] %v4607_v28  ;;  %v320_v32 = vld [vmem:[%s4557_s11 + $0x1c0] sm:$0xff]  ;;  %v321_v34 = vld [vmem:[%s4557_s11 + $0x1c8] sm:$0xff]  ;;  %v4628_v36 = vcombine.low %v329_v25, %v337_v26  ;;  %v4707_v23 = vcombine.low %v378_v63, %v386_v1 }
  0x33   : > { %1126 = vmatprep.subr.bf16.mxu0 %v4592_v21  ;;  %6998 = vst [vmem:[#allocation20_spill] sm:$0xff] %v4609_v29  ;;  %1169 = vmatprep.subr.bf16.mxu1 %v4596_v22  ;;  %6999 = vst [vmem:[#allocation21_spill] sm:$0xff] %v4617_v30  ;;  %v4630_v37 = vcombine.high %v312_v31, %v320_v32  ;;  %v4633_v38 = vcombine.high %v313_v33, %v321_v34  ;;  %v296_v39 = vld [vmem:[%s4557_s11 + $0x100] sm:$0xff]  ;;  %v297_v41 = vld [vmem:[%s4557_s11 + $0x108] sm:$0xff] }
  0x34   : > { %7000 = vst [vmem:[#allocation22_spill] sm:$0xff] %v4624_v35  ;;  %7001 = vst [vmem:[#allocation23_spill] sm:$0xff] %v4628_v36  ;;  %v304_v40 = vld [vmem:[%s4557_s11 + $0x140] sm:$0xff]  ;;  %v305_v42 = vld [vmem:[%s4557_s11 + $0x148] sm:$0xff]  ;;  %v4640_v43 = vcombine.low %v312_v31, %v320_v32  ;;  %v4644_v44 = vcombine.low %v313_v33, %v321_v34 }
  0x35   : > { %7002 = vst [vmem:[#allocation24_spill] sm:$0xff] %v4630_v37  ;;  %7003 = vst [vmem:[#allocation25_spill] sm:$0xff] %v4633_v38  ;;  %v4646_v45 = vcombine.high %v296_v39, %v304_v40  ;;  %v4649_v46 = vcombine.high %v297_v41, %v305_v42  ;;  %v280_v47 = vld [vmem:[%s4557_s11 + $0x80] sm:$0xff]  ;;  %v281_v49 = vld [vmem:[%s4557_s11 + $0x88] sm:$0xff]  ;;  %v4656_v51 = vcombine.low %v296_v39, %v304_v40 }
  0x36   : > { %1127 = vmatpush1.bf16.msra.mxu0 %v4603_v27  ;;  %1170 = vmatpush1.bf16.msra.mxu1 %v4607_v28  ;;  %7004 = vst [vmem:[#allocation26_spill] sm:$0xff] %v4640_v43  ;;  %7005 = vst [vmem:[#allocation27_spill] sm:$0xff] %v4644_v44  ;;  %v288_v48 = vld [vmem:[%s4557_s11 + $0xc0] sm:$0xff]  ;;  %v289_v50 = vld [vmem:[%s4557_s11 + $0xc8] sm:$0xff]  ;;  %v4660_v52 = vcombine.low %v297_v41, %v305_v42 }
  0x37   : > { %1128 = vmatprep.subr.bf16.mxu0 %v4609_v29  ;;  %1171 = vmatprep.subr.bf16.mxu1 %v4617_v30  ;;  %7006 = vst [vmem:[#allocation28_spill] sm:$0xff] %v4646_v45  ;;  %7007 = vst [vmem:[#allocation29_spill] sm:$0xff] %v4649_v46  ;;  %v4662_v53 = vcombine.high %v280_v47, %v288_v48  ;;  %v4665_v54 = vcombine.high %v281_v49, %v289_v50  ;;  %v264_v55 = vld [vmem:[%s4557_s11] sm:$0xff]  ;;  %v265_v57 = vld [vmem:[%s4557_s11 + $0x8] sm:$0xff] }
  0x38   : > { %7008 = vst [vmem:[#allocation30_spill] sm:$0xff] %v4656_v51  ;;  %7009 = vst [vmem:[#allocation31_spill] sm:$0xff] %v4660_v52  ;;  %v272_v56 = vld [vmem:[%s4557_s11 + $0x40] sm:$0xff]  ;;  %v273_v58 = vld [vmem:[%s4557_s11 + $0x48] sm:$0xff]  ;;  %v4672_v59 = vcombine.low %v280_v47, %v288_v48  ;;  %v4676_v60 = vcombine.low %v281_v49, %v289_v50 }
  0x39   : > { %7010 = vst [vmem:[#allocation32_spill] sm:$0xff] %v4662_v53  ;;  %7011 = vst [vmem:[#allocation33_spill] sm:$0xff] %v4665_v54  ;;  %v4678_v61 = vcombine.high %v264_v55, %v272_v56  ;;  %v4681_v62 = vcombine.high %v265_v57, %v273_v58  ;;  %v387_v3 = vld [vmem:[%s4557_s11 + $0x3d8] sm:$0xff]  ;;  %v4688_v5 = vcombine.low %v264_v55, %v272_v56  ;;  %v362_v13 = vld [vmem:[%s4557_s11 + $0x310] sm:$0xff] }
  0x3a   : > { %1129 = vmatpush1.bf16.msra.mxu0 %v4624_v35  ;;  %1172 = vmatpush1.bf16.msra.mxu1 %v4628_v36  ;;  %7012 = vst [vmem:[#allocation34_spill] sm:$0xff] %v4672_v59  ;;  %7013 = vst [vmem:[#allocation35_spill] sm:$0xff] %v4676_v60  ;;  %v4692_v7 = vcombine.low %v265_v57, %v273_v58  ;;  %v4697_v12 = vcombine.high %v379_v2, %v387_v3  ;;  %v370_v14 = vld [vmem:[%s4557_s11 + $0x350] sm:$0xff]  ;;  %v4702_v16 = vld [vmem:[%s4614_s15] sm:$0xff]  }
  0x3b   : > { %1130 = vmatprep.subr.bf16.mxu0 %v4630_v37  ;;  %1173 = vmatprep.subr.bf16.mxu1 %v4633_v38  ;;  %7014 = vst [vmem:[#allocation36_spill] sm:$0xff] %v4678_v61  ;;  %7015 = vst [vmem:[#allocation37_spill] sm:$0xff] %v4681_v62  ;;  %v363_v17 = vld [vmem:[%s4557_s11 + $0x318] sm:$0xff]  ;;  %v4711_v24 = vcombine.low %v379_v2, %v387_v3  ;;  %v4713_v25 = vcombine.high %v362_v13, %v370_v14  ;;  %v346_v31 = vld [vmem:[%s4557_s11 + $0x290] sm:$0xff] }
  0x3c   : > { %7016 = vst [vmem:[#allocation38_spill] sm:$0xff] %v4688_v5  ;;  %7017 = vst [vmem:[#allocation39_spill] sm:$0xff] %v4692_v7  ;;  %v371_v18 = vld [vmem:[%s4557_s11 + $0x358] sm:$0xff]  ;;  %v354_v32 = vld [vmem:[%s4557_s11 + $0x2d0] sm:$0xff]  ;;  %v4725_v39 = vcombine.low %v362_v13, %v370_v14 }
  0x3d   : > { %7018 = vst [vmem:[#allocation40_spill] sm:$0xff] %v4694_v8  ;;  %7019 = vst [vmem:[#allocation41_spill] sm:$0xff] %v4697_v12  ;;  %v4716_v26 = vcombine.high %v363_v17, %v371_v18  ;;  %v347_v33 = vld [vmem:[%s4557_s11 + $0x298] sm:$0xff]  ;;  %v4729_v40 = vcombine.low %v363_v17, %v371_v18  ;;  %v4731_v41 = vcombine.high %v346_v31, %v354_v32  ;;  %v330_v47 = vld [vmem:[%s4557_s11 + $0x210] sm:$0xff] }
  0x3e   : > { %1131 = vmatpush1.bf16.msra.mxu0 %v4640_v43  ;;  %1174 = vmatpush1.bf16.msra.mxu1 %v4644_v44  ;;  %7020 = vst [vmem:[#allocation42_spill] sm:$0xff] %v4707_v23  ;;  %7021 = vst [vmem:[#allocation43_spill] sm:$0xff] %v4711_v24  ;;  %v355_v34 = vld [vmem:[%s4557_s11 + $0x2d8] sm:$0xff]  ;;  %v338_v48 = vld [vmem:[%s4557_s11 + $0x250] sm:$0xff]  ;;  %v4743_v55 = vcombine.low %v346_v31, %v354_v32 }
  0x3f   : > { %1132 = vmatprep.subr.bf16.mxu0 %v4646_v45  ;;  %1175 = vmatprep.subr.bf16.mxu1 %v4649_v46  ;;  %7022 = vst [vmem:[#allocation44_spill] sm:$0xff] %v4713_v25  ;;  %7023 = vst [vmem:[#allocation45_spill] sm:$0xff] %v4716_v26  ;;  %v4734_v42 = vcombine.high %v347_v33, %v355_v34  ;;  %v331_v49 = vld [vmem:[%s4557_s11 + $0x218] sm:$0xff]  ;;  %v4747_v56 = vcombine.low %v347_v33, %v355_v34  ;;  %v314_v63 = vld [vmem:[%s4557_s11 + $0x190] sm:$0xff] }
  0x40   : > { %7024 = vst [vmem:[#allocation46_spill] sm:$0xff] %v4725_v39  ;;  %7025 = vst [vmem:[#allocation47_spill] sm:$0xff] %v4729_v40  ;;  %v339_v50 = vld [vmem:[%s4557_s11 + $0x258] sm:$0xff]  ;;  %v4749_v57 = vcombine.high %v330_v47, %v338_v48  ;;  %v322_v1 = vld [vmem:[%s4557_s11 + $0x1d0] sm:$0xff]  ;;  %v4759_v13 = vcombine.low %v330_v47, %v338_v48 }
  0x41   : > { %7026 = vst [vmem:[#allocation48_spill] sm:$0xff] %v4731_v41  ;;  %7027 = vst [vmem:[#allocation49_spill] sm:$0xff] %v4734_v42  ;;  %v4752_v58 = vcombine.high %v331_v49, %v339_v50  ;;  %v315_v2 = vld [vmem:[%s4557_s11 + $0x198] sm:$0xff]  ;;  %v298_v14 = vld [vmem:[%s4557_s11 + $0x110] sm:$0xff]  ;;  %v4764_v17 = vcombine.low %v331_v49, %v339_v50  ;;  %v4766_v18 = vcombine.high %v314_v63, %v322_v1 }
  0x42   : > { %1133 = vmatpush1.bf16.msra.mxu0 %v4656_v51  ;;  %1176 = vmatpush1.bf16.msra.mxu1 %v4660_v52  ;;  %7028 = vst [vmem:[#allocation50_spill] sm:$0xff] %v4743_v55  ;;  %7029 = vst [vmem:[#allocation51_spill] sm:$0xff] %v4747_v56  ;;  %v323_v3 = vld [vmem:[%s4557_s11 + $0x1d8] sm:$0xff]  ;;  %v306_v32 = vld [vmem:[%s4557_s11 + $0x150] sm:$0xff]  ;;  %v4775_v47 = vcombine.low %v314_v63, %v322_v1 }
  0x43   : > { %1134 = vmatprep.subr.bf16.mxu0 %v4662_v53  ;;  %1177 = vmatprep.subr.bf16.mxu1 %v4665_v54  ;;  %7030 = vst [vmem:[#allocation52_spill] sm:$0xff] %v4749_v57  ;;  %7031 = vst [vmem:[#allocation53_spill] sm:$0xff] %v4752_v58  ;;  %v4769_v31 = vcombine.high %v315_v2, %v323_v3  ;;  %v299_v33 = vld [vmem:[%s4557_s11 + $0x118] sm:$0xff]  ;;  %v4779_v48 = vcombine.low %v315_v2, %v323_v3 }
  0x44   : > { %7032 = vst [vmem:[#allocation54_spill] sm:$0xff] %v4759_v13  ;;  %7033 = vst [vmem:[#allocation55_spill] sm:$0xff] %v4764_v17  ;;  %v307_v34 = vld [vmem:[%s4557_s11 + $0x158] sm:$0xff]  ;;  %v4781_v49 = vcombine.high %v298_v14, %v306_v32 }
  0x45   : > { %7034 = vst [vmem:[#allocation56_spill] sm:$0xff] %v4766_v18  ;;  %7035 = vst [vmem:[#allocation57_spill] sm:$0xff] %v4769_v31  ;;  %v4784_v50 = vcombine.high %v299_v33, %v307_v34  ;;  %v283_v63 = vld [vmem:[%s4557_s11 + $0x98] sm:$0xff]  ;;  %v4795_v2 = vcombine.low %v299_v33, %v307_v34 }
  0x46   : > { %1135 = vmatpush1.bf16.msra.mxu0 %v4672_v59  ;;  %1178 = vmatpush1.bf16.msra.mxu1 %v4676_v60  ;;  %7036 = vst [vmem:[#allocation58_spill] sm:$0xff] %v4775_v47  ;;  %7037 = vst [vmem:[#allocation59_spill] sm:$0xff] %v4779_v48  ;;  %v291_v1 = vld [vmem:[%s4557_s11 + $0xd8] sm:$0xff] }
  0x47   : > { %1136 = vmatprep.subr.bf16.mxu0 %v4678_v61  ;;  %1179 = vmatprep.subr.bf16.mxu1 %v4681_v62  ;;  %7038 = vst [vmem:[#allocation60_spill] sm:$0xff] %v4781_v49  ;;  %7039 = vst [vmem:[#allocation61_spill] sm:$0xff] %v4784_v50  ;;  %v4811_v33 = vcombine.low %v283_v63, %v291_v1 }
  0x48   : > { %7041 = vst [vmem:[#allocation63_spill] sm:$0xff] %v4795_v2 }
  0x49   : > { %7045 = vst [vmem:[#allocation67_spill] sm:$0xff] %v4811_v33 }
  0x4a   : > { %1137 = vmatpush1.bf16.msra.mxu0 %v4688_v5  ;;  %1180 = vmatpush1.bf16.msra.mxu1 %v4692_v7 }
  0x4b   : > { %1208 = vmatprep.subr.bf16.mxu0 %v4694_v8  ;;  %1251 = vmatprep.subr.bf16.mxu1 %v4697_v12 }
  0x4d   : > { %1155 = vmatmul.mubr.bf16.vlgmr.msra.gmra.mxu0 %v4702_v16  ;;  %1198 = vmatmul.mubr.bf16.vlgmr.msra.gmra.mxu1 %v4702_v16 }
  0x4e   : > { %1209 = vmatpush1.bf16.msra.mxu0 %v4707_v23  ;;  %1252 = vmatpush1.bf16.msra.mxu1 %v4711_v24 }
  0x4f   : > { %1210 = vmatprep.subr.bf16.mxu0 %v4713_v25  ;;  %1253 = vmatprep.subr.bf16.mxu1 %v4716_v26 }
  0x50   : > { %1240 = vmatprep.mubr.bf16.mxu0 %v6669_v0  ;;  %1283 = vmatprep.mubr.bf16.mxu1 %v6669_v0  ;;  %v282_v0 = vld [vmem:[%s4557_s11 + $0x90] sm:$0xff] }
  0x52   : > { %1211 = vmatpush1.bf16.msra.mxu0 %v4725_v39  ;;  %1254 = vmatpush1.bf16.msra.mxu1 %v4729_v40 }
  0x53   : > { %1212 = vmatprep.subr.bf16.mxu0 %v4731_v41  ;;  %1255 = vmatprep.subr.bf16.mxu1 %v4734_v42 }
  0x56   : > { %1213 = vmatpush1.bf16.msra.mxu0 %v4743_v55  ;;  %1256 = vmatpush1.bf16.msra.mxu1 %v4747_v56  ;;  %v271_v56 = vld [vmem:[%s4557_s11 + $0x38] sm:$0xff] }
  0x57   : > { %1214 = vmatprep.subr.bf16.mxu0 %v4749_v57  ;;  %1257 = vmatprep.subr.bf16.mxu1 %v4752_v58  ;;  %v356_v58 = vld [vmem:[%s4557_s11 + $0x2e0] sm:$0xff]  ;;  %v358_v57 = vld [vmem:[%s4557_s11 + $0x2f0] sm:$0xff]  ;;  %v279_v55 = vld [vmem:[%s4557_s11 + $0x78] sm:$0xff] }
  0x5a   : > { %1215 = vmatpush1.bf16.msra.mxu0 %v4759_v13  ;;  %1258 = vmatpush1.bf16.msra.mxu1 %v4764_v17  ;;  %v290_v13 = vld [vmem:[%s4557_s11 + $0xd0] sm:$0xff]  ;;  %v4791_v17 = vcombine.low %v298_v14, %v306_v32  ;;  %v267_v14 = vld [vmem:[%s4557_s11 + $0x18] sm:$0xff] }
  0x5b   : > { %1216 = vmatprep.subr.bf16.mxu0 %v4766_v18  ;;  %1259 = vmatprep.subr.bf16.mxu1 %v4769_v31  ;;  %v4797_v3 = vcombine.high %v282_v0, %v290_v13  ;;  %v4800_v31 = vcombine.high %v283_v63, %v291_v1  ;;  %v266_v18 = vld [vmem:[%s4557_s11 + $0x10] sm:$0xff]  ;;  %v275_v32 = vld [vmem:[%s4557_s11 + $0x58] sm:$0xff] }
  0x5c   : > { %7040 = vst [vmem:[#allocation62_spill] sm:$0xff] %v4791_v17  ;;  %v4827_v63 = vcombine.low %v267_v14, %v275_v32 }
  0x5d   : > { %7042 = vst [vmem:[#allocation64_spill] sm:$0xff] %v4797_v3  ;;  %7043 = vst [vmem:[#allocation65_spill] sm:$0xff] %v4800_v31 }
  0x5e   : > { %1217 = vmatpush1.bf16.msra.mxu0 %v4775_v47  ;;  %1260 = vmatpush1.bf16.msra.mxu1 %v4779_v48  ;;  %v274_v47 = vld [vmem:[%s4557_s11 + $0x50] sm:$0xff]  ;;  %v4807_v48 = vcombine.low %v282_v0, %v290_v13  ;;  %v381_v0 = vld [vmem:[%s4557_s11 + $0x3a8] sm:$0xff]  ;;  %7049 = vst [vmem:[#allocation71_spill] sm:$0xff] %v4827_v63 }
  0x5f   : > { %1218 = vmatprep.subr.bf16.mxu0 %v4781_v49  ;;  %1261 = vmatprep.subr.bf16.mxu1 %v4784_v50  ;;  %v4813_v34 = vcombine.high %v266_v18, %v274_v47  ;;  %v4816_v50 = vcombine.high %v267_v14, %v275_v32  ;;  %v380_v49 = vld [vmem:[%s4557_s11 + $0x3a0] sm:$0xff]  ;;  %v389_v13 = vld [vmem:[%s4557_s11 + $0x3e8] sm:$0xff] }
  0x60   : > { %7044 = vst [vmem:[#allocation66_spill] sm:$0xff] %v4807_v48  ;;  %v4843_v14 = vcombine.low %v381_v0, %v389_v13 }
  0x61   : > { %7046 = vst [vmem:[#allocation68_spill] sm:$0xff] %v4813_v34  ;;  %7047 = vst [vmem:[#allocation69_spill] sm:$0xff] %v4816_v50 }
  0x62   : > { %1219 = vmatpush1.bf16.msra.mxu0 %v4791_v17  ;;  %1262 = vmatpush1.bf16.msra.mxu1 %v4795_v2  ;;  %v388_v17 = vld [vmem:[%s4557_s11 + $0x3e0] sm:$0xff]  ;;  %v4823_v2 = vcombine.low %v266_v18, %v274_v47  ;;  %v365_v18 = vld [vmem:[%s4557_s11 + $0x328] sm:$0xff]  ;;  %7053 = vst [vmem:[#allocation75_spill] sm:$0xff] %v4843_v14 }
  0x63   : > { %1220 = vmatprep.subr.bf16.mxu0 %v4797_v3  ;;  %1263 = vmatprep.subr.bf16.mxu1 %v4800_v31  ;;  %v4829_v1 = vcombine.high %v380_v49, %v388_v17  ;;  %v4832_v31 = vcombine.high %v381_v0, %v389_v13  ;;  %v364_v3 = vld [vmem:[%s4557_s11 + $0x320] sm:$0xff]  ;;  %v373_v47 = vld [vmem:[%s4557_s11 + $0x368] sm:$0xff] }
  0x64   : > { %7048 = vst [vmem:[#allocation70_spill] sm:$0xff] %v4823_v2  ;;  %v4861_v13 = vcombine.low %v365_v18, %v373_v47 }
  0x65   : > { %7050 = vst [vmem:[#allocation72_spill] sm:$0xff] %v4829_v1  ;;  %7051 = vst [vmem:[#allocation73_spill] sm:$0xff] %v4832_v31 }
  0x66   : > { %1221 = vmatpush1.bf16.msra.mxu0 %v4807_v48  ;;  %1264 = vmatpush1.bf16.msra.mxu1 %v4811_v33  ;;  %v372_v48 = vld [vmem:[%s4557_s11 + $0x360] sm:$0xff]  ;;  %v4839_v33 = vcombine.low %v380_v49, %v388_v17  ;;  %v349_v17 = vld [vmem:[%s4557_s11 + $0x2a8] sm:$0xff]  ;;  %7057 = vst [vmem:[#allocation79_spill] sm:$0xff] %v4861_v13 }
  0x67   : > { %1222 = vmatprep.subr.bf16.mxu0 %v4813_v34  ;;  %1265 = vmatprep.subr.bf16.mxu1 %v4816_v50  ;;  %v4845_v32 = vcombine.high %v364_v3, %v372_v48  ;;  %v4848_v50 = vcombine.high %v365_v18, %v373_v47  ;;  %v348_v34 = vld [vmem:[%s4557_s11 + $0x2a0] sm:$0xff]  ;;  %v357_v49 = vld [vmem:[%s4557_s11 + $0x2e8] sm:$0xff]  ;;  %v4857_v0 = vcombine.low %v364_v3, %v372_v48 }
  0x68   : > { %7052 = vst [vmem:[#allocation74_spill] sm:$0xff] %v4839_v33  ;;  %v333_v48 = vld [vmem:[%s4557_s11 + $0x228] sm:$0xff]  ;;  %v4875_v18 = vcombine.low %v348_v34, %v356_v58  ;;  %v4879_v47 = vcombine.low %v349_v17, %v357_v49 }
  0x69   : > { %7054 = vst [vmem:[#allocation76_spill] sm:$0xff] %v4845_v32  ;;  %7055 = vst [vmem:[#allocation77_spill] sm:$0xff] %v4848_v50  ;;  %v341_v3 = vld [vmem:[%s4557_s11 + $0x268] sm:$0xff] }
  0x6a   : > { %1223 = vmatpush1.bf16.msra.mxu0 %v4823_v2  ;;  %1266 = vmatpush1.bf16.msra.mxu1 %v4827_v63  ;;  %7056 = vst [vmem:[#allocation78_spill] sm:$0xff] %v4857_v0  ;;  %v332_v63 = vld [vmem:[%s4557_s11 + $0x220] sm:$0xff]  ;;  %7061 = vst [vmem:[#allocation82_spill] sm:$0xff] %v4875_v18 }
  0x6b   : > { %1294 = vmatprep.subr.bf16.mxu0 %v4829_v1  ;;  %1337 = vmatprep.subr.bf16.mxu1 %v4832_v31  ;;  %v4863_v31 = vcombine.high %v348_v34, %v356_v58  ;;  %v4866_v1 = vcombine.high %v349_v17, %v357_v49  ;;  %v340_v2 = vld [vmem:[%s4557_s11 + $0x260] sm:$0xff]  ;;  %7062 = vst [vmem:[#allocation83_spill] sm:$0xff] %v4879_v47  ;;  %v317_v58 = vld [vmem:[%s4557_s11 + $0x1a8] sm:$0xff] }
  0x6c   : > { %v325_v34 = vld [vmem:[%s4557_s11 + $0x1e8] sm:$0xff]  ;;  %v4895_v17 = vcombine.low %v333_v48, %v341_v3 }
  0x6d   : > { %1241 = vmatmul.mubr.bf16.vlgmr.msra.gmra.mxu0 %v4702_v16  ;;  %1284 = vmatmul.mubr.bf16.vlgmr.msra.gmra.mxu1 %v4702_v16  ;;  %7058 = vst [vmem:[#allocation80_spill] sm:$0xff] %v4863_v31  ;;  %7059 = vst [vmem:[#allocation81_spill] sm:$0xff] %v4866_v1 }
  0x6e   : > { %1295 = vmatpush1.bf16.msra.mxu0 %v4839_v33  ;;  %1338 = vmatpush1.bf16.msra.mxu1 %v4843_v14  ;;  %v7060_v33 = vmov 0   ;;  %v316_v14 = vld [vmem:[%s4557_s11 + $0x1a0] sm:$0xff]  ;;  %7066 = vst [vmem:[#allocation87_spill] sm:$0xff] %v4895_v17 }
  0x6f   : > { %1296 = vmatprep.subr.bf16.mxu0 %v4845_v32  ;;  %1339 = vmatprep.subr.bf16.mxu1 %v4848_v50  ;;  %v4881_v50 = vcombine.high %v332_v63, %v340_v2  ;;  %v4884_v32 = vcombine.high %v333_v48, %v341_v3  ;;  %v4911_v48 = vcombine.low %v317_v58, %v325_v34 }
  0x70   : > { %1326 = vmatprep.mubr.bf16.mxu0 %v7060_v33  ;;  %1369 = vmatprep.mubr.bf16.mxu1 %v7060_v33 }
  0x71   : > { %7063 = vst [vmem:[#allocation84_spill] sm:$0xff] %v4881_v50  ;;  %7064 = vst [vmem:[#allocation85_spill] sm:$0xff] %v4884_v32 }
  0x72   : > { %1297 = vmatpush1.bf16.msra.mxu0 %v4857_v0  ;;  %1340 = vmatpush1.bf16.msra.mxu1 %v4861_v13  ;;  %v324_v0 = vld [vmem:[%s4557_s11 + $0x1e0] sm:$0xff]  ;;  %v4891_v13 = vcombine.low %v332_v63, %v340_v2  ;;  %v301_v2 = vld [vmem:[%s4557_s11 + $0x128] sm:$0xff]  ;;  %7070 = vst [vmem:[#allocation91_spill] sm:$0xff] %v4911_v48 }
  0x73   : > { %1298 = vmatprep.subr.bf16.mxu0 %v4863_v31  ;;  %1341 = vmatprep.subr.bf16.mxu1 %v4866_v1  ;;  %v4897_v49 = vcombine.high %v316_v14, %v324_v0  ;;  %v4900_v1 = vcombine.high %v317_v58, %v325_v34  ;;  %v300_v31 = vld [vmem:[%s4557_s11 + $0x120] sm:$0xff]  ;;  %v309_v63 = vld [vmem:[%s4557_s11 + $0x168] sm:$0xff] }
  0x74   : > { %7065 = vst [vmem:[#allocation86_spill] sm:$0xff] %v4891_v13  ;;  %v4927_v58 = vcombine.low %v301_v2, %v309_v63 }
  0x75   : > { %7067 = vst [vmem:[#allocation88_spill] sm:$0xff] %v4897_v49  ;;  %7068 = vst [vmem:[#allocation89_spill] sm:$0xff] %v4900_v1 }
  0x76   : > { %1299 = vmatpush1.bf16.msra.mxu0 %v4875_v18  ;;  %1342 = vmatpush1.bf16.msra.mxu1 %v4879_v47  ;;  %v308_v18 = vld [vmem:[%s4557_s11 + $0x160] sm:$0xff]  ;;  %v4907_v47 = vcombine.low %v316_v14, %v324_v0  ;;  %v285_v14 = vld [vmem:[%s4557_s11 + $0xa8] sm:$0xff]  ;;  %7074 = vst [vmem:[#allocation95_spill] sm:$0xff] %v4927_v58 }
  0x77   : > { %1300 = vmatprep.subr.bf16.mxu0 %v4881_v50  ;;  %1343 = vmatprep.subr.bf16.mxu1 %v4884_v32  ;;  %v4913_v3 = vcombine.high %v300_v31, %v308_v18  ;;  %v4916_v32 = vcombine.high %v301_v2, %v309_v63  ;;  %v284_v50 = vld [vmem:[%s4557_s11 + $0xa0] sm:$0xff]  ;;  %v293_v0 = vld [vmem:[%s4557_s11 + $0xe8] sm:$0xff] }
  0x78   : > { %7069 = vst [vmem:[#allocation90_spill] sm:$0xff] %v4907_v47  ;;  %v4943_v2 = vcombine.low %v285_v14, %v293_v0 }
  0x79   : > { %7071 = vst [vmem:[#allocation92_spill] sm:$0xff] %v4913_v3  ;;  %7072 = vst [vmem:[#allocation93_spill] sm:$0xff] %v4916_v32 }
  0x7a   : > { %1301 = vmatpush1.bf16.msra.mxu0 %v4891_v13  ;;  %1344 = vmatpush1.bf16.msra.mxu1 %v4895_v17  ;;  %v292_v13 = vld [vmem:[%s4557_s11 + $0xe0] sm:$0xff]  ;;  %v4923_v17 = vcombine.low %v300_v31, %v308_v18  ;;  %v269_v31 = vld [vmem:[%s4557_s11 + $0x28] sm:$0xff]  ;;  %7078 = vst [vmem:[#allocation99_spill] sm:$0xff] %v4943_v2 }
  0x7b   : > { %1302 = vmatprep.subr.bf16.mxu0 %v4897_v49  ;;  %1345 = vmatprep.subr.bf16.mxu1 %v4900_v1  ;;  %v4929_v34 = vcombine.high %v284_v50, %v292_v13  ;;  %v4932_v1 = vcombine.high %v285_v14, %v293_v0  ;;  %v268_v49 = vld [vmem:[%s4557_s11 + $0x20] sm:$0xff]  ;;  %v277_v18 = vld [vmem:[%s4557_s11 + $0x68] sm:$0xff] }
  0x7c   : > { %7073 = vst [vmem:[#allocation94_spill] sm:$0xff] %v4923_v17  ;;  %v4959_v14 = vcombine.low %v269_v31, %v277_v18 }
  0x7d   : > { %7075 = vst [vmem:[#allocation96_spill] sm:$0xff] %v4929_v34  ;;  %7076 = vst [vmem:[#allocation97_spill] sm:$0xff] %v4932_v1 }
  0x7e   : > { %1303 = vmatpush1.bf16.msra.mxu0 %v4907_v47  ;;  %1346 = vmatpush1.bf16.msra.mxu1 %v4911_v48  ;;  %v276_v47 = vld [vmem:[%s4557_s11 + $0x60] sm:$0xff]  ;;  %v4939_v48 = vcombine.low %v284_v50, %v292_v13  ;;  %v383_v50 = vld [vmem:[%s4557_s11 + $0x3b8] sm:$0xff]  ;;  %7082 = vst [vmem:[#allocation103_spill] sm:$0xff] %v4959_v14 }
  0x7f   : > { %1304 = vmatprep.subr.bf16.mxu0 %v4913_v3  ;;  %1347 = vmatprep.subr.bf16.mxu1 %v4916_v32  ;;  %v4945_v63 = vcombine.high %v268_v49, %v276_v47  ;;  %v4948_v32 = vcombine.high %v269_v31, %v277_v18  ;;  %v382_v3 = vld [vmem:[%s4557_s11 + $0x3b0] sm:$0xff]  ;;  %v391_v13 = vld [vmem:[%s4557_s11 + $0x3f8] sm:$0xff] }
  0x80   : > { %7077 = vst [vmem:[#allocation98_spill] sm:$0xff] %v4939_v48  ;;  %v4975_v31 = vcombine.low %v383_v50, %v391_v13 }
  0x81   : > { %7079 = vst [vmem:[#allocation100_spill] sm:$0xff] %v4945_v63  ;;  %7080 = vst [vmem:[#allocation101_spill] sm:$0xff] %v4948_v32 }
  0x82   : > { %1305 = vmatpush1.bf16.msra.mxu0 %v4923_v17  ;;  %1348 = vmatpush1.bf16.msra.mxu1 %v4927_v58  ;;  %v390_v17 = vld [vmem:[%s4557_s11 + $0x3f0] sm:$0xff]  ;;  %v4955_v58 = vcombine.low %v268_v49, %v276_v47  ;;  %v367_v47 = vld [vmem:[%s4557_s11 + $0x338] sm:$0xff]  ;;  %7086 = vst [vmem:[#allocation107_spill] sm:$0xff] %v4975_v31 }
  0x83   : > { %1306 = vmatprep.subr.bf16.mxu0 %v4929_v34  ;;  %1349 = vmatprep.subr.bf16.mxu1 %v4932_v1  ;;  %v4961_v0 = vcombine.high %v382_v3, %v390_v17  ;;  %v4964_v1 = vcombine.high %v383_v50, %v391_v13  ;;  %v366_v34 = vld [vmem:[%s4557_s11 + $0x330] sm:$0xff]  ;;  %v375_v49 = vld [vmem:[%s4557_s11 + $0x378] sm:$0xff] }
  0x84   : > { %7081 = vst [vmem:[#allocation102_spill] sm:$0xff] %v4955_v58  ;;  %v4993_v13 = vcombine.low %v367_v47, %v375_v49 }
  0x85   : > { %7083 = vst [vmem:[#allocation104_spill] sm:$0xff] %v4961_v0  ;;  %7084 = vst [vmem:[#allocation105_spill] sm:$0xff] %v4964_v1 }
  0x86   : > { %1307 = vmatpush1.bf16.msra.mxu0 %v4939_v48  ;;  %1350 = vmatpush1.bf16.msra.mxu1 %v4943_v2  ;;  %v374_v48 = vld [vmem:[%s4557_s11 + $0x370] sm:$0xff]  ;;  %v4971_v2 = vcombine.low %v382_v3, %v390_v17  ;;  %v351_v17 = vld [vmem:[%s4557_s11 + $0x2b8] sm:$0xff]  ;;  %7090 = vst [vmem:[#allocation111_spill] sm:$0xff] %v4993_v13 }
  0x87   : > { %1308 = vmatprep.subr.bf16.mxu0 %v4945_v63  ;;  %1351 = vmatprep.subr.bf16.mxu1 %v4948_v32  ;;  %v4977_v18 = vcombine.high %v366_v34, %v374_v48  ;;  %v4980_v32 = vcombine.high %v367_v47, %v375_v49  ;;  %v350_v63 = vld [vmem:[%s4557_s11 + $0x2b0] sm:$0xff]  ;;  %v359_v3 = vld [vmem:[%s4557_s11 + $0x2f8] sm:$0xff]  ;;  %v4989_v50 = vcombine.low %v366_v34, %v374_v48 }
  0x88   : > { %7085 = vst [vmem:[#allocation106_spill] sm:$0xff] %v4971_v2  ;;  %v335_v48 = vld [vmem:[%s4557_s11 + $0x238] sm:$0xff]  ;;  %v5007_v47 = vcombine.low %v350_v63, %v358_v57  ;;  %v5011_v49 = vcombine.low %v351_v17, %v359_v3 }
  0x89   : > { %7087 = vst [vmem:[#allocation108_spill] sm:$0xff] %v4977_v18  ;;  %7088 = vst [vmem:[#allocation109_spill] sm:$0xff] %v4980_v32  ;;  %v343_v34 = vld [vmem:[%s4557_s11 + $0x278] sm:$0xff] }
  0x8a   : > { %1309 = vmatpush1.bf16.msra.mxu0 %v4955_v58  ;;  %1352 = vmatpush1.bf16.msra.mxu1 %v4959_v14  ;;  %7089 = vst [vmem:[#allocation110_spill] sm:$0xff] %v4989_v50  ;;  %v334_v14 = vld [vmem:[%s4557_s11 + $0x230] sm:$0xff]  ;;  %7093 = vst [vmem:[#allocation114_spill] sm:$0xff] %v5007_v47 }
  0x8b   : > { %1380 = vmatprep.subr.bf16.mxu0 %v4961_v0  ;;  %1423 = vmatprep.subr.bf16.mxu1 %v4964_v1  ;;  %v4995_v1 = vcombine.high %v350_v63, %v358_v57  ;;  %v4998_v0 = vcombine.high %v351_v17, %v359_v3  ;;  %v342_v58 = vld [vmem:[%s4557_s11 + $0x270] sm:$0xff]  ;;  %7094 = vst [vmem:[#allocation115_spill] sm:$0xff] %v5011_v49  ;;  %v319_v57 = vld [vmem:[%s4557_s11 + $0x1b8] sm:$0xff] }
  0x8c   : > { %v327_v63 = vld [vmem:[%s4557_s11 + $0x1f8] sm:$0xff]  ;;  %v5027_v17 = vcombine.low %v335_v48, %v343_v34 }
  0x8d   : > { %1327 = vmatmul.mubr.bf16.vlgmr.msra.gmra.mxu0 %v4702_v16  ;;  %1370 = vmatmul.mubr.bf16.vlgmr.msra.gmra.mxu1 %v4702_v16  ;;  %7091 = vst [vmem:[#allocation112_spill] sm:$0xff] %v4995_v1  ;;  %7092 = vst [vmem:[#allocation113_spill] sm:$0xff] %v4998_v0 }
  0x8e   : > { %1381 = vmatpush1.bf16.msra.mxu0 %v4971_v2  ;;  %1424 = vmatpush1.bf16.msra.mxu1 %v4975_v31  ;;  %v318_v31 = vld [vmem:[%s4557_s11 + $0x1b0] sm:$0xff]  ;;  %7098 = vst [vmem:[#allocation119_spill] sm:$0xff] %v5027_v17 }
  0x8f   : > { %1382 = vmatprep.subr.bf16.mxu0 %v4977_v18  ;;  %1425 = vmatprep.subr.bf16.mxu1 %v4980_v32  ;;  %v5013_v32 = vcombine.high %v334_v14, %v342_v58  ;;  %v5016_v18 = vcombine.high %v335_v48, %v343_v34  ;;  %v5043_v48 = vcombine.low %v319_v57, %v327_v63  ;;  %v278_v2 = vld [vmem:[%s4557_s11 + $0x70] sm:$0xff] }
  0x90   : > { %1412 = vmatprep.mubr.bf16.mxu0 %v7060_v33  ;;  %1455 = vmatprep.mubr.bf16.mxu1 %v7060_v33 }
  0x91   : > { %7095 = vst [vmem:[#allocation116_spill] sm:$0xff] %v5013_v32  ;;  %7096 = vst [vmem:[#allocation117_spill] sm:$0xff] %v5016_v18 }
  0x92   : > { %1383 = vmatpush1.bf16.msra.mxu0 %v4989_v50  ;;  %1426 = vmatpush1.bf16.msra.mxu1 %v4993_v13  ;;  %v326_v50 = vld [vmem:[%s4557_s11 + $0x1f0] sm:$0xff]  ;;  %v5023_v13 = vcombine.low %v334_v14, %v342_v58  ;;  %v303_v58 = vld [vmem:[%s4557_s11 + $0x138] sm:$0xff] }
  0x93   : > { %1384 = vmatprep.subr.bf16.mxu0 %v4995_v1  ;;  %1427 = vmatprep.subr.bf16.mxu1 %v4998_v0  ;;  %v5029_v3 = vcombine.high %v318_v31, %v326_v50  ;;  %v5032_v0 = vcombine.high %v319_v57, %v327_v63  ;;  %v302_v1 = vld [vmem:[%s4557_s11 + $0x130] sm:$0xff]  ;;  %v311_v14 = vld [vmem:[%s4557_s11 + $0x178] sm:$0xff] }
  0x94   : > { %7097 = vst [vmem:[#allocation118_spill] sm:$0xff] %v5023_v13  ;;  %v5059_v57 = vcombine.low %v303_v58, %v311_v14 }
  0x95   : > { %7099 = vst [vmem:[#allocation120_spill] sm:$0xff] %v5029_v3  ;;  %7100 = vst [vmem:[#allocation121_spill] sm:$0xff] %v5032_v0 }
  0x96   : > { %1385 = vmatpush1.bf16.msra.mxu0 %v5007_v47  ;;  %1428 = vmatpush1.bf16.msra.mxu1 %v5011_v49  ;;  %v310_v47 = vld [vmem:[%s4557_s11 + $0x170] sm:$0xff]  ;;  %v5039_v49 = vcombine.low %v318_v31, %v326_v50  ;;  %v287_v31 = vld [vmem:[%s4557_s11 + $0xb8] sm:$0xff] }
  0x97   : > { %1386 = vmatprep.subr.bf16.mxu0 %v5013_v32  ;;  %1429 = vmatprep.subr.bf16.mxu1 %v5016_v18  ;;  %v5045_v34 = vcombine.high %v302_v1, %v310_v47  ;;  %v5048_v18 = vcombine.high %v303_v58, %v311_v14  ;;  %v286_v32 = vld [vmem:[%s4557_s11 + $0xb0] sm:$0xff]  ;;  %v295_v50 = vld [vmem:[%s4557_s11 + $0xf8] sm:$0xff]  ;;  %v5080_v14 = vcombine.high %v271_v56, %v279_v55 }
  0x99   : > { %7101 = vst [vmem:[#allocation122_spill] sm:$0xff] %v5048_v18  ;;  %7104 = vst [vmem:[#allocation125_spill] sm:$0xff] %v5080_v14 }
  0x9a   : > { %1387 = vmatpush1.bf16.msra.mxu0 %v5023_v13  ;;  %1430 = vmatpush1.bf16.msra.mxu1 %v5027_v17  ;;  %v294_v13 = vld [vmem:[%s4557_s11 + $0xf0] sm:$0xff]  ;;  %v5055_v17 = vcombine.low %v302_v1, %v310_v47  ;;  %v5075_v47 = vcombine.low %v287_v31, %v295_v50 }
  0x9b   : > { %1388 = vmatprep.subr.bf16.mxu0 %v5029_v3  ;;  %1431 = vmatprep.subr.bf16.mxu1 %v5032_v0  ;;  %v5061_v63 = vcombine.high %v286_v32, %v294_v13  ;;  %v5064_v0 = vcombine.high %v287_v31, %v295_v50  ;;  %v270_v3 = vld [vmem:[%s4557_s11 + $0x30] sm:$0xff]  ;;  %v5071_v1 = vcombine.low %v286_v32, %v294_v13  ;;  %v393_v13 = vld [vmem:[%s5136_s19 + $0x8] sm:$0xff] }
  0x9c   : > { %7102 = vst [vmem:[#allocation123_spill] sm:$0xff] %v5075_v47  ;;  %v5077_v58 = vcombine.high %v270_v3, %v278_v2  ;;  %v5087_v32 = vcombine.low %v271_v56, %v279_v55  ;;  %v5130_v56 = vld [vmem:[%s4614_s15 + $0x8] sm:$0xff]  }
  0x9e   : > { %1389 = vmatpush1.bf16.msra.mxu0 %v5039_v49  ;;  %1432 = vmatpush1.bf16.msra.mxu1 %v5043_v48  ;;  %7103 = vst [vmem:[#allocation124_spill] sm:$0xff] %v5077_v58  ;;  %7106 = vst [vmem:[#allocation127_spill] sm:$0xff] %v5087_v32 }
  0x9f   : > { %1390 = vmatprep.subr.bf16.mxu0 %v5045_v34  ;;  %1433 = vmatprep.subr.bf16.mxu1 %v5048_v18  ;;  %v5083_v18 = vcombine.low %v270_v3, %v278_v2 }
  0xa1   : > { %7105 = vst [vmem:[#allocation126_spill] sm:$0xff] %v5083_v18 }
  0xa2   : > { %1391 = vmatpush1.bf16.msra.mxu0 %v5055_v17  ;;  %1434 = vmatpush1.bf16.msra.mxu1 %v5059_v57 }
  0xa3   : > { %1392 = vmatprep.subr.bf16.mxu0 %v5061_v63  ;;  %1435 = vmatprep.subr.bf16.mxu1 %v5064_v0 }
  0xa6   : > { %1393 = vmatpush1.bf16.msra.mxu0 %v5071_v1  ;;  %1436 = vmatpush1.bf16.msra.mxu1 %v5075_v47 }
  0xa7   : > { %1394 = vmatprep.subr.bf16.mxu0 %v5077_v58  ;;  %1437 = vmatprep.subr.bf16.mxu1 %v5080_v14 }
  0xaa   : > { %1395 = vmatpush1.bf16.msra.mxu0 %v5083_v18  ;;  %1438 = vmatpush1.bf16.msra.mxu1 %v5087_v32 }
  0xab   : > { %1680 = vmatprep.subr.bf16.mxu0 %v4562_v4  ;;  %1723 = vmatprep.subr.bf16.mxu1 %v4569_v9 }
  0xad   : > { %1413 = vmatmul.mubr.bf16.vlgmr.msra.gmra.mxu0 %v4702_v16  ;;  %1456 = vmatmul.mubr.bf16.vlgmr.msra.gmra.mxu1 %v4702_v16  ;;  %v396_v16 = vlaneseq }
  0xae   : > { %1681 = vmatpush1.bf16.msra.mxu0 %v4565_v6  ;;  %1724 = vmatpush1.bf16.msra.mxu1 %v4571_v10 }
  0xaf   : > { %1682 = vmatprep.subr.bf16.mxu0 %v4573_v11  ;;  %1725 = vmatprep.subr.bf16.mxu1 %v4579_v15  ;;  %v5123_v55 = vshrl.u32 %v396_v16, 7 }
  0xb0   : > { %1712 = vmatprep.mubr.bf16.mxu0 %v7060_v33  ;;  %1755 = vmatprep.mubr.bf16.mxu1 %v7060_v33 }
  0xb1   : > { %7107 = vst [vmem:[#allocation128_spill] sm:$0xff] %v5123_v55  ;;  %v6819_v2 = vsub.s32 0, %v5123_v55  ;;  %v6822_v3 = vsub.s32 2, %v5123_v55  ;;  %v6821_v50 = vsub.s32 1, %v5123_v55  ;;  %v6823_v16 = vsub.s32 3, %v5123_v55 }
  0xb2   : > { %1683 = vmatpush1.bf16.msra.mxu0 %v4586_v19  ;;  %1726 = vmatpush1.bf16.msra.mxu1 %v4590_v20 }
  0xb3   : > { %1684 = vmatprep.subr.bf16.mxu0 %v4592_v21  ;;  %1727 = vmatprep.subr.bf16.mxu1 %v4596_v22  ;;  %v5146_v31 = vrot.slane %v393_v13, %v6819_v2  ;;  %v5161_v2 = vrot.slane %v393_v13, %v6821_v50  ;;  %v7112_v50 = vld [vmem:[#allocation50_spill] sm:$0xff] }
  0xb5   : > { %7108 = vst [vmem:[#allocation129_spill] sm:$0xff] %v5146_v31  ;;  %7110 = vst [vmem:[#allocation131_spill] sm:$0xff] %v5161_v2  ;;  %v5165_v31 = vrot.slane %v393_v13, %v6823_v16  ;;  %v7114_v16 = vld [vmem:[#allocation52_spill] sm:$0xff]  ;;  %v7117_v2 = vld [vmem:[#allocation55_spill] sm:$0xff] }
  0xb6   : > { %1685 = vmatpush1.bf16.msra.mxu0 %v4603_v27  ;;  %1728 = vmatpush1.bf16.msra.mxu1 %v4607_v28 }
  0xb7   : > { %1686 = vmatprep.subr.bf16.mxu0 %v4609_v29  ;;  %1729 = vmatprep.subr.bf16.mxu1 %v4617_v30  ;;  %7111 = vst [vmem:[#allocation132_spill] sm:$0xff] %v5165_v31  ;;  %v7115_v31 = vld [vmem:[#allocation53_spill] sm:$0xff] }
  0xba   : > { %1687 = vmatpush1.bf16.msra.mxu0 %v4624_v35  ;;  %1730 = vmatpush1.bf16.msra.mxu1 %v4628_v36 }
  0xbb   : > { %1688 = vmatprep.subr.bf16.mxu0 %v4630_v37  ;;  %1731 = vmatprep.subr.bf16.mxu1 %v4633_v38 }
  0xbe   : > { %1689 = vmatpush1.bf16.msra.mxu0 %v4640_v43  ;;  %1732 = vmatpush1.bf16.msra.mxu1 %v4644_v44 }
  0xbf   : > { %1690 = vmatprep.subr.bf16.mxu0 %v4646_v45  ;;  %1733 = vmatprep.subr.bf16.mxu1 %v4649_v46 }
  0xc2   : > { %1691 = vmatpush1.bf16.msra.mxu0 %v4656_v51  ;;  %1734 = vmatpush1.bf16.msra.mxu1 %v4660_v52 }
  0xc3   : > { %1692 = vmatprep.subr.bf16.mxu0 %v4662_v53  ;;  %1735 = vmatprep.subr.bf16.mxu1 %v4665_v54  ;;  %v7193_v53 = vld [vmem:[#allocation113_spill] sm:$0xff] }
  0xc6   : > { %1693 = vmatpush1.bf16.msra.mxu0 %v4672_v59  ;;  %1736 = vmatpush1.bf16.msra.mxu1 %v4676_v60 }
  0xc7   : > { %1694 = vmatprep.subr.bf16.mxu0 %v4678_v61  ;;  %1737 = vmatprep.subr.bf16.mxu1 %v4681_v62  ;;  %v7186_v61 = vld [vmem:[#allocation110_spill] sm:$0xff] }
  0xca   : > { %1695 = vmatpush1.bf16.msra.mxu0 %v4688_v5  ;;  %1738 = vmatpush1.bf16.msra.mxu1 %v4692_v7  ;;  %v7185_v7 = vld [vmem:[#allocation109_spill] sm:$0xff] }
  0xcb   : > { %1766 = vmatprep.subr.bf16.mxu0 %v4694_v8  ;;  %1809 = vmatprep.subr.bf16.mxu1 %v4697_v12  ;;  %v5155_v8 = vrot.slane %v393_v13, %v6822_v3  ;;  %v7113_v3 = vld [vmem:[#allocation51_spill] sm:$0xff]  ;;  %v5291_v12 = vstv %s5254_s25 }
  0xcc   : > { %7184 = vst [vmem:[#allocation142_spill] sm:$0xff] %v5291_v12  ;;  %vm5302_vm0 = vcmp.lt.s32.totalorder %v5123_v55, %v5291_v12 }
  0xcd   : > { %1713 = vmatmul.mubr.bf16.vlgmr.msra.gmra.mxu0 %v5130_v56  ;;  %1756 = vmatmul.mubr.bf16.vlgmr.msra.gmra.mxu1 %v5130_v56  ;;  %7109 = vst [vmem:[#allocation130_spill] sm:$0xff] %v5155_v8  ;;  %v5287_v8 = vadd.s32 8, %v5123_v55 }
  0xce   : > { %1767 = vmatpush1.bf16.msra.mxu0 %v4707_v23  ;;  %1810 = vmatpush1.bf16.msra.mxu1 %v4711_v24  ;;  %v7181_v24 = vld [vmem:[#allocation107_spill] sm:$0xff]  ;;  %v7183_v23 = vld [vmem:[#allocation108_spill] sm:$0xff] }
  0xcf   : > { %1768 = vmatprep.subr.bf16.mxu0 %v4713_v25  ;;  %1811 = vmatprep.subr.bf16.mxu1 %v4716_v26  ;;  %v7116_v26 = vld [vmem:[#allocation54_spill] sm:$0xff]  ;;  %v7118_v25 = vld [vmem:[#allocation56_spill] sm:$0xff]  ;;  %7182 = vst [vmem:[#allocation141_spill] sm:$0xff] %v5287_v8  ;;  %vm5308_vm1 = vcmp.lt.s32.totalorder %v5287_v8, %v5291_v12 }
  0xd0   : > { %1798 = vmatprep.mubr.bf16.mxu0 %v7060_v33  ;;  %1841 = vmatprep.mubr.bf16.mxu1 %v7060_v33 }
  0xd2   : > { %1769 = vmatpush1.bf16.msra.mxu0 %v4725_v39  ;;  %1812 = vmatpush1.bf16.msra.mxu1 %v4729_v40  ;;  %v7119_v39 = vld [vmem:[#allocation57_spill] sm:$0xff]  ;;  %v7120_v40 = vld [vmem:[#allocation58_spill] sm:$0xff] }
  0xd3   : > { %1770 = vmatprep.subr.bf16.mxu0 %v4731_v41  ;;  %1813 = vmatprep.subr.bf16.mxu1 %v4734_v42  ;;  %v7121_v41 = vld [vmem:[#allocation59_spill] sm:$0xff]  ;;  %v7122_v42 = vld [vmem:[#allocation60_spill] sm:$0xff] }
  0xd6   : > { %1771 = vmatpush1.bf16.msra.mxu0 %v7112_v50  ;;  %1814 = vmatpush1.bf16.msra.mxu1 %v7113_v3  ;;  %v7123_v50 = vld [vmem:[#allocation61_spill] sm:$0xff]  ;;  %v7124_v3 = vld [vmem:[#allocation62_spill] sm:$0xff] }
  0xd7   : > { %1772 = vmatprep.subr.bf16.mxu0 %v7114_v16  ;;  %1815 = vmatprep.subr.bf16.mxu1 %v7115_v31  ;;  %v7125_v16 = vld [vmem:[#allocation63_spill] sm:$0xff]  ;;  %v7126_v31 = vld [vmem:[#allocation64_spill] sm:$0xff] }
  0xda   : > { %1773 = vmatpush1.bf16.msra.mxu0 %v7116_v26  ;;  %1816 = vmatpush1.bf16.msra.mxu1 %v7117_v2  ;;  %v7127_v26 = vld [vmem:[#allocation65_spill] sm:$0xff]  ;;  %v7128_v2 = vld [vmem:[#allocation66_spill] sm:$0xff] }
  0xdb   : > { %1774 = vmatprep.subr.bf16.mxu0 %v7118_v25  ;;  %1817 = vmatprep.subr.bf16.mxu1 %v7119_v39  ;;  %v7129_v25 = vld [vmem:[#allocation67_spill] sm:$0xff]  ;;  %v7130_v39 = vld [vmem:[#allocation68_spill] sm:$0xff] }
  0xde   : > { %1775 = vmatpush1.bf16.msra.mxu0 %v7120_v40  ;;  %1818 = vmatpush1.bf16.msra.mxu1 %v7121_v41  ;;  %v7131_v40 = vld [vmem:[#allocation69_spill] sm:$0xff]  ;;  %v7132_v41 = vld [vmem:[#allocation70_spill] sm:$0xff] }
  0xdf   : > { %1776 = vmatprep.subr.bf16.mxu0 %v7122_v42  ;;  %1819 = vmatprep.subr.bf16.mxu1 %v7123_v50  ;;  %v6838_v42 = vsub.s32 4, %v5123_v55  ;;  %v7133_v50 = vld [vmem:[#allocation71_spill] sm:$0xff] }
  0xe2   : > { %1777 = vmatpush1.bf16.msra.mxu0 %v7124_v3  ;;  %1820 = vmatpush1.bf16.msra.mxu1 %v7125_v16  ;;  %v7134_v3 = vld [vmem:[#allocation72_spill] sm:$0xff] }
  0xe3   : > { %1778 = vmatprep.subr.bf16.mxu0 %v7126_v31  ;;  %1821 = vmatprep.subr.bf16.mxu1 %v7127_v26  ;;  %v5200_v31 = vrot.slane %v393_v13, %v6838_v42  ;;  %v7136_v26 = vld [vmem:[#allocation73_spill] sm:$0xff]  ;;  %v7139_v42 = vld [vmem:[#allocation75_spill] sm:$0xff] }
  0xe5   : > { %7135 = vst [vmem:[#allocation133_spill] sm:$0xff] %v5200_v31  ;;  %v7140_v31 = vld [vmem:[#allocation76_spill] sm:$0xff] }
  0xe6   : > { %1779 = vmatpush1.bf16.msra.mxu0 %v7128_v2  ;;  %1822 = vmatpush1.bf16.msra.mxu1 %v7129_v25  ;;  %v6840_v25 = vsub.s32 6, %v5123_v55  ;;  %v7143_v2 = vld [vmem:[#allocation77_spill] sm:$0xff] }
  0xe7   : > { %1780 = vmatprep.subr.bf16.mxu0 %v7130_v39  ;;  %1823 = vmatprep.subr.bf16.mxu1 %v7131_v40  ;;  %v6842_v40 = vsub.s32 5, %v5123_v55  ;;  %v6844_v39 = vsub.s32 7, %v5123_v55 }
  0xea   : > { %1781 = vmatpush1.bf16.msra.mxu0 %v7132_v41  ;;  %1824 = vmatpush1.bf16.msra.mxu1 %v7133_v50  ;;  %v7137_v41 = vld [vmem:[#allocation74_spill] sm:$0xff]  ;;  %v5221_v50 = vrot.slane %v393_v13, %v6844_v39  ;;  %v7151_v39 = vld [vmem:[#allocation85_spill] sm:$0xff] }
  0xeb   : > { %1852 = vmatprep.subr.bf16.mxu0 %v7134_v3  ;;  %1895 = vmatprep.subr.bf16.mxu1 %v7136_v26  ;;  %v5211_v3 = vrot.slane %v393_v13, %v6840_v25  ;;  %v5217_v26 = vrot.slane %v393_v13, %v6842_v40  ;;  %v7144_v25 = vld [vmem:[#allocation78_spill] sm:$0xff]  ;;  %v7150_v13 = vld [vmem:[#allocation84_spill] sm:$0xff] }
  0xec   : > { %7142 = vst [vmem:[#allocation136_spill] sm:$0xff] %v5221_v50  ;;  %v7148_v40 = vld [vmem:[#allocation82_spill] sm:$0xff] }
  0xed   : > { %1799 = vmatmul.mubr.bf16.vlgmr.msra.gmra.mxu0 %v5130_v56  ;;  %1842 = vmatmul.mubr.bf16.vlgmr.msra.gmra.mxu1 %v5130_v56  ;;  %7138 = vst [vmem:[#allocation134_spill] sm:$0xff] %v5211_v3  ;;  %7141 = vst [vmem:[#allocation135_spill] sm:$0xff] %v5217_v26  ;;  %v7145_v3 = vld [vmem:[#allocation79_spill] sm:$0xff]  ;;  %v7152_v50 = vld [vmem:[#allocation86_spill] sm:$0xff] }
  0xee   : > { %1853 = vmatpush1.bf16.msra.mxu0 %v7137_v41  ;;  %1896 = vmatpush1.bf16.msra.mxu1 %v7139_v42  ;;  %v7146_v42 = vld [vmem:[#allocation80_spill] sm:$0xff]  ;;  %v7149_v26 = vld [vmem:[#allocation83_spill] sm:$0xff]  ;;  %v7164_v41 = vld [vmem:[#allocation98_spill] sm:$0xff] }
  0xef   : > { %1854 = vmatprep.subr.bf16.mxu0 %v7140_v31  ;;  %1897 = vmatprep.subr.bf16.mxu1 %v7143_v2  ;;  %v7147_v31 = vld [vmem:[#allocation81_spill] sm:$0xff]  ;;  %v7153_v2 = vld [vmem:[#allocation87_spill] sm:$0xff] }
  0xf0   : > { %1884 = vmatprep.mubr.bf16.mxu0 %v7060_v33  ;;  %1927 = vmatprep.mubr.bf16.mxu1 %v7060_v33 }
  0xf2   : > { %1855 = vmatpush1.bf16.msra.mxu0 %v7144_v25  ;;  %1898 = vmatpush1.bf16.msra.mxu1 %v7145_v3  ;;  %v7154_v25 = vld [vmem:[#allocation88_spill] sm:$0xff]  ;;  %v7155_v3 = vld [vmem:[#allocation89_spill] sm:$0xff] }
  0xf3   : > { %1856 = vmatprep.subr.bf16.mxu0 %v7146_v42  ;;  %1899 = vmatprep.subr.bf16.mxu1 %v7147_v31  ;;  %v7156_v42 = vld [vmem:[#allocation90_spill] sm:$0xff]  ;;  %v7157_v31 = vld [vmem:[#allocation91_spill] sm:$0xff] }
  0xf6   : > { %1857 = vmatpush1.bf16.msra.mxu0 %v7148_v40  ;;  %1900 = vmatpush1.bf16.msra.mxu1 %v7149_v26  ;;  %v7158_v40 = vld [vmem:[#allocation92_spill] sm:$0xff]  ;;  %v7159_v26 = vld [vmem:[#allocation93_spill] sm:$0xff] }
  0xf7   : > { %1858 = vmatprep.subr.bf16.mxu0 %v7150_v13  ;;  %1901 = vmatprep.subr.bf16.mxu1 %v7151_v39  ;;  %v7160_v13 = vld [vmem:[#allocation94_spill] sm:$0xff]  ;;  %v7161_v39 = vld [vmem:[#allocation95_spill] sm:$0xff] }
  0xfa   : > { %1859 = vmatpush1.bf16.msra.mxu0 %v7152_v50  ;;  %1902 = vmatpush1.bf16.msra.mxu1 %v7153_v2  ;;  %v7162_v50 = vld [vmem:[#allocation96_spill] sm:$0xff]  ;;  %v7163_v2 = vld [vmem:[#allocation97_spill] sm:$0xff] }
  0xfb   : > { %1860 = vmatprep.subr.bf16.mxu0 %v7154_v25  ;;  %1903 = vmatprep.subr.bf16.mxu1 %v7155_v3  ;;  %v7165_v25 = vld [vmem:[#allocation99_spill] sm:$0xff]  ;;  %v7166_v3 = vld [vmem:[#allocation100_spill] sm:$0xff] }
  0xfe   : > { %1861 = vmatpush1.bf16.msra.mxu0 %v7156_v42  ;;  %1904 = vmatpush1.bf16.msra.mxu1 %v7157_v31  ;;  %v5250_v42 = vld [vmem:[%s5136_s19] sm:$0xff]  ;;  %v7167_v31 = vld [vmem:[#allocation101_spill] sm:$0xff] }
  0xff   : > { %1862 = vmatprep.subr.bf16.mxu0 %v7158_v40  ;;  %1905 = vmatprep.subr.bf16.mxu1 %v7159_v26  ;;  %v7168_v26 = vld [vmem:[#allocation102_spill] sm:$0xff] }
 0x102   : > { %1863 = vmatpush1.bf16.msra.mxu0 %v7160_v13  ;;  %1906 = vmatpush1.bf16.msra.mxu1 %v7161_v39  ;;  %v7169_v39 = vsub.s32 0, %v5123_v55  ;;  %v7176_v13 = vsub.s32 1, %v5123_v55 }
 0x103   : > { %1864 = vmatprep.subr.bf16.mxu0 %v7162_v50  ;;  %1907 = vmatprep.subr.bf16.mxu1 %v7163_v2  ;;  %v7171_v2 = vld [vmem:[#allocation103_spill] sm:$0xff] }
 0x104   : > { %v5260_v50 = vrot.slane %v5250_v42, %v7169_v39  ;;  %v7178_v39 = vsub.s32 3, %v5123_v55 }
 0x106   : > { %1865 = vmatpush1.bf16.msra.mxu0 %v7164_v41  ;;  %1908 = vmatpush1.bf16.msra.mxu1 %v7165_v25  ;;  %7170 = vst [vmem:[#allocation137_spill] sm:$0xff] %v5260_v50  ;;  %v7172_v41 = vsub.s32 2, %v5123_v55 }
 0x107   : > { %1866 = vmatprep.subr.bf16.mxu0 %v7166_v3  ;;  %1909 = vmatprep.subr.bf16.mxu1 %v7167_v31  ;;  %v7174_v3 = vld [vmem:[#allocation104_spill] sm:$0xff]  ;;  %v7175_v31 = vld [vmem:[#allocation105_spill] sm:$0xff] }
 0x108   : > { %v5266_v25 = vrot.slane %v5250_v42, %v7172_v41 }
 0x10a   : > { %1867 = vmatpush1.bf16.msra.mxu0 %v7168_v26  ;;  %1910 = vmatpush1.bf16.msra.mxu1 %v7171_v2  ;;  %7173 = vst [vmem:[#allocation138_spill] sm:$0xff] %v5266_v25  ;;  %v5273_v26 = vrot.slane %v5250_v42, %v7176_v13  ;;  %v5279_v2 = vrot.slane %v5250_v42, %v7178_v39 }
 0x10b   : > { %1938 = vmatprep.subr.bf16.mxu0 %v7174_v3  ;;  %1981 = vmatprep.subr.bf16.mxu1 %v7175_v31  ;;  %v7180_v3 = vld [vmem:[#allocation106_spill] sm:$0xff] }
 0x10c   : > { %7177 = vst [vmem:[#allocation139_spill] sm:$0xff] %v5273_v26  ;;  %7179 = vst [vmem:[#allocation140_spill] sm:$0xff] %v5279_v2 }
 0x10d   : > { %v1156_v40 = vpop.f32.mrf.mxu0  ;;  %1885 = vmatmul.mubr.bf16.vlgmr.msra.gmra.mxu0 %v5130_v56  ;;  %v1199_v16 = vpop.f32.mrf.mxu1  ;;  %1928 = vmatmul.mubr.bf16.vlgmr.msra.gmra.mxu1 %v5130_v56 }
 0x10e   : > { %v1157_v41 = vadd.f32 %v1156_v40, %v5260_v50  ;;  %1939 = vmatpush1.bf16.msra.mxu0 %v7180_v3  ;;  %v1200_v31 = vadd.f32 %v1199_v16, %v5266_v25  ;;  %1982 = vmatpush1.bf16.msra.mxu1 %v7181_v24 }
 0x10f   : > { %v1158_v13 = vpop.f32.mrf.mxu0  ;;  %1940 = vmatprep.subr.bf16.mxu0 %v7183_v23  ;;  %v1201_v40 = vpop.f32.mrf.mxu1  ;;  %1983 = vmatprep.subr.bf16.mxu1 %v7185_v7  ;;  %v7191_v23 = vld [vmem:[#allocation111_spill] sm:$0xff] }
 0x110   : > { %v1159_v39 = vadd.f32 %v1158_v13, %v5273_v26  ;;  %1970 = vmatprep.mubr.bf16.mxu0 %v7060_v33  ;;  %v1202_v3 = vadd.f32 %v1201_v40, %v5279_v2  ;;  %2013 = vmatprep.mubr.bf16.mxu1 %v7060_v33  ;;  %v1466_v24 = vmax.f32 %v1157_v41, 0.0  ;;  %v1468_v7 = vmax.f32 %v1200_v31, 0.0  ;;  %v7290_v40 = vld [vmem:[#allocation94_spill] sm:$0xff] }
 0x111   : > { %v1160_v16 = vpop.f32.mrf.mxu0  ;;  %v1203_v62 = vpop.f32.mrf.mxu1 }
 0x112   : > { %v1161_v5 = vadd.f32 %v1160_v16, %v5260_v50  ;;  %1941 = vmatpush1.bf16.msra.mxu0 %v7186_v61  ;;  %v1204_v41 = vadd.f32 %v1203_v62, %v5266_v25  ;;  %1984 = vmatpush1.bf16.msra.mxu1 %v7191_v23  ;;  %v7192_v50 = vld [vmem:[#allocation112_spill] sm:$0xff]  ;;  %v1467_v61 = vmax.f32 %v1159_v39, 0.0  ;;  %v1469_v31 = vmax.f32 %v1202_v3, 0.0  ;;  %v7194_v25 = vld [vmem:[#allocation114_spill] sm:$0xff] }
 0x113   : > { %v1162_v16 = vpop.f32.mrf.mxu0  ;;  %1942 = vmatprep.subr.bf16.mxu0 %v7192_v50  ;;  %v1205_v54 = vpop.f32.mrf.mxu1  ;;  %1985 = vmatprep.subr.bf16.mxu1 %v7193_v53  ;;  %v1511_v8 = vsel %vm5302_vm0, %v1466_v24, 0.0 }
 0x114   : > { %v1482_v60 = vmax.f32 %v1161_v5, 0.0  ;;  %v1163_v59 = vadd.f32 %v1162_v16, %v5273_v26  ;;  %v1484_v52 = vmax.f32 %v1204_v41, 0.0  ;;  %v1206_v12 = vadd.f32 %v1205_v54, %v5279_v2  ;;  %v7195_v16 = vld [vmem:[#allocation115_spill] sm:$0xff]  ;;  %v7196_v54 = vld [vmem:[#allocation116_spill] sm:$0xff] }
 0x115   : > { %v1513_v5 = vsel %vm5302_vm0, %v1468_v7, 0.0  ;;  %v1512_v24 = vsel %vm5302_vm0, %v1467_v61, 0.0  ;;  %v1514_v7 = vsel %vm5302_vm0, %v1469_v31, 0.0  ;;  %v7199_v61 = vld [vmem:[#allocation119_spill] sm:$0xff]  ;;  %v7203_v31 = vsub.s32 4, %v5123_v55 }
 0x116   : > { %v1527_v62 = vsel %vm5308_vm1, %v1482_v60, 0.0  ;;  %v1483_v23 = vmax.f32 %v1163_v59, 0.0  ;;  %1943 = vmatpush1.bf16.msra.mxu0 %v7194_v25  ;;  %v1529_v3 = vsel %vm5308_vm1, %v1484_v52, 0.0  ;;  %v1485_v41 = vmax.f32 %v1206_v12, 0.0  ;;  %1986 = vmatpush1.bf16.msra.mxu1 %v7195_v16  ;;  %v7197_v25 = vld [vmem:[#allocation117_spill] sm:$0xff] }
 0x117   : > { %v5325_v39 = vadd.f32 %v1527_v62, %v1511_v8  ;;  %1944 = vmatprep.subr.bf16.mxu0 %v7196_v54  ;;  %v5333_v60 = vadd.f32 %v1529_v3, %v1513_v5  ;;  %1987 = vmatprep.subr.bf16.mxu1 %v7197_v25  ;;  %v7198_v62 = vld [vmem:[#allocation118_spill] sm:$0xff]  ;;  %v7200_v5 = vld [vmem:[#allocation120_spill] sm:$0xff]  ;;  %v7201_v3 = vld [vmem:[#allocation121_spill] sm:$0xff] }
 0x118   : > { %v1528_v59 = vsel %vm5308_vm1, %v1483_v23, 0.0  ;;  %v1530_v52 = vsel %vm5308_vm1, %v1485_v41, 0.0  ;;  %v7202_v23 = vld [vmem:[#allocation122_spill] sm:$0xff]  ;;  %v5366_v41 = vrot.slane %v5250_v42, %v7203_v31  ;;  %v7209_v31 = vsub.s32 7, %v5123_v55 }
 0x119   : > { %v5340_v8 = vadd.f32 %v1528_v59, %v1512_v24  ;;  %v5344_v12 = vadd.f32 %v1530_v52, %v1514_v7  ;;  %v7205_v24 = vsub.s32 6, %v5123_v55  ;;  %v7207_v7 = vsub.s32 5, %v5123_v55 }
 0x11a   : > { %1945 = vmatpush1.bf16.msra.mxu0 %v7198_v62  ;;  %1988 = vmatpush1.bf16.msra.mxu1 %v7199_v61  ;;  %7204 = vst [vmem:[#allocation112_spill] sm:$0xff] %v5366_v41 }
 0x11b   : > { %1946 = vmatprep.subr.bf16.mxu0 %v7200_v5  ;;  %1989 = vmatprep.subr.bf16.mxu1 %v7201_v3  ;;  %v5372_v59 = vrot.slane %v5250_v42, %v7205_v24  ;;  %v5379_v52 = vrot.slane %v5250_v42, %v7207_v7 }
 0x11d   : > { %7206 = vst [vmem:[#allocation113_spill] sm:$0xff] %v5372_v59  ;;  %7208 = vst [vmem:[#allocation118_spill] sm:$0xff] %v5379_v52 }
 0x11e   : > { %1947 = vmatpush1.bf16.msra.mxu0 %v5039_v49  ;;  %1990 = vmatpush1.bf16.msra.mxu1 %v5043_v48 }
 0x11f   : > { %1948 = vmatprep.subr.bf16.mxu0 %v5045_v34  ;;  %1991 = vmatprep.subr.bf16.mxu1 %v7202_v23 }
 0x122   : > { %1949 = vmatpush1.bf16.msra.mxu0 %v5055_v17  ;;  %1992 = vmatpush1.bf16.msra.mxu1 %v5059_v57 }
 0x123   : > { %1950 = vmatprep.subr.bf16.mxu0 %v5061_v63  ;;  %1993 = vmatprep.subr.bf16.mxu1 %v5064_v0 }
 0x126   : > { %1951 = vmatpush1.bf16.msra.mxu0 %v5071_v1  ;;  %1994 = vmatpush1.bf16.msra.mxu1 %v5075_v47 }
 0x127   : > { %1952 = vmatprep.subr.bf16.mxu0 %v5077_v58  ;;  %1995 = vmatprep.subr.bf16.mxu1 %v5080_v14 }
 0x12a   : > { %1953 = vmatpush1.bf16.msra.mxu0 %v5083_v18  ;;  %1996 = vmatpush1.bf16.msra.mxu1 %v5087_v32  ;;  %v5385_v32 = vrot.slane %v5250_v42, %v7209_v31 }
 0x12b   : > { %2234 = vmatprep.subr.bf16.mxu0 %v4562_v4  ;;  %2277 = vmatprep.subr.bf16.mxu1 %v4569_v9 }
 0x12c   : > { %7210 = vst [vmem:[#allocation119_spill] sm:$0xff] %v5385_v32 }
 0x12d   : > { %v1242_v18 = vpop.f32.mrf.mxu0  ;;  %1971 = vmatmul.mubr.bf16.vlgmr.msra.gmra.mxu0 %v5130_v56  ;;  %v1285_v14 = vpop.f32.mrf.mxu1  ;;  %2014 = vmatmul.mubr.bf16.vlgmr.msra.gmra.mxu1 %v5130_v56 }
 0x12e   : > { %v1243_v24 = vadd.f32 %v1242_v18, %v5366_v41  ;;  %2235 = vmatpush1.bf16.msra.mxu0 %v4565_v6  ;;  %v1286_v9 = vadd.f32 %v1285_v14, %v5372_v59  ;;  %2278 = vmatpush1.bf16.msra.mxu1 %v4571_v10 }
 0x12f   : > { %v1244_v7 = vpop.f32.mrf.mxu0  ;;  %2236 = vmatprep.subr.bf16.mxu0 %v4573_v11  ;;  %v1287_v58 = vpop.f32.mrf.mxu1  ;;  %2279 = vmatprep.subr.bf16.mxu1 %v4579_v15 }
 0x130   : > { %v1245_v4 = vadd.f32 %v1244_v7, %v5379_v52  ;;  %2266 = vmatprep.mubr.bf16.mxu0 %v7060_v33  ;;  %v1288_v42 = vadd.f32 %v1287_v58, %v5385_v32  ;;  %2309 = vmatprep.mubr.bf16.mxu1 %v7060_v33  ;;  %v1470_v56 = vmax.f32 %v1243_v24, 0.0  ;;  %v1472_v10 = vmax.f32 %v1286_v9, 0.0 }
 0x131   : > { %v1246_v18 = vpop.f32.mrf.mxu0  ;;  %v1289_v31 = vpop.f32.mrf.mxu1 }
 0x132   : > { %v1247_v14 = vadd.f32 %v1246_v18, %v5366_v41  ;;  %2237 = vmatpush1.bf16.msra.mxu0 %v4586_v19  ;;  %v1290_v11 = vadd.f32 %v1289_v31, %v5372_v59  ;;  %2280 = vmatpush1.bf16.msra.mxu1 %v4590_v20  ;;  %v1471_v15 = vmax.f32 %v1245_v4, 0.0  ;;  %v1473_v24 = vmax.f32 %v1288_v42, 0.0 }
 0x133   : > { %v1248_v7 = vpop.f32.mrf.mxu0  ;;  %2238 = vmatprep.subr.bf16.mxu0 %v4592_v21  ;;  %v1291_v47 = vpop.f32.mrf.mxu1  ;;  %2281 = vmatprep.subr.bf16.mxu1 %v4596_v22  ;;  %v1515_v9 = vsel %vm5302_vm0, %v1470_v56, 0.0  ;;  %v1517_v4 = vsel %vm5302_vm0, %v1472_v10, 0.0 }
 0x134   : > { %v1486_v6 = vmax.f32 %v1247_v14, 0.0  ;;  %v1249_v58 = vadd.f32 %v1248_v7, %v5379_v52  ;;  %v1488_v18 = vmax.f32 %v1290_v11, 0.0  ;;  %v1292_v41 = vadd.f32 %v1291_v47, %v5385_v32 }
 0x135   : > { %v1516_v47 = vsel %vm5302_vm0, %v1471_v15, 0.0  ;;  %v1518_v10 = vsel %vm5302_vm0, %v1473_v24, 0.0  ;;  %v7211_v15 = vld [vmem:[#allocation31_spill] sm:$0xff]  ;;  %v7213_v24 = vld [vmem:[#allocation33_spill] sm:$0xff] }
 0x136   : > { %v1531_v31 = vsel %vm5308_vm1, %v1486_v6, 0.0  ;;  %v1487_v20 = vmax.f32 %v1249_v58, 0.0  ;;  %2239 = vmatpush1.bf16.msra.mxu0 %v4603_v27  ;;  %v1533_v42 = vsel %vm5308_vm1, %v1488_v18, 0.0  ;;  %v1489_v11 = vmax.f32 %v1292_v41, 0.0  ;;  %2282 = vmatpush1.bf16.msra.mxu1 %v4607_v28  ;;  %v7214_v18 = vld [vmem:[#allocation34_spill] sm:$0xff] }
 0x137   : > { %v5413_v14 = vadd.f32 %v1531_v31, %v1515_v9  ;;  %2240 = vmatprep.subr.bf16.mxu0 %v4609_v29  ;;  %v5421_v6 = vadd.f32 %v1533_v42, %v1517_v4  ;;  %2283 = vmatprep.subr.bf16.mxu1 %v4617_v30  ;;  %v7215_v9 = vld [vmem:[#allocation35_spill] sm:$0xff]  ;;  %v7216_v31 = vld [vmem:[#allocation36_spill] sm:$0xff]  ;;  %v7217_v4 = vld [vmem:[#allocation37_spill] sm:$0xff] }
 0x138   : > { %v1532_v56 = vsel %vm5308_vm1, %v1487_v20, 0.0  ;;  %v1534_v41 = vsel %vm5308_vm1, %v1489_v11, 0.0  ;;  %v7212_v20 = vld [vmem:[#allocation32_spill] sm:$0xff]  ;;  %v5451_v42 = vld [vmem:[%s4614_s15 + $0x10] sm:$0xff]  }
 0x139   : > { %v5428_v7 = vadd.f32 %v1532_v56, %v1516_v47  ;;  %v5432_v58 = vadd.f32 %v1534_v41, %v1518_v10  ;;  %v7218_v11 = vld [vmem:[#allocation38_spill] sm:$0xff]  ;;  %v7219_v47 = vld [vmem:[#allocation39_spill] sm:$0xff]  ;;  %v7220_v56 = vld [vmem:[#allocation40_spill] sm:$0xff] }
 0x13a   : > { %2241 = vmatpush1.bf16.msra.mxu0 %v4624_v35  ;;  %2284 = vmatpush1.bf16.msra.mxu1 %v4628_v36  ;;  %v7221_v10 = vld [vmem:[#allocation41_spill] sm:$0xff]  ;;  %v7232_v36 = vld [vmem:[#allocation48_spill] sm:$0xff] }
 0x13b   : > { %2242 = vmatprep.subr.bf16.mxu0 %v4630_v37  ;;  %2285 = vmatprep.subr.bf16.mxu1 %v4633_v38  ;;  %v7231_v37 = vld [vmem:[#allocation47_spill] sm:$0xff]  ;;  %v7233_v35 = vld [vmem:[#allocation49_spill] sm:$0xff] }
 0x13e   : > { %2243 = vmatpush1.bf16.msra.mxu0 %v4640_v43  ;;  %2286 = vmatpush1.bf16.msra.mxu1 %v4644_v44  ;;  %v7229_v44 = vld [vmem:[#allocation132_spill] sm:$0xff] }
 0x13f   : > { %2244 = vmatprep.subr.bf16.mxu0 %v4646_v45  ;;  %2287 = vmatprep.subr.bf16.mxu1 %v4649_v46  ;;  %v7228_v45 = vld [vmem:[#allocation45_spill] sm:$0xff] }
 0x142   : > { %2245 = vmatpush1.bf16.msra.mxu0 %v4656_v51  ;;  %2288 = vmatpush1.bf16.msra.mxu1 %v7211_v15  ;;  %v7225_v15 = vld [vmem:[#allocation43_spill] sm:$0xff] }
 0x143   : > { %2246 = vmatprep.subr.bf16.mxu0 %v7212_v20  ;;  %2289 = vmatprep.subr.bf16.mxu1 %v7213_v24  ;;  %v7227_v51 = vld [vmem:[#allocation131_spill] sm:$0xff] }
 0x146   : > { %2247 = vmatpush1.bf16.msra.mxu0 %v7214_v18  ;;  %2290 = vmatpush1.bf16.msra.mxu1 %v7215_v9  ;;  %v7222_v18 = vld [vmem:[#allocation129_spill] sm:$0xff] }
 0x147   : > { %2248 = vmatprep.subr.bf16.mxu0 %v7216_v31  ;;  %2291 = vmatprep.subr.bf16.mxu1 %v7217_v4  ;;  %v7223_v31 = vld [vmem:[#allocation42_spill] sm:$0xff] }
 0x148   : > { %v7224_v4 = vld [vmem:[#allocation130_spill] sm:$0xff] }
 0x14a   : > { %2249 = vmatpush1.bf16.msra.mxu0 %v7218_v11  ;;  %2292 = vmatpush1.bf16.msra.mxu1 %v7219_v47  ;;  %v7226_v47 = vld [vmem:[#allocation44_spill] sm:$0xff] }
 0x14b   : > { %2320 = vmatprep.subr.bf16.mxu0 %v7220_v56  ;;  %2363 = vmatprep.subr.bf16.mxu1 %v7221_v10 }
 0x14d   : > { %v1328_v41 = vpop.f32.mrf.mxu0  ;;  %2267 = vmatmul.mubr.bf16.vlgmr.msra.gmra.mxu0 %v5451_v42  ;;  %v1371_v9 = vpop.f32.mrf.mxu1  ;;  %2310 = vmatmul.mubr.bf16.vlgmr.msra.gmra.mxu1 %v5451_v42 }
 0x14e   : > { %v1329_v24 = vadd.f32 %v1328_v41, %v7222_v18  ;;  %2321 = vmatpush1.bf16.msra.mxu0 %v7223_v31  ;;  %v1372_v20 = vadd.f32 %v1371_v9, %v7224_v4  ;;  %2364 = vmatpush1.bf16.msra.mxu1 %v7225_v15  ;;  %v7230_v31 = vld [vmem:[#allocation46_spill] sm:$0xff] }
 0x14f   : > { %v1330_v11 = vpop.f32.mrf.mxu0  ;;  %2322 = vmatprep.subr.bf16.mxu0 %v7226_v47  ;;  %v1373_v46 = vpop.f32.mrf.mxu1  ;;  %2365 = vmatprep.subr.bf16.mxu1 %v7228_v45 }
 0x150   : > { %v1474_v56 = vmax.f32 %v1329_v24, 0.0  ;;  %v1331_v10 = vadd.f32 %v1330_v11, %v7227_v51  ;;  %2352 = vmatprep.mubr.bf16.mxu0 %v7060_v33  ;;  %v1476_v41 = vmax.f32 %v1372_v20, 0.0  ;;  %v1374_v43 = vadd.f32 %v1373_v46, %v7229_v44  ;;  %2395 = vmatprep.mubr.bf16.mxu1 %v7060_v33 }
 0x151   : > { %v1332_v38 = vpop.f32.mrf.mxu0  ;;  %v1375_v24 = vpop.f32.mrf.mxu1 }
 0x152   : > { %v1519_v9 = vsel %vm5302_vm0, %v1474_v56, 0.0  ;;  %v1475_v15 = vmax.f32 %v1331_v10, 0.0  ;;  %v1333_v47 = vadd.f32 %v1332_v38, %v7222_v18  ;;  %2323 = vmatpush1.bf16.msra.mxu0 %v7230_v31  ;;  %v1521_v11 = vsel %vm5302_vm0, %v1476_v41, 0.0  ;;  %2366 = vmatpush1.bf16.msra.mxu1 %v7231_v37 }
 0x153   : > { %v1477_v45 = vmax.f32 %v1374_v43, 0.0  ;;  %v1376_v20 = vadd.f32 %v1375_v24, %v7224_v4  ;;  %v1334_v46 = vpop.f32.mrf.mxu0  ;;  %2324 = vmatprep.subr.bf16.mxu0 %v7232_v36  ;;  %v1377_v18 = vpop.f32.mrf.mxu1  ;;  %2367 = vmatprep.subr.bf16.mxu1 %v7233_v35  ;;  %v7234_v36 = vld [vmem:[#allocation50_spill] sm:$0xff]  ;;  %v7237_v35 = vld [vmem:[#allocation52_spill] sm:$0xff] }
 0x154   : > { %v1520_v56 = vsel %vm5302_vm0, %v1475_v15, 0.0  ;;  %v1490_v10 = vmax.f32 %v1333_v47, 0.0  ;;  %v1335_v38 = vadd.f32 %v1334_v46, %v7227_v51  ;;  %v1378_v24 = vadd.f32 %v1377_v18, %v7229_v44  ;;  %v7236_v46 = vld [vmem:[#allocation51_spill] sm:$0xff] }
 0x155   : > { %v1522_v41 = vsel %vm5302_vm0, %v1477_v45, 0.0  ;;  %v1492_v43 = vmax.f32 %v1376_v20, 0.0  ;;  %v7239_v20 = vld [vmem:[#allocation53_spill] sm:$0xff]  ;;  %v7271_v51 = vld [vmem:[#allocation79_spill] sm:$0xff] }
 0x156   : > { %v1535_v37 = vsel %vm5308_vm1, %v1490_v10, 0.0  ;;  %v1491_v31 = vmax.f32 %v1335_v38, 0.0  ;;  %2325 = vmatpush1.bf16.msra.mxu0 %v7234_v36  ;;  %v1493_v47 = vmax.f32 %v1378_v24, 0.0  ;;  %2368 = vmatpush1.bf16.msra.mxu1 %v7236_v46  ;;  %v7242_v38 = vld [vmem:[#allocation54_spill] sm:$0xff]  ;;  %v7244_v24 = vld [vmem:[#allocation56_spill] sm:$0xff]  ;;  %v7268_v36 = vld [vmem:[#allocation77_spill] sm:$0xff] }
 0x157   : > { %v5488_v4 = vadd.f32 %v1535_v37, %v1519_v9  ;;  %v1537_v15 = vsel %vm5308_vm1, %v1492_v43, 0.0  ;;  %2326 = vmatprep.subr.bf16.mxu0 %v7237_v35  ;;  %2369 = vmatprep.subr.bf16.mxu1 %v7239_v20  ;;  %v7243_v43 = vld [vmem:[#allocation55_spill] sm:$0xff]  ;;  %v7248_v20 = vld [vmem:[#allocation60_spill] sm:$0xff] }
 0x158   : > { %v5494_v45 = vadd.f32 %v1537_v15, %v1521_v11  ;;  %v1536_v18 = vsel %vm5308_vm1, %v1491_v31, 0.0  ;;  %v1538_v37 = vsel %vm5308_vm1, %v1493_v47, 0.0  ;;  %v7245_v11 = vld [vmem:[#allocation57_spill] sm:$0xff]  ;;  %v7246_v15 = vld [vmem:[#allocation58_spill] sm:$0xff]  ;;  %v7247_v31 = vld [vmem:[#allocation59_spill] sm:$0xff] }
 0x159   : > { %7235 = vst [vmem:[#allocation120_spill] sm:$0xff] %v5488_v4  ;;  %v5499_v10 = vadd.f32 %v1536_v18, %v1520_v56  ;;  %v5503_v9 = vadd.f32 %v1538_v37, %v1522_v41  ;;  %v7249_v56 = vld [vmem:[#allocation61_spill] sm:$0xff]  ;;  %v7250_v18 = vld [vmem:[#allocation62_spill] sm:$0xff]  ;;  %v7251_v41 = vld [vmem:[#allocation63_spill] sm:$0xff] }
 0x15a   : > { %7238 = vst [vmem:[#allocation122_spill] sm:$0xff] %v5494_v45  ;;  %2327 = vmatpush1.bf16.msra.mxu0 %v7242_v38  ;;  %2370 = vmatpush1.bf16.msra.mxu1 %v7243_v43  ;;  %v7252_v47 = vld [vmem:[#allocation64_spill] sm:$0xff]  ;;  %v7253_v37 = vld [vmem:[#allocation65_spill] sm:$0xff]  ;;  %v7254_v43 = vld [vmem:[#allocation66_spill] sm:$0xff] }
 0x15b   : > { %7240 = vst [vmem:[#allocation143_spill] sm:$0xff] %v5499_v10  ;;  %7241 = vst [vmem:[#allocation144_spill] sm:$0xff] %v5503_v9  ;;  %2328 = vmatprep.subr.bf16.mxu0 %v7244_v24  ;;  %2371 = vmatprep.subr.bf16.mxu1 %v7245_v11  ;;  %v7255_v24 = vld [vmem:[#allocation67_spill] sm:$0xff]  ;;  %v7256_v11 = vld [vmem:[#allocation68_spill] sm:$0xff] }
 0x15c   : > { %v7265_v38 = vld [vmem:[#allocation75_spill] sm:$0xff]  ;;  %v7269_v9 = vld [vmem:[#allocation136_spill] sm:$0xff]  ;;  %v7273_v4 = vld [vmem:[#allocation81_spill] sm:$0xff] }
 0x15d   : > { %v7267_v35 = vld [vmem:[#allocation135_spill] sm:$0xff]  ;;  %v7272_v45 = vld [vmem:[#allocation80_spill] sm:$0xff] }
 0x15e   : > { %2329 = vmatpush1.bf16.msra.mxu0 %v7246_v15  ;;  %2372 = vmatpush1.bf16.msra.mxu1 %v7247_v31  ;;  %v7257_v15 = vld [vmem:[#allocation69_spill] sm:$0xff]  ;;  %v7258_v31 = vld [vmem:[#allocation70_spill] sm:$0xff] }
 0x15f   : > { %2330 = vmatprep.subr.bf16.mxu0 %v7248_v20  ;;  %2373 = vmatprep.subr.bf16.mxu1 %v7249_v56  ;;  %v7259_v20 = vld [vmem:[#allocation71_spill] sm:$0xff]  ;;  %v7260_v56 = vld [vmem:[#allocation72_spill] sm:$0xff] }
 0x162   : > { %2331 = vmatpush1.bf16.msra.mxu0 %v7250_v18  ;;  %2374 = vmatpush1.bf16.msra.mxu1 %v7251_v41  ;;  %v7261_v18 = vld [vmem:[#allocation73_spill] sm:$0xff] }
 0x163   : > { %2332 = vmatprep.subr.bf16.mxu0 %v7252_v47  ;;  %2375 = vmatprep.subr.bf16.mxu1 %v7253_v37  ;;  %v7262_v37 = vld [vmem:[#allocation133_spill] sm:$0xff] }
 0x166   : > { %2333 = vmatpush1.bf16.msra.mxu0 %v7254_v43  ;;  %2376 = vmatpush1.bf16.msra.mxu1 %v7255_v24  ;;  %v7263_v24 = vld [vmem:[#allocation74_spill] sm:$0xff] }
 0x167   : > { %2334 = vmatprep.subr.bf16.mxu0 %v7256_v11  ;;  %2377 = vmatprep.subr.bf16.mxu1 %v7257_v15  ;;  %v7264_v11 = vld [vmem:[#allocation134_spill] sm:$0xff] }
 0x16a   : > { %2335 = vmatpush1.bf16.msra.mxu0 %v7258_v31  ;;  %2378 = vmatpush1.bf16.msra.mxu1 %v7259_v20  ;;  %v7266_v20 = vld [vmem:[#allocation76_spill] sm:$0xff] }
 0x16b   : > { %2406 = vmatprep.subr.bf16.mxu0 %v7260_v56  ;;  %2449 = vmatprep.subr.bf16.mxu1 %v7261_v18 }
 0x16d   : > { %v1414_v41 = vpop.f32.mrf.mxu0  ;;  %2353 = vmatmul.mubr.bf16.vlgmr.msra.gmra.mxu0 %v5451_v42  ;;  %v1457_v43 = vpop.f32.mrf.mxu1  ;;  %2396 = vmatmul.mubr.bf16.vlgmr.msra.gmra.mxu1 %v5451_v42 }
 0x16e   : > { %v1415_v47 = vadd.f32 %v1414_v41, %v7262_v37  ;;  %2407 = vmatpush1.bf16.msra.mxu0 %v7263_v24  ;;  %v1458_v15 = vadd.f32 %v1457_v43, %v7264_v11  ;;  %2450 = vmatpush1.bf16.msra.mxu1 %v7265_v38  ;;  %v7270_v24 = vld [vmem:[#allocation78_spill] sm:$0xff] }
 0x16f   : > { %v1416_v31 = vpop.f32.mrf.mxu0  ;;  %2408 = vmatprep.subr.bf16.mxu0 %v7266_v20  ;;  %v1459_v46 = vpop.f32.mrf.mxu1  ;;  %2451 = vmatprep.subr.bf16.mxu1 %v7268_v36 }
 0x170   : > { %v1478_v56 = vmax.f32 %v1415_v47, 0.0  ;;  %v1417_v18 = vadd.f32 %v1416_v31, %v7267_v35  ;;  %2438 = vmatprep.mubr.bf16.mxu0 %v7060_v33  ;;  %v1480_v41 = vmax.f32 %v1458_v15, 0.0  ;;  %v1460_v44 = vadd.f32 %v1459_v46, %v7269_v9  ;;  %2481 = vmatprep.mubr.bf16.mxu1 %v7060_v33 }
 0x171   : > { %v1418_v10 = vpop.f32.mrf.mxu0  ;;  %v1461_v47 = vpop.f32.mrf.mxu1 }
 0x172   : > { %v1523_v43 = vsel %vm5302_vm0, %v1478_v56, 0.0  ;;  %v1479_v38 = vmax.f32 %v1417_v18, 0.0  ;;  %v1419_v20 = vadd.f32 %v1418_v10, %v7262_v37  ;;  %2409 = vmatpush1.bf16.msra.mxu0 %v7270_v24  ;;  %v1525_v31 = vsel %vm5302_vm0, %v1480_v41, 0.0  ;;  %2452 = vmatpush1.bf16.msra.mxu1 %v7271_v51 }
 0x173   : > { %v1481_v36 = vmax.f32 %v1460_v44, 0.0  ;;  %v1462_v15 = vadd.f32 %v1461_v47, %v7264_v11  ;;  %v1420_v46 = vpop.f32.mrf.mxu0  ;;  %2410 = vmatprep.subr.bf16.mxu0 %v7272_v45  ;;  %v1463_v37 = vpop.f32.mrf.mxu1  ;;  %2453 = vmatprep.subr.bf16.mxu1 %v7273_v4  ;;  %v7274_v45 = vld [vmem:[#allocation82_spill] sm:$0xff]  ;;  %v7277_v4 = vld [vmem:[#allocation84_spill] sm:$0xff] }
 0x174   : > { %v1524_v56 = vsel %vm5302_vm0, %v1479_v38, 0.0  ;;  %v1494_v18 = vmax.f32 %v1419_v20, 0.0  ;;  %v1421_v10 = vadd.f32 %v1420_v46, %v7267_v35  ;;  %v1464_v47 = vadd.f32 %v1463_v37, %v7269_v9  ;;  %v7276_v46 = vld [vmem:[#allocation83_spill] sm:$0xff]  ;;  %v7279_v37 = vld [vmem:[#allocation85_spill] sm:$0xff]  ;;  %v7312_v9 = vld [vmem:[#allocation110_spill] sm:$0xff] }
 0x175   : > { %v1526_v41 = vsel %vm5302_vm0, %v1481_v36, 0.0  ;;  %v1496_v44 = vmax.f32 %v1462_v15, 0.0 }
 0x176   : > { %v1539_v51 = vsel %vm5308_vm1, %v1494_v18, 0.0  ;;  %v1495_v24 = vmax.f32 %v1421_v10, 0.0  ;;  %2411 = vmatpush1.bf16.msra.mxu0 %v7274_v45  ;;  %v1497_v38 = vmax.f32 %v1464_v47, 0.0  ;;  %2454 = vmatpush1.bf16.msra.mxu1 %v7276_v46  ;;  %v7282_v18 = vld [vmem:[#allocation86_spill] sm:$0xff]  ;;  %v7283_v10 = vld [vmem:[#allocation87_spill] sm:$0xff]  ;;  %v7307_v46 = vld [vmem:[#allocation108_spill] sm:$0xff] }
 0x177   : > { %v5556_v11 = vadd.f32 %v1539_v51, %v1523_v43  ;;  %v1541_v20 = vsel %vm5308_vm1, %v1496_v44, 0.0  ;;  %2412 = vmatprep.subr.bf16.mxu0 %v7277_v4  ;;  %2455 = vmatprep.subr.bf16.mxu1 %v7279_v37  ;;  %v7284_v44 = vld [vmem:[#allocation88_spill] sm:$0xff]  ;;  %v7286_v47 = vld [vmem:[#allocation90_spill] sm:$0xff]  ;;  %v7306_v37 = vld [vmem:[#allocation141_spill] sm:$0xff] }
 0x178   : > { %v5562_v36 = vadd.f32 %v1541_v20, %v1525_v31  ;;  %v1540_v13 = vsel %vm5308_vm1, %v1495_v24, 0.0  ;;  %v1542_v51 = vsel %vm5308_vm1, %v1497_v38, 0.0  ;;  %v7285_v31 = vld [vmem:[#allocation89_spill] sm:$0xff]  ;;  %v7287_v24 = vld [vmem:[#allocation91_spill] sm:$0xff]  ;;  %v7288_v20 = vld [vmem:[#allocation92_spill] sm:$0xff]  ;;  %v2058_v4 = vadd.s32 16, %v7306_v37 }
 0x179   : > { %7275 = vst [vmem:[#allocation145_spill] sm:$0xff] %v5556_v11  ;;  %v5567_v15 = vadd.f32 %v1540_v13, %v1524_v56  ;;  %v5571_v43 = vadd.f32 %v1542_v51, %v1526_v41  ;;  %v7289_v56 = vld [vmem:[#allocation93_spill] sm:$0xff]  ;;  %v7291_v41 = vld [vmem:[#allocation95_spill] sm:$0xff]  ;;  %v7292_v38 = vld [vmem:[#allocation96_spill] sm:$0xff]  ;;  %v1565_v37 = vrot.slane %v5344_v12, 4 }
 0x17a   : > { %7278 = vst [vmem:[#allocation146_spill] sm:$0xff] %v5562_v36  ;;  %2413 = vmatpush1.bf16.msra.mxu0 %v7282_v18  ;;  %2456 = vmatpush1.bf16.msra.mxu1 %v7283_v10  ;;  %v7293_v13 = vld [vmem:[#allocation97_spill] sm:$0xff]  ;;  %v7294_v51 = vld [vmem:[#allocation98_spill] sm:$0xff]  ;;  %v7305_v18 = vld [vmem:[#allocation107_spill] sm:$0xff] }
 0x17b   : > { %7280 = vst [vmem:[#allocation147_spill] sm:$0xff] %v5567_v15  ;;  %7281 = vst [vmem:[#allocation148_spill] sm:$0xff] %v5571_v43  ;;  %2414 = vmatprep.subr.bf16.mxu0 %v7284_v44  ;;  %2457 = vmatprep.subr.bf16.mxu1 %v7285_v31  ;;  %v7295_v44 = vld [vmem:[#allocation99_spill] sm:$0xff]  ;;  %v7296_v31 = vld [vmem:[#allocation100_spill] sm:$0xff] }
 0x17c   : > { %v7304_v10 = vld [vmem:[#allocation138_spill] sm:$0xff]  ;;  %v7308_v43 = vld [vmem:[#allocation109_spill] sm:$0xff] }
 0x17e   : > { %2415 = vmatpush1.bf16.msra.mxu0 %v7286_v47  ;;  %2458 = vmatpush1.bf16.msra.mxu1 %v7287_v24  ;;  %v7297_v47 = vld [vmem:[#allocation101_spill] sm:$0xff]  ;;  %v7298_v24 = vld [vmem:[#allocation102_spill] sm:$0xff] }
 0x17f   : > { %2416 = vmatprep.subr.bf16.mxu0 %v7288_v20  ;;  %2459 = vmatprep.subr.bf16.mxu1 %v7289_v56  ;;  %v1544_v56 = vrot.slane %v5325_v39, 4  ;;  %v7299_v20 = vld [vmem:[#allocation103_spill] sm:$0xff] }
 0x182   : > { %2417 = vmatpush1.bf16.msra.mxu0 %v7290_v40  ;;  %2460 = vmatpush1.bf16.msra.mxu1 %v7291_v41  ;;  %v7300_v40 = vld [vmem:[#allocation104_spill] sm:$0xff]  ;;  %v7301_v41 = vld [vmem:[#allocation105_spill] sm:$0xff] }
 0x183   : > { %2418 = vmatprep.subr.bf16.mxu0 %v7292_v38  ;;  %2461 = vmatprep.subr.bf16.mxu1 %v7293_v13  ;;  %v1558_v13 = vrot.slane %v5333_v60, 4 }
 0x186   : > { %2419 = vmatpush1.bf16.msra.mxu0 %v7294_v51  ;;  %2462 = vmatpush1.bf16.msra.mxu1 %v7295_v44  ;;  %v7302_v44 = vld [vmem:[#allocation137_spill] sm:$0xff] }
 0x187   : > { %2420 = vmatprep.subr.bf16.mxu0 %v7296_v31  ;;  %2463 = vmatprep.subr.bf16.mxu1 %v7297_v47  ;;  %v2057_v31 = vadd.s32 16, %v5123_v55 }
 0x18a   : > { %2421 = vmatpush1.bf16.msra.mxu0 %v7298_v24  ;;  %2464 = vmatpush1.bf16.msra.mxu1 %v7299_v20  ;;  %v7303_v24 = vld [vmem:[#allocation106_spill] sm:$0xff]  ;;  %v1545_v20 = vadd.f32 %v1544_v56, %v5325_v39  ;;  %v1559_v39 = vadd.f32 %v1558_v13, %v5333_v60 }
 0x18b   : > { %2492 = vmatprep.subr.bf16.mxu0 %v7300_v40  ;;  %2535 = vmatprep.subr.bf16.mxu1 %v7301_v41 }
 0x18c   : > { %v1546_v15 = vrot.slane %v1545_v20, 2 }
 0x18d   : > { %v1714_v38 = vpop.f32.mrf.mxu0  ;;  %2439 = vmatmul.mubr.bf16.vlgmr.msra.gmra.mxu0 %v5451_v42  ;;  %v1757_v47 = vpop.f32.mrf.mxu1  ;;  %2482 = vmatmul.mubr.bf16.vlgmr.msra.gmra.mxu1 %v5451_v42 }
 0x18e   : > { %v1715_v51 = vadd.f32 %v1714_v38, %v7302_v44  ;;  %2493 = vmatpush1.bf16.msra.mxu0 %v7303_v24  ;;  %v1758_v40 = vadd.f32 %v1757_v47, %v7304_v10  ;;  %2536 = vmatpush1.bf16.msra.mxu1 %v7305_v18  ;;  %v1551_v38 = vrot.slane %v5340_v8, 4  ;;  %v7416_v24 = vld [vmem:[#allocation84_spill] sm:$0xff] }
 0x18f   : > { %v1716_v41 = vpop.f32.mrf.mxu0  ;;  %2494 = vmatprep.subr.bf16.mxu0 %v7307_v46  ;;  %v1759_v45 = vpop.f32.mrf.mxu1  ;;  %2537 = vmatprep.subr.bf16.mxu1 %v7308_v43  ;;  %v7309_v46 = vld [vmem:[#allocation142_spill] sm:$0xff] }
 0x190   : > { %v1717_v55 = vadd.f32 %v1716_v41, %v5273_v26  ;;  %2524 = vmatprep.mubr.bf16.mxu0 %v7060_v33  ;;  %v1760_v47 = vadd.f32 %v1759_v45, %v5279_v2  ;;  %2567 = vmatprep.mubr.bf16.mxu1 %v7060_v33  ;;  %v2024_v18 = vmax.f32 %v1715_v51, 0.0  ;;  %vm5614_vm2 = vcmp.lt.s32.totalorder %v2057_v31, %v7309_v46  ;;  %v7315_v51 = vld [vmem:[#allocation111_spill] sm:$0xff] }
 0x191   : > { %v1718_v56 = vpop.f32.mrf.mxu0  ;;  %v1761_v43 = vpop.f32.mrf.mxu1  ;;  %v2026_v60 = vmax.f32 %v1758_v40, 0.0  ;;  %vm5621_vm3 = vcmp.lt.s32.totalorder %v2058_v4, %v7309_v46  ;;  %v1552_v35 = vadd.f32 %v1551_v38, %v5340_v8  ;;  %v1560_v4 = vrot.slane %v1559_v39, 2  ;;  %v7316_v38 = vld [vmem:[#allocation114_spill] sm:$0xff] }
 0x192   : > { %v1719_v41 = vadd.f32 %v1718_v56, %v7302_v44  ;;  %2495 = vmatpush1.bf16.msra.mxu0 %v7312_v9  ;;  %v1762_v13 = vadd.f32 %v1761_v43, %v7304_v10  ;;  %2538 = vmatpush1.bf16.msra.mxu1 %v7315_v51  ;;  %v2025_v56 = vmax.f32 %v1717_v55, 0.0  ;;  %v2027_v40 = vmax.f32 %v1760_v47, 0.0 }
 0x193   : > { %v1720_v31 = vpop.f32.mrf.mxu0  ;;  %2496 = vmatprep.subr.bf16.mxu0 %v7192_v50  ;;  %v1763_v36 = vpop.f32.mrf.mxu1  ;;  %2539 = vmatprep.subr.bf16.mxu1 %v7193_v53  ;;  %v1566_v43 = vadd.f32 %v1565_v37, %v5344_v12  ;;  %v2065_v51 = vsel %vm5614_vm2, %v2024_v18, 0.0  ;;  %v1553_v12 = vrot.slane %v1552_v35, 2 }
 0x194   : > { %v2040_v44 = vmax.f32 %v1719_v41, 0.0  ;;  %v1721_v9 = vadd.f32 %v1720_v31, %v5273_v26  ;;  %v2042_v46 = vmax.f32 %v1762_v13, 0.0  ;;  %v1764_v11 = vadd.f32 %v1763_v36, %v5279_v2 }
 0x195   : > { %v2067_v41 = vsel %vm5614_vm2, %v2026_v60, 0.0  ;;  %v2066_v36 = vsel %vm5614_vm2, %v2025_v56, 0.0  ;;  %v2068_v18 = vsel %vm5614_vm2, %v2027_v40, 0.0  ;;  %v1567_v60 = vrot.slane %v1566_v43, 2 }
 0x196   : > { %v2081_v8 = vsel %vm5621_vm3, %v2040_v44, 0.0  ;;  %v2041_v55 = vmax.f32 %v1721_v9, 0.0  ;;  %2497 = vmatpush1.bf16.msra.mxu0 %v7316_v38  ;;  %v2083_v47 = vsel %vm5621_vm3, %v2042_v46, 0.0  ;;  %v2043_v13 = vmax.f32 %v1764_v11, 0.0  ;;  %2540 = vmatpush1.bf16.msra.mxu1 %v7195_v16 }
 0x197   : > { %v2097_v31 = vadd.f32 %v2081_v8, %v2065_v51  ;;  %2498 = vmatprep.subr.bf16.mxu0 %v7196_v54  ;;  %v2111_v37 = vadd.f32 %v2083_v47, %v2067_v41  ;;  %2541 = vmatprep.subr.bf16.mxu1 %v7197_v25  ;;  %v1547_v56 = vadd.f32 %v1546_v15, %v1545_v20 }
 0x198   : > { %v2082_v9 = vsel %vm5621_vm3, %v2041_v55, 0.0  ;;  %v2084_v11 = vsel %vm5621_vm3, %v2043_v13, 0.0  ;;  %v1561_v55 = vadd.f32 %v1560_v4, %v1559_v39  ;;  %v1568_v54 = vadd.f32 %v1567_v60, %v1566_v43 }
 0x199   : > { %v2098_v44 = vrot.slane %v2097_v31, 4  ;;  %v2104_v46 = vadd.f32 %v2082_v9, %v2066_v36  ;;  %v2112_v51 = vrot.slane %v2111_v37, 4  ;;  %v2118_v8 = vadd.f32 %v2084_v11, %v2068_v18 }
 0x19a   : > { %2499 = vmatpush1.bf16.msra.mxu0 %v7198_v62  ;;  %2542 = vmatpush1.bf16.msra.mxu1 %v7199_v61  ;;  %v1554_v36 = vadd.f32 %v1553_v12, %v1552_v35  ;;  %v1548_v15 = vrot.slane %v1547_v56, 1  ;;  %v1562_v39 = vrot.slane %v1561_v55, 1  ;;  %v1569_v43 = vrot.slane %v1568_v54, 1 }
 0x19b   : > { %v2099_v41 = vadd.f32 %v2098_v44, %v2097_v31  ;;  %v2105_v47 = vrot.slane %v2104_v46, 4  ;;  %2500 = vmatprep.subr.bf16.mxu0 %v7200_v5  ;;  %v2113_v25 = vadd.f32 %v2112_v51, %v2111_v37  ;;  %v2119_v40 = vrot.slane %v2118_v8, 4  ;;  %2543 = vmatprep.subr.bf16.mxu1 %v7201_v3 }
 0x19c   : > { %v1555_v35 = vrot.slane %v1554_v36, 1  ;;  %v1549_v60 = vadd.f32 %v1548_v15, %v1547_v56  ;;  %v7317_v15 = vld [vmem:[#allocation123_spill] sm:$0xff] }
 0x19d   : > { %v2100_v9 = vrot.slane %v2099_v41, 2  ;;  %v2106_v13 = vadd.f32 %v2105_v47, %v2104_v46  ;;  %v2114_v16 = vrot.slane %v2113_v25, 2  ;;  %v2120_v18 = vadd.f32 %v2119_v40, %v2118_v8 }
 0x19e   : > { %2501 = vmatpush1.bf16.msra.mxu0 %v5039_v49  ;;  %2544 = vmatpush1.bf16.msra.mxu1 %v5043_v48  ;;  %v1556_v47 = vadd.f32 %v1555_v35, %v1554_v36  ;;  %v7320_v36 = vld [vmem:[#allocation126_spill] sm:$0xff] }
 0x19f   : > { %v2101_v20 = vadd.f32 %v2100_v9, %v2099_v41  ;;  %v2107_v31 = vrot.slane %v2106_v13, 2  ;;  %2502 = vmatprep.subr.bf16.mxu0 %v5045_v34  ;;  %v2115_v4 = vadd.f32 %v2114_v16, %v2113_v25  ;;  %v2121_v37 = vrot.slane %v2120_v18, 2  ;;  %2545 = vmatprep.subr.bf16.mxu1 %v7202_v23  ;;  %v7323_v35 = vld [vmem:[#allocation10_spill] sm:$0xff] }
 0x1a0   : > { %v1563_v41 = vadd.f32 %v1562_v39, %v1561_v55  ;;  %v7319_v39 = vld [vmem:[#allocation125_spill] sm:$0xff] }
 0x1a1   : > { %v2102_v12 = vrot.slane %v2101_v20, 1  ;;  %v2108_v44 = vadd.f32 %v2107_v31, %v2106_v13  ;;  %v2116_v46 = vrot.slane %v2115_v4, 1  ;;  %v2122_v11 = vadd.f32 %v2121_v37, %v2120_v18  ;;  %v7322_v37 = vld [vmem:[#allocation8_spill] sm:$0xff] }
 0x1a2   : > { %2503 = vmatpush1.bf16.msra.mxu0 %v5055_v17  ;;  %2546 = vmatpush1.bf16.msra.mxu1 %v5059_v57  ;;  %v1570_v13 = vadd.f32 %v1569_v43, %v1568_v54  ;;  %v7321_v54 = vld [vmem:[#allocation127_spill] sm:$0xff]  ;;  %v7324_v43 = vld [vmem:[#allocation112_spill] sm:$0xff] }
 0x1a3   : > { %v2103_v51 = vadd.f32 %v2102_v12, %v2101_v20  ;;  %v2109_v8 = vrot.slane %v2108_v44, 1  ;;  %2504 = vmatprep.subr.bf16.mxu0 %v5061_v63  ;;  %v2117_v25 = vadd.f32 %v2116_v46, %v2115_v4  ;;  %v2123_v16 = vrot.slane %v2122_v11, 1  ;;  %2547 = vmatprep.subr.bf16.mxu1 %v5064_v0  ;;  %v7318_v20 = vld [vmem:[#allocation124_spill] sm:$0xff] }
 0x1a4   : > { %v1572_v4 = vrot.slane %v5413_v14, 4  ;;  %v1586_v12 = vrot.slane %v5421_v6, 4 }
 0x1a5   : > { %v5665_v40 = vadd.f32 %v2103_v51, %v1549_v60  ;;  %v2110_v9 = vadd.f32 %v2109_v8, %v2108_v44  ;;  %v5667_v18 = vadd.f32 %v2117_v25, %v1563_v41  ;;  %v2124_v31 = vadd.f32 %v2123_v16, %v2122_v11  ;;  %v7325_v60 = vld [vmem:[#allocation9_spill] sm:$0xff]  ;;  %v7326_v41 = vld [vmem:[#allocation11_spill] sm:$0xff]  ;;  %v7327_v16 = vld [vmem:[#allocation12_spill] sm:$0xff] }
 0x1a6   : > { %2505 = vmatpush1.bf16.msra.mxu0 %v5071_v1  ;;  %2548 = vmatpush1.bf16.msra.mxu1 %v7317_v15  ;;  %v1573_v51 = vadd.f32 %v1572_v4, %v5413_v14 }
 0x1a7   : > { %v5670_v56 = vadd.f32 %v2110_v9, %v1556_v47  ;;  %2506 = vmatprep.subr.bf16.mxu0 %v7318_v20  ;;  %v5674_v55 = vadd.f32 %v2124_v31, %v1570_v13  ;;  %2549 = vmatprep.subr.bf16.mxu1 %v7319_v39  ;;  %v1579_v47 = vrot.slane %v5428_v7, 4  ;;  %v7328_v31 = vld [vmem:[#allocation13_spill] sm:$0xff] }
 0x1aa   : > { %2507 = vmatpush1.bf16.msra.mxu0 %v7320_v36  ;;  %2550 = vmatpush1.bf16.msra.mxu1 %v7321_v54 }
 0x1ab   : > { %2788 = vmatprep.subr.bf16.mxu0 %v7322_v37  ;;  %2831 = vmatprep.subr.bf16.mxu1 %v7323_v35  ;;  %v7329_v35 = vld [vmem:[#allocation15_spill] sm:$0xff] }
 0x1ad   : > { %v1800_v44 = vpop.f32.mrf.mxu0  ;;  %2525 = vmatmul.mubr.bf16.vlgmr.msra.gmra.mxu0 %v5451_v42  ;;  %v1843_v11 = vpop.f32.mrf.mxu1  ;;  %2568 = vmatmul.mubr.bf16.vlgmr.msra.gmra.mxu1 %v5451_v42  ;;  %v1587_v42 = vadd.f32 %v1586_v12, %v5421_v6  ;;  %v1580_v12 = vadd.f32 %v1579_v47, %v5428_v7 }
 0x1ae   : > { %v1801_v46 = vadd.f32 %v1800_v44, %v7324_v43  ;;  %2789 = vmatpush1.bf16.msra.mxu0 %v7325_v60  ;;  %v1844_v8 = vadd.f32 %v1843_v11, %v5372_v59  ;;  %2832 = vmatpush1.bf16.msra.mxu1 %v7326_v41  ;;  %v1593_v44 = vrot.slane %v5432_v58, 4 }
 0x1af   : > { %v1802_v25 = vpop.f32.mrf.mxu0  ;;  %2790 = vmatprep.subr.bf16.mxu0 %v7327_v16  ;;  %v1845_v13 = vpop.f32.mrf.mxu1  ;;  %2833 = vmatprep.subr.bf16.mxu1 %v7328_v31 }
 0x1b0   : > { %v1803_v9 = vadd.f32 %v1802_v25, %v5379_v52  ;;  %2820 = vmatprep.mubr.bf16.mxu0 %v7060_v33  ;;  %v1846_v14 = vadd.f32 %v1845_v13, %v5385_v32  ;;  %2863 = vmatprep.mubr.bf16.mxu1 %v7060_v33  ;;  %v2028_v11 = vmax.f32 %v1801_v46, 0.0  ;;  %v1574_v25 = vrot.slane %v1573_v51, 2 }
 0x1b1   : > { %v1804_v4 = vpop.f32.mrf.mxu0  ;;  %v1847_v41 = vpop.f32.mrf.mxu1  ;;  %v2030_v60 = vmax.f32 %v1844_v8, 0.0 }
 0x1b2   : > { %v1805_v16 = vadd.f32 %v1804_v4, %v7324_v43  ;;  %2791 = vmatpush1.bf16.msra.mxu0 %v4586_v19  ;;  %v1848_v31 = vadd.f32 %v1847_v41, %v5372_v59  ;;  %2834 = vmatpush1.bf16.msra.mxu1 %v7329_v35  ;;  %v2029_v13 = vmax.f32 %v1803_v9, 0.0  ;;  %v1588_v4 = vrot.slane %v1587_v42, 2 }
 0x1b3   : > { %v1806_v6 = vpop.f32.mrf.mxu0  ;;  %2792 = vmatprep.subr.bf16.mxu0 %v4592_v21  ;;  %v1849_v54 = vpop.f32.mrf.mxu1  ;;  %2835 = vmatprep.subr.bf16.mxu1 %v4596_v22  ;;  %v2031_v19 = vmax.f32 %v1846_v14, 0.0  ;;  %v1594_v41 = vadd.f32 %v1593_v44, %v5432_v58  ;;  %v2069_v35 = vsel %vm5614_vm2, %v2028_v11, 0.0  ;;  %v1581_v58 = vrot.slane %v1580_v12, 2 }
 0x1b4   : > { %v2044_v37 = vmax.f32 %v1805_v16, 0.0  ;;  %v1807_v46 = vadd.f32 %v1806_v6, %v5379_v52  ;;  %v2046_v43 = vmax.f32 %v1848_v31, 0.0  ;;  %v1850_v8 = vadd.f32 %v1849_v54, %v5385_v32 }
 0x1b5   : > { %v2071_v16 = vsel %vm5614_vm2, %v2030_v60, 0.0  ;;  %v2070_v54 = vsel %vm5614_vm2, %v2029_v13, 0.0  ;;  %v1595_v6 = vrot.slane %v1594_v41, 2  ;;  %v1575_v13 = vadd.f32 %v1574_v25, %v1573_v51 }
 0x1b6   : > { %v2085_v7 = vsel %vm5621_vm3, %v2044_v37, 0.0  ;;  %v2045_v47 = vmax.f32 %v1807_v46, 0.0  ;;  %2793 = vmatpush1.bf16.msra.mxu0 %v4603_v27  ;;  %v2087_v31 = vsel %vm5621_vm3, %v2046_v43, 0.0  ;;  %v2047_v14 = vmax.f32 %v1850_v8, 0.0  ;;  %2836 = vmatpush1.bf16.msra.mxu1 %v4607_v28  ;;  %v7333_v27 = vld [vmem:[#allocation25_spill] sm:$0xff] }
 0x1b7   : > { %v2125_v9 = vadd.f32 %v2085_v7, %v2069_v35  ;;  %2794 = vmatprep.subr.bf16.mxu0 %v4609_v29  ;;  %v2139_v37 = vadd.f32 %v2087_v31, %v2071_v16  ;;  %2837 = vmatprep.subr.bf16.mxu1 %v4617_v30  ;;  %v2072_v35 = vsel %vm5614_vm2, %v2031_v19, 0.0  ;;  %v7330_v7 = vld [vmem:[#allocation22_spill] sm:$0xff]  ;;  %v7331_v29 = vld [vmem:[#allocation23_spill] sm:$0xff]  ;;  %v1589_v30 = vadd.f32 %v1588_v4, %v1587_v42 }
 0x1b8   : > { %v2086_v44 = vsel %vm5621_vm3, %v2045_v47, 0.0  ;;  %v2088_v11 = vsel %vm5621_vm3, %v2047_v14, 0.0  ;;  %v7332_v47 = vld [vmem:[#allocation24_spill] sm:$0xff]  ;;  %v1596_v22 = vadd.f32 %v1595_v6, %v1594_v41  ;;  %v1576_v51 = vrot.slane %v1575_v13, 1 }
 0x1b9   : > { %v2126_v60 = vrot.slane %v2125_v9, 4  ;;  %v2132_v43 = vadd.f32 %v2086_v44, %v2070_v54  ;;  %v2140_v46 = vrot.slane %v2139_v37, 4  ;;  %v2146_v8 = vadd.f32 %v2088_v11, %v2072_v35  ;;  %v7334_v11 = vld [vmem:[#allocation26_spill] sm:$0xff] }
 0x1ba   : > { %2795 = vmatpush1.bf16.msra.mxu0 %v7330_v7  ;;  %2838 = vmatpush1.bf16.msra.mxu1 %v7331_v29  ;;  %v1582_v54 = vadd.f32 %v1581_v58, %v1580_v12  ;;  %v7336_v29 = vld [vmem:[#allocation28_spill] sm:$0xff]  ;;  %v1590_v42 = vrot.slane %v1589_v30, 1  ;;  %v1597_v41 = vrot.slane %v1596_v22, 1 }
 0x1bb   : > { %v2127_v16 = vadd.f32 %v2126_v60, %v2125_v9  ;;  %v2133_v31 = vrot.slane %v2132_v43, 4  ;;  %2796 = vmatprep.subr.bf16.mxu0 %v7332_v47  ;;  %v2141_v28 = vadd.f32 %v2140_v46, %v2139_v37  ;;  %v2147_v19 = vrot.slane %v2146_v8, 4  ;;  %2839 = vmatprep.subr.bf16.mxu1 %v7333_v27  ;;  %v7335_v60 = vld [vmem:[#allocation27_spill] sm:$0xff]  ;;  %v7337_v46 = vld [vmem:[#allocation29_spill] sm:$0xff]  ;;  %v7368_v47 = vld [vmem:[#allocation48_spill] sm:$0xff] }
 0x1bc   : > { %v1583_v12 = vrot.slane %v1582_v54, 1 }
 0x1bd   : > { %v2128_v44 = vrot.slane %v2127_v16, 2  ;;  %v2134_v14 = vadd.f32 %v2133_v31, %v2132_v43  ;;  %v2142_v21 = vrot.slane %v2141_v28, 2  ;;  %v2148_v35 = vadd.f32 %v2147_v19, %v2146_v8  ;;  %v7338_v31 = vld [vmem:[#allocation30_spill] sm:$0xff] }
 0x1be   : > { %2797 = vmatpush1.bf16.msra.mxu0 %v7334_v11  ;;  %2840 = vmatpush1.bf16.msra.mxu1 %v7335_v60  ;;  %v1577_v19 = vadd.f32 %v1576_v51, %v1575_v13  ;;  %v7339_v11 = vld [vmem:[#allocation31_spill] sm:$0xff]  ;;  %v7340_v60 = vld [vmem:[#allocation32_spill] sm:$0xff]  ;;  %v1584_v27 = vadd.f32 %v1583_v12, %v1582_v54  ;;  %v7344_v51 = vld [vmem:[#allocation34_spill] sm:$0xff] }
 0x1bf   : > { %v2129_v25 = vadd.f32 %v2128_v44, %v2127_v16  ;;  %v2135_v9 = vrot.slane %v2134_v14, 2  ;;  %2798 = vmatprep.subr.bf16.mxu0 %v7336_v29  ;;  %v2143_v4 = vadd.f32 %v2142_v21, %v2141_v28  ;;  %v2149_v37 = vrot.slane %v2148_v35, 2  ;;  %2841 = vmatprep.subr.bf16.mxu1 %v7337_v46  ;;  %v7341_v46 = vld [vmem:[#allocation33_spill] sm:$0xff]  ;;  %v5754_v54 = vld [vmem:[%s4614_s15 + $0x18] sm:$0xff]   ;;  %v7350_v12 = vld [vmem:[#allocation38_spill] sm:$0xff] }
 0x1c0   : > { %v1591_v29 = vadd.f32 %v1590_v42, %v1589_v30  ;;  %v7347_v30 = vld [vmem:[#allocation36_spill] sm:$0xff] }
 0x1c1   : > { %v2130_v58 = vrot.slane %v2129_v25, 1  ;;  %v2136_v43 = vadd.f32 %v2135_v9, %v2134_v14  ;;  %v2144_v6 = vrot.slane %v2143_v4, 1  ;;  %v2150_v8 = vadd.f32 %v2149_v37, %v2148_v35 }
 0x1c2   : > { %2799 = vmatpush1.bf16.msra.mxu0 %v7338_v31  ;;  %2842 = vmatpush1.bf16.msra.mxu1 %v7339_v11  ;;  %v1598_v35 = vadd.f32 %v1597_v41, %v1596_v22  ;;  %v7351_v22 = vld [vmem:[#allocation39_spill] sm:$0xff]  ;;  %v7354_v41 = vld [vmem:[#allocation129_spill] sm:$0xff] }
 0x1c3   : > { %v2131_v16 = vadd.f32 %v2130_v58, %v2129_v25  ;;  %v2137_v44 = vrot.slane %v2136_v43, 1  ;;  %2800 = vmatprep.subr.bf16.mxu0 %v7340_v60  ;;  %v2145_v21 = vadd.f32 %v2144_v6, %v2143_v4  ;;  %v2151_v28 = vrot.slane %v2150_v8, 1  ;;  %2843 = vmatprep.subr.bf16.mxu1 %v7341_v46  ;;  %v7346_v58 = vld [vmem:[#allocation35_spill] sm:$0xff]  ;;  %v7349_v4 = vld [vmem:[#allocation37_spill] sm:$0xff] }
 0x1c4   : > { %v7367_v11 = vld [vmem:[#allocation47_spill] sm:$0xff] }
 0x1c5   : > { %v5741_v14 = vadd.f32 %v2131_v16, %v1577_v19  ;;  %v2138_v9 = vadd.f32 %v2137_v44, %v2136_v43  ;;  %v5743_v37 = vadd.f32 %v2145_v21, %v1591_v29  ;;  %v2152_v13 = vadd.f32 %v2151_v28, %v2150_v8  ;;  %v7352_v29 = vld [vmem:[#allocation40_spill] sm:$0xff]  ;;  %v7353_v43 = vld [vmem:[#allocation41_spill] sm:$0xff]  ;;  %v7355_v19 = vld [vmem:[#allocation42_spill] sm:$0xff] }
 0x1c6   : > { %2801 = vmatpush1.bf16.msra.mxu0 %v7344_v51  ;;  %2844 = vmatpush1.bf16.msra.mxu1 %v7346_v58  ;;  %v7356_v16 = vld [vmem:[#allocation120_spill] sm:$0xff]  ;;  %v7357_v21 = vld [vmem:[#allocation130_spill] sm:$0xff] }
 0x1c7   : > { %7342 = vst [vmem:[#allocation114_spill] sm:$0xff] %v5741_v14  ;;  %7343 = vst [vmem:[#allocation123_spill] sm:$0xff] %v5743_v37  ;;  %v5746_v25 = vadd.f32 %v2138_v9, %v1584_v27  ;;  %2802 = vmatprep.subr.bf16.mxu0 %v7347_v30  ;;  %v5750_v42 = vadd.f32 %v2152_v13, %v1598_v35  ;;  %2845 = vmatprep.subr.bf16.mxu1 %v7349_v4  ;;  %v1600_v44 = vrot.slane %v7356_v16, 4  ;;  %v7358_v9 = vld [vmem:[#allocation43_spill] sm:$0xff]  ;;  %v7359_v13 = vld [vmem:[#allocation44_spill] sm:$0xff] }
 0x1c9   : > { %7345 = vst [vmem:[#allocation124_spill] sm:$0xff] %v5746_v25  ;;  %7348 = vst [vmem:[#allocation125_spill] sm:$0xff] %v5750_v42  ;;  %v7362_v42 = vld [vmem:[#allocation45_spill] sm:$0xff]  ;;  %v7364_v25 = vld [vmem:[#allocation132_spill] sm:$0xff]  ;;  %v1601_v46 = vadd.f32 %v1600_v44, %v7356_v16 }
 0x1ca   : > { %2803 = vmatpush1.bf16.msra.mxu0 %v7350_v12  ;;  %2846 = vmatpush1.bf16.msra.mxu1 %v7351_v22  ;;  %v7361_v12 = vld [vmem:[#allocation131_spill] sm:$0xff]  ;;  %v7369_v44 = vld [vmem:[#allocation49_spill] sm:$0xff] }
 0x1cb   : > { %2874 = vmatprep.subr.bf16.mxu0 %v7352_v29  ;;  %2917 = vmatprep.subr.bf16.mxu1 %v7353_v43  ;;  %v7360_v43 = vld [vmem:[#allocation122_spill] sm:$0xff] }
 0x1cc   : > { %v1614_v29 = vrot.slane %v7360_v43, 4 }
 0x1cd   : > { %v1886_v27 = vpop.f32.mrf.mxu0  ;;  %2821 = vmatmul.mubr.bf16.vlgmr.msra.gmra.mxu0 %v5754_v54  ;;  %v1929_v8 = vpop.f32.mrf.mxu1  ;;  %2864 = vmatmul.mubr.bf16.vlgmr.msra.gmra.mxu1 %v5754_v54 }
 0x1ce   : > { %v1887_v6 = vadd.f32 %v1886_v27, %v7354_v41  ;;  %2875 = vmatpush1.bf16.msra.mxu0 %v7355_v19  ;;  %v1930_v28 = vadd.f32 %v1929_v8, %v7357_v21  ;;  %2918 = vmatpush1.bf16.msra.mxu1 %v7358_v9  ;;  %v7363_v19 = vld [vmem:[#allocation143_spill] sm:$0xff]  ;;  %v7365_v9 = vld [vmem:[#allocation144_spill] sm:$0xff] }
 0x1cf   : > { %v1888_v35 = vpop.f32.mrf.mxu0  ;;  %2876 = vmatprep.subr.bf16.mxu0 %v7359_v13  ;;  %v1931_v27 = vpop.f32.mrf.mxu1  ;;  %2919 = vmatprep.subr.bf16.mxu1 %v7362_v42  ;;  %v1607_v30 = vrot.slane %v7363_v19, 4  ;;  %v1621_v13 = vrot.slane %v7365_v9, 4  ;;  %v7366_v42 = vld [vmem:[#allocation46_spill] sm:$0xff] }
 0x1d0   : > { %v2032_v22 = vmax.f32 %v1887_v6, 0.0  ;;  %v1889_v4 = vadd.f32 %v1888_v35, %v7361_v12  ;;  %2906 = vmatprep.mubr.bf16.mxu0 %v7060_v33  ;;  %v2034_v58 = vmax.f32 %v1930_v28, 0.0  ;;  %v1932_v8 = vadd.f32 %v1931_v27, %v7364_v25  ;;  %2949 = vmatprep.mubr.bf16.mxu1 %v7060_v33 }
 0x1d1   : > { %v1890_v51 = vpop.f32.mrf.mxu0  ;;  %v1933_v14 = vpop.f32.mrf.mxu1 }
 0x1d2   : > { %v2073_v6 = vsel %vm5614_vm2, %v2032_v22, 0.0  ;;  %v2033_v37 = vmax.f32 %v1889_v4, 0.0  ;;  %v1891_v35 = vadd.f32 %v1890_v51, %v7354_v41  ;;  %2877 = vmatpush1.bf16.msra.mxu0 %v7366_v42  ;;  %v2075_v28 = vsel %vm5614_vm2, %v2034_v58, 0.0  ;;  %2920 = vmatpush1.bf16.msra.mxu1 %v7367_v11  ;;  %v7377_v41 = vld [vmem:[#allocation57_spill] sm:$0xff] }
 0x1d3   : > { %v2035_v27 = vmax.f32 %v1932_v8, 0.0  ;;  %v1934_v60 = vadd.f32 %v1933_v14, %v7357_v21  ;;  %v1892_v31 = vpop.f32.mrf.mxu0  ;;  %2878 = vmatprep.subr.bf16.mxu0 %v7368_v47  ;;  %v1615_v4 = vadd.f32 %v1614_v29, %v7360_v43  ;;  %v1935_v16 = vpop.f32.mrf.mxu1  ;;  %2921 = vmatprep.subr.bf16.mxu1 %v7369_v44  ;;  %v1608_v58 = vadd.f32 %v1607_v30, %v7363_v19  ;;  %v7370_v43 = vld [vmem:[#allocation50_spill] sm:$0xff]  ;;  %v7371_v19 = vld [vmem:[#allocation51_spill] sm:$0xff] }
 0x1d4   : > { %v2074_v51 = vsel %vm5614_vm2, %v2033_v37, 0.0  ;;  %v2048_v22 = vmax.f32 %v1891_v35, 0.0  ;;  %v1893_v42 = vadd.f32 %v1892_v31, %v7361_v12  ;;  %v1936_v11 = vadd.f32 %v1935_v16, %v7364_v25  ;;  %v7374_v25 = vld [vmem:[#allocation54_spill] sm:$0xff] }
 0x1d5   : > { %v2076_v14 = vsel %vm5614_vm2, %v2035_v27, 0.0  ;;  %v2050_v8 = vmax.f32 %v1934_v60, 0.0  ;;  %v1622_v47 = vadd.f32 %v1621_v13, %v7365_v9  ;;  %v1602_v31 = vrot.slane %v1601_v46, 2  ;;  %v7372_v27 = vld [vmem:[#allocation52_spill] sm:$0xff]  ;;  %v7373_v13 = vld [vmem:[#allocation53_spill] sm:$0xff] }
 0x1d6   : > { %v2089_v29 = vsel %vm5621_vm3, %v2048_v22, 0.0  ;;  %v2049_v37 = vmax.f32 %v1893_v42, 0.0  ;;  %2879 = vmatpush1.bf16.msra.mxu0 %v7370_v43  ;;  %v2051_v30 = vmax.f32 %v1936_v11, 0.0  ;;  %2922 = vmatpush1.bf16.msra.mxu1 %v7371_v19  ;;  %v1616_v60 = vrot.slane %v1615_v4, 2 }
 0x1d7   : > { %v2153_v35 = vadd.f32 %v2089_v29, %v2073_v6  ;;  %v2091_v44 = vsel %vm5621_vm3, %v2050_v8, 0.0  ;;  %2880 = vmatprep.subr.bf16.mxu0 %v7372_v27  ;;  %2923 = vmatprep.subr.bf16.mxu1 %v7373_v13  ;;  %v1609_v42 = vrot.slane %v1608_v58, 2  ;;  %v1623_v29 = vrot.slane %v1622_v47, 2 }
 0x1d8   : > { %v2167_v16 = vadd.f32 %v2091_v44, %v2075_v28  ;;  %v2090_v9 = vsel %vm5621_vm3, %v2049_v37, 0.0  ;;  %v2092_v6 = vsel %vm5621_vm3, %v2051_v30, 0.0  ;;  %v1603_v19 = vadd.f32 %v1602_v31, %v1601_v46  ;;  %v7375_v28 = vld [vmem:[#allocation55_spill] sm:$0xff]  ;;  %v7376_v44 = vld [vmem:[#allocation56_spill] sm:$0xff] }
 0x1d9   : > { %v2154_v22 = vrot.slane %v2153_v35, 4  ;;  %v2160_v43 = vadd.f32 %v2090_v9, %v2074_v51  ;;  %v2174_v11 = vadd.f32 %v2092_v6, %v2076_v14  ;;  %v1617_v37 = vadd.f32 %v1616_v60, %v1615_v4  ;;  %v7378_v6 = vld [vmem:[#allocation58_spill] sm:$0xff] }
 0x1da   : > { %v2168_v8 = vrot.slane %v2167_v16, 4  ;;  %2881 = vmatpush1.bf16.msra.mxu0 %v7374_v25  ;;  %2924 = vmatpush1.bf16.msra.mxu1 %v7375_v28  ;;  %v1610_v51 = vadd.f32 %v1609_v42, %v1608_v58  ;;  %v1624_v7 = vadd.f32 %v1623_v29, %v1622_v47  ;;  %v1604_v46 = vrot.slane %v1603_v19, 1  ;;  %v7380_v28 = vld [vmem:[#allocation60_spill] sm:$0xff]  ;;  %v7382_v29 = vld [vmem:[#allocation62_spill] sm:$0xff] }
 0x1db   : > { %v2155_v27 = vadd.f32 %v2154_v22, %v2153_v35  ;;  %v2161_v12 = vrot.slane %v2160_v43, 4  ;;  %2882 = vmatprep.subr.bf16.mxu0 %v7376_v44  ;;  %v2175_v21 = vrot.slane %v2174_v11, 4  ;;  %2925 = vmatprep.subr.bf16.mxu1 %v7377_v41  ;;  %v7379_v22 = vld [vmem:[#allocation59_spill] sm:$0xff]  ;;  %v1618_v4 = vrot.slane %v1617_v37, 1  ;;  %v7385_v41 = vld [vmem:[#allocation65_spill] sm:$0xff] }
 0x1dc   : > { %v2169_v13 = vadd.f32 %v2168_v8, %v2167_v16  ;;  %v7381_v8 = vld [vmem:[#allocation61_spill] sm:$0xff]  ;;  %v1611_v58 = vrot.slane %v1610_v51, 1  ;;  %v1625_v47 = vrot.slane %v1624_v7, 1 }
 0x1dd   : > { %v2156_v9 = vrot.slane %v2155_v27, 2  ;;  %v2162_v30 = vadd.f32 %v2161_v12, %v2160_v43  ;;  %v2176_v14 = vadd.f32 %v2175_v21, %v2174_v11  ;;  %v1605_v11 = vadd.f32 %v1604_v46, %v1603_v19  ;;  %v7388_v19 = vld [vmem:[#allocation66_spill] sm:$0xff] }
 0x1de   : > { %v2170_v32 = vrot.slane %v2169_v13, 2  ;;  %2883 = vmatpush1.bf16.msra.mxu0 %v7378_v6  ;;  %2926 = vmatpush1.bf16.msra.mxu1 %v7379_v22  ;;  %v7383_v6 = vld [vmem:[#allocation63_spill] sm:$0xff]  ;;  %v7384_v22 = vld [vmem:[#allocation64_spill] sm:$0xff] }
 0x1df   : > { %v2157_v31 = vadd.f32 %v2156_v9, %v2155_v27  ;;  %v2163_v35 = vrot.slane %v2162_v30, 2  ;;  %2884 = vmatprep.subr.bf16.mxu0 %v7380_v28  ;;  %v2177_v16 = vrot.slane %v2176_v14, 2  ;;  %2927 = vmatprep.subr.bf16.mxu1 %v7381_v8  ;;  %v1619_v28 = vadd.f32 %v1618_v4, %v1617_v37  ;;  %v7393_v4 = vld [vmem:[#allocation69_spill] sm:$0xff] }
 0x1e0   : > { %v2171_v60 = vadd.f32 %v2170_v32, %v2169_v13  ;;  %v1612_v8 = vadd.f32 %v1611_v58, %v1610_v51  ;;  %v7394_v51 = vld [vmem:[#allocation70_spill] sm:$0xff] }
 0x1e1   : > { %v2158_v42 = vrot.slane %v2157_v31, 1  ;;  %v2164_v12 = vadd.f32 %v2163_v35, %v2162_v30  ;;  %v2178_v21 = vadd.f32 %v2177_v16, %v2176_v14  ;;  %v1626_v35 = vadd.f32 %v1625_v47, %v1624_v7  ;;  %v7396_v7 = vld [vmem:[#allocation72_spill] sm:$0xff] }
 0x1e2   : > { %v2172_v43 = vrot.slane %v2171_v60, 1  ;;  %2885 = vmatpush1.bf16.msra.mxu0 %v7382_v29  ;;  %2928 = vmatpush1.bf16.msra.mxu1 %v7383_v6  ;;  %v7412_v6 = vld [vmem:[#allocation80_spill] sm:$0xff] }
 0x1e3   : > { %v2159_v27 = vadd.f32 %v2158_v42, %v2157_v31  ;;  %v2165_v9 = vrot.slane %v2164_v12, 1  ;;  %2886 = vmatprep.subr.bf16.mxu0 %v7384_v22  ;;  %v2179_v13 = vrot.slane %v2178_v21, 1  ;;  %2929 = vmatprep.subr.bf16.mxu1 %v7385_v41  ;;  %v7390_v31 = vld [vmem:[#allocation67_spill] sm:$0xff]  ;;  %v7391_v42 = vld [vmem:[#allocation68_spill] sm:$0xff] }
 0x1e4   : > { %v2173_v32 = vadd.f32 %v2172_v43, %v2171_v60  ;;  %v7395_v60 = vld [vmem:[#allocation71_spill] sm:$0xff]  ;;  %v7399_v43 = vld [vmem:[#allocation74_spill] sm:$0xff] }
 0x1e5   : > { %v5820_v44 = vadd.f32 %v2159_v27, %v1605_v11  ;;  %v2166_v30 = vadd.f32 %v2165_v9, %v2164_v12  ;;  %v2180_v16 = vadd.f32 %v2179_v13, %v2178_v21  ;;  %v7400_v21 = vld [vmem:[#allocation145_spill] sm:$0xff]  ;;  %v7401_v27 = vld [vmem:[#allocation134_spill] sm:$0xff]  ;;  %v7411_v41 = vld [vmem:[#allocation79_spill] sm:$0xff] }
 0x1e6   : > { %v5822_v14 = vadd.f32 %v2173_v32, %v1619_v28  ;;  %2887 = vmatpush1.bf16.msra.mxu0 %v7388_v19  ;;  %2930 = vmatpush1.bf16.msra.mxu1 %v7390_v31  ;;  %v7397_v28 = vld [vmem:[#allocation73_spill] sm:$0xff]  ;;  %v1628_v11 = vrot.slane %v7400_v21, 4  ;;  %v7402_v32 = vld [vmem:[#allocation75_spill] sm:$0xff] }
 0x1e7   : > { %7386 = vst [vmem:[#allocation126_spill] sm:$0xff] %v5820_v44  ;;  %v5825_v46 = vadd.f32 %v2166_v30, %v1612_v8  ;;  %2888 = vmatprep.subr.bf16.mxu0 %v7391_v42  ;;  %v5829_v37 = vadd.f32 %v2180_v16, %v1626_v35  ;;  %2931 = vmatprep.subr.bf16.mxu1 %v7393_v4  ;;  %v7398_v8 = vld [vmem:[#allocation133_spill] sm:$0xff]  ;;  %v7403_v30 = vld [vmem:[#allocation76_spill] sm:$0xff]  ;;  %v7404_v35 = vld [vmem:[#allocation146_spill] sm:$0xff] }
 0x1e8   : > { %7387 = vst [vmem:[#allocation120_spill] sm:$0xff] %v5822_v14  ;;  %v1642_v16 = vrot.slane %v7404_v35, 4  ;;  %v7408_v42 = vld [vmem:[#allocation136_spill] sm:$0xff]  ;;  %v1629_v14 = vadd.f32 %v1628_v11, %v7400_v21  ;;  %v7413_v11 = vld [vmem:[#allocation81_spill] sm:$0xff] }
 0x1e9   : > { %7389 = vst [vmem:[#allocation122_spill] sm:$0xff] %v5825_v46  ;;  %7392 = vst [vmem:[#allocation143_spill] sm:$0xff] %v5829_v37 }
 0x1ea   : > { %2889 = vmatpush1.bf16.msra.mxu0 %v7394_v51  ;;  %2932 = vmatpush1.bf16.msra.mxu1 %v7395_v60  ;;  %v7406_v51 = vld [vmem:[#allocation77_spill] sm:$0xff] }
 0x1eb   : > { %2960 = vmatprep.subr.bf16.mxu0 %v7396_v7  ;;  %3003 = vmatprep.subr.bf16.mxu1 %v7397_v28  ;;  %v7405_v7 = vld [vmem:[#allocation135_spill] sm:$0xff] }
 0x1ed   : > { %v1972_v58 = vpop.f32.mrf.mxu0  ;;  %2907 = vmatmul.mubr.bf16.vlgmr.msra.gmra.mxu0 %v5754_v54  ;;  %v2015_v47 = vpop.f32.mrf.mxu1  ;;  %2950 = vmatmul.mubr.bf16.vlgmr.msra.gmra.mxu1 %v5754_v54 }
 0x1ee   : > { %v1973_v12 = vadd.f32 %v1972_v58, %v7398_v8  ;;  %2961 = vmatpush1.bf16.msra.mxu0 %v7399_v43  ;;  %v2016_v9 = vadd.f32 %v2015_v47, %v7401_v27  ;;  %3004 = vmatpush1.bf16.msra.mxu1 %v7402_v32  ;;  %v7407_v43 = vld [vmem:[#allocation147_spill] sm:$0xff]  ;;  %v7409_v32 = vld [vmem:[#allocation148_spill] sm:$0xff] }
 0x1ef   : > { %v1974_v13 = vpop.f32.mrf.mxu0  ;;  %2962 = vmatprep.subr.bf16.mxu0 %v7403_v30  ;;  %v2017_v58 = vpop.f32.mrf.mxu1  ;;  %3005 = vmatprep.subr.bf16.mxu1 %v7406_v51  ;;  %v1635_v4 = vrot.slane %v7407_v43, 4  ;;  %v1649_v30 = vrot.slane %v7409_v32, 4  ;;  %v7410_v51 = vld [vmem:[#allocation78_spill] sm:$0xff] }
 0x1f0   : > { %v2036_v28 = vmax.f32 %v1973_v12, 0.0  ;;  %v1975_v60 = vadd.f32 %v1974_v13, %v7405_v7  ;;  %2992 = vmatprep.mubr.bf16.mxu0 %v7060_v33  ;;  %v2038_v37 = vmax.f32 %v2016_v9, 0.0  ;;  %v2018_v47 = vadd.f32 %v2017_v58, %v7408_v42  ;;  %3035 = vmatprep.mubr.bf16.mxu1 %v7060_v33 }
 0x1f1   : > { %v1976_v31 = vpop.f32.mrf.mxu0  ;;  %v2019_v19 = vpop.f32.mrf.mxu1 }
 0x1f2   : > { %v2077_v12 = vsel %vm5614_vm2, %v2036_v28, 0.0  ;;  %v2037_v46 = vmax.f32 %v1975_v60, 0.0  ;;  %v1977_v13 = vadd.f32 %v1976_v31, %v7398_v8  ;;  %2963 = vmatpush1.bf16.msra.mxu0 %v7410_v51  ;;  %v2079_v9 = vsel %vm5614_vm2, %v2038_v37, 0.0  ;;  %3006 = vmatpush1.bf16.msra.mxu1 %v7411_v41 }
 0x1f3   : > { %v2039_v58 = vmax.f32 %v2018_v47, 0.0  ;;  %v2020_v44 = vadd.f32 %v2019_v19, %v7401_v27  ;;  %v1978_v22 = vpop.f32.mrf.mxu0  ;;  %2964 = vmatprep.subr.bf16.mxu0 %v7412_v6  ;;  %v1643_v60 = vadd.f32 %v1642_v16, %v7404_v35  ;;  %v2021_v21 = vpop.f32.mrf.mxu1  ;;  %3007 = vmatprep.subr.bf16.mxu1 %v7413_v11  ;;  %v1636_v37 = vadd.f32 %v1635_v4, %v7407_v43  ;;  %v7414_v16 = vld [vmem:[#allocation82_spill] sm:$0xff]  ;;  %v7415_v43 = vld [vmem:[#allocation83_spill] sm:$0xff]  ;;  %v7421_v27 = vld [vmem:[#allocation89_spill] sm:$0xff] }
 0x1f4   : > { %v2078_v31 = vsel %vm5614_vm2, %v2037_v46, 0.0  ;;  %v2052_v28 = vmax.f32 %v1977_v13, 0.0  ;;  %v1979_v51 = vadd.f32 %v1978_v22, %v7405_v7  ;;  %v2022_v41 = vadd.f32 %v2021_v21, %v7408_v42 }
 0x1f5   : > { %v2080_v19 = vsel %vm5614_vm2, %v2039_v58, 0.0  ;;  %v2054_v47 = vmax.f32 %v2020_v44, 0.0  ;;  %v1650_v6 = vadd.f32 %v1649_v30, %v7409_v32  ;;  %v1630_v22 = vrot.slane %v1629_v14, 2  ;;  %v7417_v30 = vld [vmem:[#allocation85_spill] sm:$0xff] }
 0x1f6   : > { %v2093_v35 = vsel %vm5621_vm3, %v2052_v28, 0.0  ;;  %v2053_v46 = vmax.f32 %v1979_v51, 0.0  ;;  %2965 = vmatpush1.bf16.msra.mxu0 %v7414_v16  ;;  %v2055_v4 = vmax.f32 %v2022_v41, 0.0  ;;  %3008 = vmatpush1.bf16.msra.mxu1 %v7415_v43  ;;  %v1644_v44 = vrot.slane %v1643_v60, 2  ;;  %v7418_v16 = vld [vmem:[#allocation86_spill] sm:$0xff] }
 0x1f7   : > { %v2181_v13 = vadd.f32 %v2093_v35, %v2077_v12  ;;  %v2095_v11 = vsel %vm5621_vm3, %v2054_v47, 0.0  ;;  %2966 = vmatprep.subr.bf16.mxu0 %v7416_v24  ;;  %3009 = vmatprep.subr.bf16.mxu1 %v7417_v30  ;;  %v1637_v51 = vrot.slane %v1636_v37, 2  ;;  %v1651_v35 = vrot.slane %v1650_v6, 2 }
 0x1f8   : > { %v2195_v58 = vadd.f32 %v2095_v11, %v2079_v9  ;;  %v2094_v32 = vsel %vm5621_vm3, %v2053_v46, 0.0  ;;  %v2096_v12 = vsel %vm5621_vm3, %v2055_v4, 0.0  ;;  %v1631_v43 = vadd.f32 %v1630_v22, %v1629_v14  ;;  %v7419_v9 = vld [vmem:[#allocation87_spill] sm:$0xff]  ;;  %v7420_v11 = vld [vmem:[#allocation88_spill] sm:$0xff] }
 0x1f9   : > { %v2182_v28 = vrot.slane %v2181_v13, 4  ;;  %v2188_v21 = vadd.f32 %v2094_v32, %v2078_v31  ;;  %v2202_v41 = vadd.f32 %v2096_v12, %v2080_v19  ;;  %v1645_v46 = vadd.f32 %v1644_v44, %v1643_v60  ;;  %v7422_v12 = vld [vmem:[#allocation90_spill] sm:$0xff] }
 0x1fa   : > { %v2196_v47 = vrot.slane %v2195_v58, 4  ;;  %2967 = vmatpush1.bf16.msra.mxu0 %v7418_v16  ;;  %3010 = vmatpush1.bf16.msra.mxu1 %v7419_v9  ;;  %v1638_v31 = vadd.f32 %v1637_v51, %v1636_v37  ;;  %v1652_v32 = vadd.f32 %v1651_v35, %v1650_v6  ;;  %v1632_v14 = vrot.slane %v1631_v43, 1  ;;  %v7424_v9 = vld [vmem:[#allocation92_spill] sm:$0xff]  ;;  %v7426_v35 = vld [vmem:[#allocation94_spill] sm:$0xff] }
 0x1fb   : > { %v2183_v24 = vadd.f32 %v2182_v28, %v2181_v13  ;;  %v2189_v42 = vrot.slane %v2188_v21, 4  ;;  %2968 = vmatprep.subr.bf16.mxu0 %v7420_v11  ;;  %v2203_v7 = vrot.slane %v2202_v41, 4  ;;  %3011 = vmatprep.subr.bf16.mxu1 %v7421_v27  ;;  %v7423_v28 = vld [vmem:[#allocation91_spill] sm:$0xff]  ;;  %v1646_v60 = vrot.slane %v1645_v46, 1  ;;  %v7429_v27 = vld [vmem:[#allocation97_spill] sm:$0xff] }
 0x1fc   : > { %v2197_v30 = vadd.f32 %v2196_v47, %v2195_v58  ;;  %v7425_v47 = vld [vmem:[#allocation93_spill] sm:$0xff]  ;;  %v1639_v37 = vrot.slane %v1638_v31, 1  ;;  %v1653_v6 = vrot.slane %v1652_v32, 1 }
 0x1fd   : > { %v2184_v45 = vrot.slane %v2183_v24, 2  ;;  %v2190_v4 = vadd.f32 %v2189_v42, %v2188_v21  ;;  %v2204_v19 = vadd.f32 %v2203_v7, %v2202_v41  ;;  %v1633_v41 = vadd.f32 %v1632_v14, %v1631_v43  ;;  %v7430_v43 = vld [vmem:[#allocation98_spill] sm:$0xff] }
 0x1fe   : > { %v2198_v8 = vrot.slane %v2197_v30, 2  ;;  %2969 = vmatpush1.bf16.msra.mxu0 %v7422_v12  ;;  %3012 = vmatpush1.bf16.msra.mxu1 %v7423_v28  ;;  %v7427_v12 = vld [vmem:[#allocation95_spill] sm:$0xff]  ;;  %v7428_v28 = vld [vmem:[#allocation96_spill] sm:$0xff] }
 0x1ff   : > { %v2185_v22 = vadd.f32 %v2184_v45, %v2183_v24  ;;  %v2191_v13 = vrot.slane %v2190_v4, 2  ;;  %2970 = vmatprep.subr.bf16.mxu0 %v7424_v9  ;;  %v2205_v58 = vrot.slane %v2204_v19, 2  ;;  %3013 = vmatprep.subr.bf16.mxu1 %v7425_v47  ;;  %v1647_v9 = vadd.f32 %v1646_v60, %v1645_v46  ;;  %v7433_v60 = vld [vmem:[#allocation101_spill] sm:$0xff] }
 0x200   : > { %v2199_v44 = vadd.f32 %v2198_v8, %v2197_v30  ;;  %v1640_v47 = vadd.f32 %v1639_v37, %v1638_v31  ;;  %v7434_v31 = vld [vmem:[#allocation102_spill] sm:$0xff] }
 0x201   : > { %v2186_v51 = vrot.slane %v2185_v22, 1  ;;  %v2192_v42 = vadd.f32 %v2191_v13, %v2190_v4  ;;  %v2206_v7 = vadd.f32 %v2205_v58, %v2204_v19  ;;  %v1654_v13 = vadd.f32 %v1653_v6, %v1652_v32  ;;  %v7436_v32 = vld [vmem:[#allocation104_spill] sm:$0xff] }
 0x202   : > { %v2200_v21 = vrot.slane %v2199_v44, 1  ;;  %2971 = vmatpush1.bf16.msra.mxu0 %v7426_v35  ;;  %3014 = vmatpush1.bf16.msra.mxu1 %v7427_v12 }
 0x203   : > { %v2187_v24 = vadd.f32 %v2186_v51, %v2185_v22  ;;  %v2193_v45 = vrot.slane %v2192_v42, 1  ;;  %2972 = vmatprep.subr.bf16.mxu0 %v7428_v28  ;;  %v2207_v30 = vrot.slane %v2206_v7, 1  ;;  %3015 = vmatprep.subr.bf16.mxu1 %v7429_v27  ;;  %v7431_v22 = vld [vmem:[#allocation99_spill] sm:$0xff]  ;;  %v7432_v51 = vld [vmem:[#allocation100_spill] sm:$0xff] }
 0x204   : > { %v2201_v8 = vadd.f32 %v2200_v21, %v2199_v44  ;;  %v7435_v44 = vld [vmem:[#allocation103_spill] sm:$0xff]  ;;  %v7439_v21 = vld [vmem:[#allocation106_spill] sm:$0xff] }
 0x205   : > { %v5896_v11 = vadd.f32 %v2187_v24, %v1633_v41  ;;  %v2194_v4 = vadd.f32 %v2193_v45, %v2192_v42  ;;  %v2208_v58 = vadd.f32 %v2207_v30, %v2206_v7  ;;  %v7440_v7 = vld [vmem:[#allocation128_spill] sm:$0xff]  ;;  %v7441_v45 = vld [vmem:[#allocation107_spill] sm:$0xff]  ;;  %v7442_v30 = vld [vmem:[#allocation141_spill] sm:$0xff] }
 0x206   : > { %v5898_v19 = vadd.f32 %v2201_v8, %v1647_v9  ;;  %2973 = vmatpush1.bf16.msra.mxu0 %v7430_v43  ;;  %3016 = vmatpush1.bf16.msra.mxu1 %v7431_v22  ;;  %v7437_v9 = vld [vmem:[#allocation105_spill] sm:$0xff]  ;;  %v2611_v41 = vadd.s32 32, %v7440_v7 }
 0x207   : > { %v5901_v14 = vadd.f32 %v2194_v4, %v1640_v47  ;;  %2974 = vmatprep.subr.bf16.mxu0 %v7432_v51  ;;  %v5905_v46 = vadd.f32 %v2208_v58, %v1654_v13  ;;  %3017 = vmatprep.subr.bf16.mxu1 %v7433_v60  ;;  %v7438_v47 = vld [vmem:[#allocation137_spill] sm:$0xff]  ;;  %v2612_v4 = vadd.s32 32, %v7442_v30  ;;  %v7443_v13 = vld [vmem:[#allocation108_spill] sm:$0xff]  ;;  %v7446_v30 = vld [vmem:[#allocation142_spill] sm:$0xff] }
 0x208   : > { %vm5929_vm4 = vcmp.lt.s32.totalorder %v2611_v41, %v7446_v30 }
 0x209   : > { %vm5934_vm5 = vcmp.lt.s32.totalorder %v2612_v4, %v7446_v30 }
 0x20a   : > { %2975 = vmatpush1.bf16.msra.mxu0 %v7434_v31  ;;  %3018 = vmatpush1.bf16.msra.mxu1 %v7435_v44  ;;  %v7445_v44 = vld [vmem:[#allocation110_spill] sm:$0xff]  ;;  %v7451_v31 = vld [vmem:[#allocation111_spill] sm:$0xff] }
 0x20b   : > { %3046 = vmatprep.subr.bf16.mxu0 %v7436_v32  ;;  %3089 = vmatprep.subr.bf16.mxu1 %v7437_v9 }
 0x20d   : > { %v2268_v37 = vpop.f32.mrf.mxu0  ;;  %2993 = vmatmul.mubr.bf16.vlgmr.msra.gmra.mxu0 %v5754_v54  ;;  %v2311_v6 = vpop.f32.mrf.mxu1  ;;  %3036 = vmatmul.mubr.bf16.vlgmr.msra.gmra.mxu1 %v5754_v54 }
 0x20e   : > { %v2269_v42 = vadd.f32 %v2268_v37, %v7438_v47  ;;  %3047 = vmatpush1.bf16.msra.mxu0 %v7439_v21  ;;  %v2312_v24 = vadd.f32 %v2311_v6, %v7304_v10  ;;  %3090 = vmatpush1.bf16.msra.mxu1 %v7441_v45  ;;  %v7444_v37 = vld [vmem:[#allocation109_spill] sm:$0xff] }
 0x20f   : > { %v2270_v8 = vpop.f32.mrf.mxu0  ;;  %3048 = vmatprep.subr.bf16.mxu0 %v7443_v13  ;;  %v2313_v9 = vpop.f32.mrf.mxu1  ;;  %3091 = vmatprep.subr.bf16.mxu1 %v7444_v37  ;;  %v7563_v37 = vld [vmem:[#allocation90_spill] sm:$0xff] }
 0x210   : > { %v2271_v58 = vadd.f32 %v2270_v8, %v5273_v26  ;;  %3078 = vmatprep.mubr.bf16.mxu0 %v7060_v33  ;;  %v2314_v21 = vadd.f32 %v2313_v9, %v5279_v2  ;;  %3121 = vmatprep.mubr.bf16.mxu1 %v7060_v33  ;;  %v2578_v6 = vmax.f32 %v2269_v42, 0.0  ;;  %v2580_v8 = vmax.f32 %v2312_v24, 0.0 }
 0x211   : > { %v2272_v32 = vpop.f32.mrf.mxu0  ;;  %v2315_v45 = vpop.f32.mrf.mxu1 }
 0x212   : > { %v2273_v7 = vadd.f32 %v2272_v32, %v7438_v47  ;;  %3049 = vmatpush1.bf16.msra.mxu0 %v7445_v44  ;;  %v2316_v9 = vadd.f32 %v2315_v45, %v7304_v10  ;;  %3092 = vmatpush1.bf16.msra.mxu1 %v7451_v31  ;;  %v2579_v32 = vmax.f32 %v2271_v58, 0.0  ;;  %v2581_v24 = vmax.f32 %v2314_v21, 0.0 }
 0x213   : > { %v2274_v42 = vpop.f32.mrf.mxu0  ;;  %3050 = vmatprep.subr.bf16.mxu0 %v7192_v50  ;;  %v2317_v44 = vpop.f32.mrf.mxu1  ;;  %3093 = vmatprep.subr.bf16.mxu1 %v7193_v53  ;;  %v2619_v30 = vsel %vm5929_vm4, %v2578_v6, 0.0 }
 0x214   : > { %v2594_v47 = vmax.f32 %v2273_v7, 0.0  ;;  %v2275_v41 = vadd.f32 %v2274_v42, %v5273_v26  ;;  %v2596_v60 = vmax.f32 %v2316_v9, 0.0  ;;  %v2318_v4 = vadd.f32 %v2317_v44, %v5279_v2  ;;  %v7452_v9 = vld [vmem:[#allocation115_spill] sm:$0xff]  ;;  %v7453_v44 = vld [vmem:[#allocation116_spill] sm:$0xff] }
 0x215   : > { %v2621_v7 = vsel %vm5929_vm4, %v2580_v8, 0.0  ;;  %v2620_v6 = vsel %vm5929_vm4, %v2579_v32, 0.0 }
 0x216   : > { %v2635_v45 = vsel %vm5934_vm5, %v2594_v47, 0.0  ;;  %v2595_v10 = vmax.f32 %v2275_v41, 0.0  ;;  %3051 = vmatpush1.bf16.msra.mxu0 %v7316_v38  ;;  %v2637_v42 = vsel %vm5934_vm5, %v2596_v60, 0.0  ;;  %v2597_v21 = vmax.f32 %v2318_v4, 0.0  ;;  %3094 = vmatpush1.bf16.msra.mxu1 %v7452_v9  ;;  %v7454_v41 = vld [vmem:[#allocation117_spill] sm:$0xff] }
 0x217   : > { %v2651_v58 = vadd.f32 %v2635_v45, %v2619_v30  ;;  %3052 = vmatprep.subr.bf16.mxu0 %v7453_v44  ;;  %v2665_v2 = vadd.f32 %v2637_v42, %v2621_v7  ;;  %3095 = vmatprep.subr.bf16.mxu1 %v7454_v41  ;;  %v2622_v30 = vsel %vm5929_vm4, %v2581_v24, 0.0 }
 0x218   : > { %v2636_v47 = vsel %vm5934_vm5, %v2595_v10, 0.0  ;;  %v2638_v60 = vsel %vm5934_vm5, %v2597_v21, 0.0 }
 0x219   : > { %v2652_v8 = vrot.slane %v2651_v58, 4  ;;  %v2658_v45 = vadd.f32 %v2636_v47, %v2620_v6  ;;  %v2666_v4 = vrot.slane %v2665_v2, 4  ;;  %v2672_v26 = vadd.f32 %v2638_v60, %v2622_v30 }
 0x21a   : > { %3053 = vmatpush1.bf16.msra.mxu0 %v7198_v62  ;;  %3096 = vmatpush1.bf16.msra.mxu1 %v7199_v61 }
 0x21b   : > { %v2653_v44 = vadd.f32 %v2652_v8, %v2651_v58  ;;  %v2659_v32 = vrot.slane %v2658_v45, 4  ;;  %3054 = vmatprep.subr.bf16.mxu0 %v7200_v5  ;;  %v2667_v10 = vadd.f32 %v2666_v4, %v2665_v2  ;;  %v2673_v7 = vrot.slane %v2672_v26, 4  ;;  %3097 = vmatprep.subr.bf16.mxu1 %v7201_v3 }
 0x21d   : > { %v2654_v24 = vrot.slane %v2653_v44, 2  ;;  %v2660_v42 = vadd.f32 %v2659_v32, %v2658_v45  ;;  %v2668_v6 = vrot.slane %v2667_v10, 2  ;;  %v2674_v47 = vadd.f32 %v2673_v7, %v2672_v26 }
 0x21e   : > { %3055 = vmatpush1.bf16.msra.mxu0 %v5039_v49  ;;  %3098 = vmatpush1.bf16.msra.mxu1 %v5043_v48 }
 0x21f   : > { %v2655_v21 = vadd.f32 %v2654_v24, %v2653_v44  ;;  %v2661_v30 = vrot.slane %v2660_v42, 2  ;;  %3056 = vmatprep.subr.bf16.mxu0 %v5045_v34  ;;  %v2669_v58 = vadd.f32 %v2668_v6, %v2667_v10  ;;  %v2675_v8 = vrot.slane %v2674_v47, 2  ;;  %3099 = vmatprep.subr.bf16.mxu1 %v7202_v23 }
 0x221   : > { %v2656_v2 = vrot.slane %v2655_v21, 1  ;;  %v2662_v60 = vadd.f32 %v2661_v30, %v2660_v42  ;;  %v2670_v4 = vrot.slane %v2669_v58, 1  ;;  %v2676_v3 = vadd.f32 %v2675_v8, %v2674_v47 }
 0x222   : > { %3057 = vmatpush1.bf16.msra.mxu0 %v5055_v17  ;;  %3100 = vmatpush1.bf16.msra.mxu1 %v5059_v57 }
 0x223   : > { %v2657_v45 = vadd.f32 %v2656_v2, %v2655_v21  ;;  %v2663_v26 = vrot.slane %v2662_v60, 1  ;;  %3058 = vmatprep.subr.bf16.mxu0 %v5061_v63  ;;  %v2671_v44 = vadd.f32 %v2670_v4, %v2669_v58  ;;  %v2677_v32 = vrot.slane %v2676_v3, 1  ;;  %3101 = vmatprep.subr.bf16.mxu1 %v5064_v0  ;;  %v7464_v2 = vld [vmem:[#allocation11_spill] sm:$0xff]  ;;  %v7465_v4 = vld [vmem:[#allocation12_spill] sm:$0xff] }
 0x225   : > { %v5977_v10 = vadd.f32 %v2657_v45, %v5665_v40  ;;  %v2664_v7 = vadd.f32 %v2663_v26, %v2662_v60  ;;  %v5980_v24 = vadd.f32 %v2671_v44, %v5667_v18  ;;  %v2678_v42 = vadd.f32 %v2677_v32, %v2676_v3  ;;  %v7459_v40 = vld [vmem:[#allocation127_spill] sm:$0xff]  ;;  %v7460_v18 = vld [vmem:[#allocation8_spill] sm:$0xff]  ;;  %v7461_v3 = vld [vmem:[#allocation10_spill] sm:$0xff] }
 0x226   : > { %3059 = vmatpush1.bf16.msra.mxu0 %v5071_v1  ;;  %3102 = vmatpush1.bf16.msra.mxu1 %v7317_v15  ;;  %v7466_v44 = vld [vmem:[#allocation13_spill] sm:$0xff]  ;;  %v7467_v32 = vld [vmem:[#allocation119_spill] sm:$0xff] }
 0x227   : > { %7455 = vst [vmem:[#allocation144_spill] sm:$0xff] %v5977_v10  ;;  %7456 = vst [vmem:[#allocation54_spill] sm:$0xff] %v5980_v24  ;;  %v5984_v6 = vadd.f32 %v2664_v7, %v5670_v56  ;;  %3060 = vmatprep.subr.bf16.mxu0 %v7318_v20  ;;  %v5989_v47 = vadd.f32 %v2678_v42, %v5674_v55  ;;  %3103 = vmatprep.subr.bf16.mxu1 %v7319_v39  ;;  %v7462_v56 = vld [vmem:[#allocation112_spill] sm:$0xff]  ;;  %v7463_v55 = vld [vmem:[#allocation9_spill] sm:$0xff] }
 0x228   : > { %v7471_v24 = vld [vmem:[#allocation17_spill] sm:$0xff] }
 0x229   : > { %7457 = vst [vmem:[#allocation62_spill] sm:$0xff] %v5984_v6  ;;  %7458 = vst [vmem:[#allocation145_spill] sm:$0xff] %v5989_v47 }
 0x22a   : > { %3061 = vmatpush1.bf16.msra.mxu0 %v7320_v36  ;;  %3104 = vmatpush1.bf16.msra.mxu1 %v7459_v40 }
 0x22b   : > { %3342 = vmatprep.subr.bf16.mxu0 %v7460_v18  ;;  %3385 = vmatprep.subr.bf16.mxu1 %v7461_v3 }
 0x22d   : > { %v2354_v21 = vpop.f32.mrf.mxu0  ;;  %3079 = vmatmul.mubr.bf16.vlgmr.msra.gmra.mxu0 %v5754_v54  ;;  %v2397_v58 = vpop.f32.mrf.mxu1  ;;  %3122 = vmatmul.mubr.bf16.vlgmr.msra.gmra.mxu1 %v5754_v54 }
 0x22e   : > { %v2355_v30 = vadd.f32 %v2354_v21, %v7462_v56  ;;  %3343 = vmatpush1.bf16.msra.mxu0 %v7463_v55  ;;  %v2398_v8 = vadd.f32 %v2397_v58, %v5372_v59  ;;  %3386 = vmatpush1.bf16.msra.mxu1 %v7464_v2  ;;  %v7468_v21 = vld [vmem:[#allocation14_spill] sm:$0xff]  ;;  %v7469_v2 = vld [vmem:[#allocation15_spill] sm:$0xff] }
 0x22f   : > { %v2356_v60 = vpop.f32.mrf.mxu0  ;;  %3344 = vmatprep.subr.bf16.mxu0 %v7465_v4  ;;  %v2399_v26 = vpop.f32.mrf.mxu1  ;;  %3387 = vmatprep.subr.bf16.mxu1 %v7466_v44  ;;  %v7470_v4 = vld [vmem:[#allocation16_spill] sm:$0xff] }
 0x230   : > { %v2357_v45 = vadd.f32 %v2356_v60, %v5379_v52  ;;  %3374 = vmatprep.mubr.bf16.mxu0 %v7060_v33  ;;  %v2400_v7 = vadd.f32 %v2399_v26, %v7467_v32  ;;  %3417 = vmatprep.mubr.bf16.mxu1 %v7060_v33  ;;  %v2582_v54 = vmax.f32 %v2355_v30, 0.0  ;;  %v2584_v58 = vmax.f32 %v2398_v8, 0.0 }
 0x231   : > { %v2358_v42 = vpop.f32.mrf.mxu0  ;;  %v2401_v3 = vpop.f32.mrf.mxu1 }
 0x232   : > { %v2359_v18 = vadd.f32 %v2358_v42, %v7462_v56  ;;  %3345 = vmatpush1.bf16.msra.mxu0 %v7468_v21  ;;  %v2402_v55 = vadd.f32 %v2401_v3, %v5372_v59  ;;  %3388 = vmatpush1.bf16.msra.mxu1 %v7469_v2  ;;  %v2583_v44 = vmax.f32 %v2357_v45, 0.0  ;;  %v2585_v30 = vmax.f32 %v2400_v7, 0.0  ;;  %v7472_v2 = vld [vmem:[#allocation18_spill] sm:$0xff] }
 0x233   : > { %v2360_v60 = vpop.f32.mrf.mxu0  ;;  %3346 = vmatprep.subr.bf16.mxu0 %v7470_v4  ;;  %v2403_v6 = vpop.f32.mrf.mxu1  ;;  %3389 = vmatprep.subr.bf16.mxu1 %v7471_v24  ;;  %v2623_v8 = vsel %vm5929_vm4, %v2582_v54, 0.0  ;;  %v2625_v45 = vsel %vm5929_vm4, %v2584_v58, 0.0  ;;  %v7475_v4 = vld [vmem:[#allocation21_spill] sm:$0xff]  ;;  %v7484_v59 = vld [vmem:[#allocation30_spill] sm:$0xff] }
 0x234   : > { %v2598_v47 = vmax.f32 %v2359_v18, 0.0  ;;  %v2361_v26 = vadd.f32 %v2360_v60, %v5379_v52  ;;  %v2600_v42 = vmax.f32 %v2402_v55, 0.0  ;;  %v2404_v56 = vadd.f32 %v2403_v6, %v7467_v32  ;;  %v7473_v55 = vld [vmem:[#allocation19_spill] sm:$0xff]  ;;  %v7474_v6 = vld [vmem:[#allocation20_spill] sm:$0xff]  ;;  %v7480_v52 = vld [vmem:[#allocation26_spill] sm:$0xff] }
 0x235   : > { %v2624_v54 = vsel %vm5929_vm4, %v2583_v44, 0.0  ;;  %v2626_v58 = vsel %vm5929_vm4, %v2585_v30, 0.0 }
 0x236   : > { %v2639_v3 = vsel %vm5934_vm5, %v2598_v47, 0.0  ;;  %v2599_v21 = vmax.f32 %v2361_v26, 0.0  ;;  %3347 = vmatpush1.bf16.msra.mxu0 %v7472_v2  ;;  %v2641_v24 = vsel %vm5934_vm5, %v2600_v42, 0.0  ;;  %v2601_v7 = vmax.f32 %v2404_v56, 0.0  ;;  %3390 = vmatpush1.bf16.msra.mxu1 %v7473_v55  ;;  %v7476_v2 = vld [vmem:[#allocation22_spill] sm:$0xff] }
 0x237   : > { %v2679_v18 = vadd.f32 %v2639_v3, %v2623_v8  ;;  %3348 = vmatprep.subr.bf16.mxu0 %v7474_v6  ;;  %v2693_v60 = vadd.f32 %v2641_v24, %v2625_v45  ;;  %3391 = vmatprep.subr.bf16.mxu1 %v7475_v4  ;;  %v7477_v45 = vld [vmem:[#allocation23_spill] sm:$0xff]  ;;  %v7478_v24 = vld [vmem:[#allocation24_spill] sm:$0xff]  ;;  %v7479_v4 = vld [vmem:[#allocation25_spill] sm:$0xff] }
 0x238   : > { %v2640_v47 = vsel %vm5934_vm5, %v2599_v21, 0.0  ;;  %v2642_v56 = vsel %vm5934_vm5, %v2601_v7, 0.0 }
 0x239   : > { %v2680_v26 = vrot.slane %v2679_v18, 4  ;;  %v2686_v8 = vadd.f32 %v2640_v47, %v2624_v54  ;;  %v2694_v42 = vrot.slane %v2693_v60, 4  ;;  %v2700_v3 = vadd.f32 %v2642_v56, %v2626_v58  ;;  %v7481_v56 = vld [vmem:[#allocation27_spill] sm:$0xff] }
 0x23a   : > { %3349 = vmatpush1.bf16.msra.mxu0 %v7476_v2  ;;  %3392 = vmatpush1.bf16.msra.mxu1 %v7477_v45  ;;  %v7483_v45 = vld [vmem:[#allocation29_spill] sm:$0xff] }
 0x23b   : > { %v2681_v55 = vadd.f32 %v2680_v26, %v2679_v18  ;;  %v2687_v44 = vrot.slane %v2686_v8, 4  ;;  %3350 = vmatprep.subr.bf16.mxu0 %v7478_v24  ;;  %v2695_v21 = vadd.f32 %v2694_v42, %v2693_v60  ;;  %v2701_v6 = vrot.slane %v2700_v3, 4  ;;  %3393 = vmatprep.subr.bf16.mxu1 %v7479_v4  ;;  %v7482_v18 = vld [vmem:[#allocation28_spill] sm:$0xff] }
 0x23d   : > { %v2682_v30 = vrot.slane %v2681_v55, 2  ;;  %v2688_v32 = vadd.f32 %v2687_v44, %v2686_v8  ;;  %v2696_v54 = vrot.slane %v2695_v21, 2  ;;  %v2702_v47 = vadd.f32 %v2701_v6, %v2700_v3  ;;  %v7485_v44 = vld [vmem:[#allocation31_spill] sm:$0xff] }
 0x23e   : > { %3351 = vmatpush1.bf16.msra.mxu0 %v7480_v52  ;;  %3394 = vmatpush1.bf16.msra.mxu1 %v7481_v56  ;;  %v7486_v52 = vld [vmem:[#allocation32_spill] sm:$0xff] }
 0x23f   : > { %v2683_v7 = vadd.f32 %v2682_v30, %v2681_v55  ;;  %v2689_v58 = vrot.slane %v2688_v32, 2  ;;  %3352 = vmatprep.subr.bf16.mxu0 %v7482_v18  ;;  %v2697_v26 = vadd.f32 %v2696_v54, %v2695_v21  ;;  %v2703_v2 = vrot.slane %v2702_v47, 2  ;;  %3395 = vmatprep.subr.bf16.mxu1 %v7483_v45  ;;  %v7487_v30 = vld [vmem:[#allocation33_spill] sm:$0xff]  ;;  %v7488_v21 = vld [vmem:[#allocation114_spill] sm:$0xff]  ;;  %v7496_v45 = vld [vmem:[#allocation36_spill] sm:$0xff] }
 0x241   : > { %v2684_v60 = vrot.slane %v2683_v7, 1  ;;  %v2690_v42 = vadd.f32 %v2689_v58, %v2688_v32  ;;  %v2698_v24 = vrot.slane %v2697_v26, 1  ;;  %v2704_v4 = vadd.f32 %v2703_v2, %v2702_v47  ;;  %v7490_v32 = vld [vmem:[#allocation123_spill] sm:$0xff] }
 0x242   : > { %3353 = vmatpush1.bf16.msra.mxu0 %v7484_v59  ;;  %3396 = vmatpush1.bf16.msra.mxu1 %v7485_v44  ;;  %v7492_v59 = vld [vmem:[#allocation34_spill] sm:$0xff]  ;;  %v7495_v2 = vld [vmem:[#allocation35_spill] sm:$0xff]  ;;  %v7503_v44 = vld [vmem:[#allocation41_spill] sm:$0xff] }
 0x243   : > { %v2685_v8 = vadd.f32 %v2684_v60, %v2683_v7  ;;  %v2691_v3 = vrot.slane %v2690_v42, 1  ;;  %3354 = vmatprep.subr.bf16.mxu0 %v7486_v52  ;;  %v2699_v55 = vadd.f32 %v2698_v24, %v2697_v26  ;;  %v2705_v6 = vrot.slane %v2704_v4, 1  ;;  %3397 = vmatprep.subr.bf16.mxu1 %v7487_v30  ;;  %v7493_v7 = vld [vmem:[#allocation124_spill] sm:$0xff]  ;;  %v7497_v26 = vld [vmem:[#allocation125_spill] sm:$0xff] }
 0x244   : > { %v7499_v24 = vld [vmem:[#allocation37_spill] sm:$0xff] }
 0x245   : > { %v6049_v54 = vadd.f32 %v2685_v8, %v7488_v21  ;;  %v2692_v56 = vadd.f32 %v2691_v3, %v2690_v42  ;;  %v6052_v58 = vadd.f32 %v2699_v55, %v7490_v32  ;;  %v2706_v47 = vadd.f32 %v2705_v6, %v2704_v4  ;;  %v6065_v8 = vld [vmem:[%s4614_s15 + $0x20] sm:$0xff]   ;;  %v7500_v42 = vld [vmem:[#allocation38_spill] sm:$0xff]  ;;  %v7501_v3 = vld [vmem:[#allocation39_spill] sm:$0xff]  ;;  %s4384_s15 = sshll.u32 %s4463_s22, 4  ;;  %s4385_s15 = int_to_ptr.vmem [resolvable:$false] %s4384_s15 }
 0x246   : > { %3355 = vmatpush1.bf16.msra.mxu0 %v7492_v59  ;;  %3398 = vmatpush1.bf16.msra.mxu1 %v7495_v2  ;;  %v7502_v4 = vld [vmem:[#allocation40_spill] sm:$0xff]  ;;  %v7504_v55 = vld [vmem:[#allocation129_spill] sm:$0xff]  ;;  %v7505_v21 = vld [vmem:[#allocation42_spill] sm:$0xff]  ;;  %s4386_s16 = scalar_lea.vmem %s4385_s15, 512  ;;  %p4387_p6 = scmp.lt.s32.totalorder %s4042_s9, %s4385_s15 }
 0x247   : > { %7489 = vst [vmem:[#allocation146_spill] sm:$0xff] %v6049_v54  ;;  %7491 = vst [vmem:[#allocation147_spill] sm:$0xff] %v6052_v58  ;;  %v6056_v18 = vadd.f32 %v2692_v56, %v7493_v7  ;;  %3356 = vmatprep.subr.bf16.mxu0 %v7496_v45  ;;  %v6061_v60 = vadd.f32 %v2706_v47, %v7497_v26  ;;  %3399 = vmatprep.subr.bf16.mxu1 %v7499_v24  ;;  %v7506_v56 = vld [vmem:[#allocation130_spill] sm:$0xff]  ;;  %v7507_v47 = vld [vmem:[#allocation43_spill] sm:$0xff]  ;;  %p4388_p7 = scmp.lt.s32.totalorder %s4386_s16, %s4380_s14 }
 0x248   : > { %v7508_v7 = vld [vmem:[#allocation44_spill] sm:$0xff]  ;;  %v7509_v45 = vld [vmem:[#allocation131_spill] sm:$0xff]  ;;  %v7515_v54 = vld [vmem:[#allocation49_spill] sm:$0xff] }
 0x249   : > { %7494 = vst [vmem:[#allocation148_spill] sm:$0xff] %v6056_v18  ;;  %7498 = vst [vmem:[#allocation86_spill] sm:$0xff] %v6061_v60  ;;  %v7513_v60 = vld [vmem:[#allocation47_spill] sm:$0xff]  ;;  %v7514_v18 = vld [vmem:[#allocation48_spill] sm:$0xff]  ;;  %p4389_p8 = por %p4388_p7, %p4387_p6 }
 0x24a   : > { %3357 = vmatpush1.bf16.msra.mxu0 %v7500_v42  ;;  %3400 = vmatpush1.bf16.msra.mxu1 %v7501_v3  ;;  %v7510_v42 = vld [vmem:[#allocation45_spill] sm:$0xff] }
 0x24b   : > { %3428 = vmatprep.subr.bf16.mxu0 %v7502_v4  ;;  %3471 = vmatprep.subr.bf16.mxu1 %v7503_v44  ;;  %v7511_v4 = vld [vmem:[#allocation132_spill] sm:$0xff]  ;;  %p4390_p10 = pnand %p4389_p8, %p4383_p5 }
 0x24d   : > { %v2440_v52 = vpop.f32.mrf.mxu0  ;;  %3375 = vmatmul.mubr.bf16.vlgmr.msra.gmra.mxu0 %v6065_v8  ;;  %v2483_v30 = vpop.f32.mrf.mxu1  ;;  %3418 = vmatmul.mubr.bf16.vlgmr.msra.gmra.mxu1 %v6065_v8 }
 0x24e   : > { %v2441_v6 = vadd.f32 %v2440_v52, %v7504_v55  ;;  %3429 = vmatpush1.bf16.msra.mxu0 %v7505_v21  ;;  %v2484_v32 = vadd.f32 %v2483_v30, %v7506_v56  ;;  %3472 = vmatpush1.bf16.msra.mxu1 %v7507_v47 }
 0x24f   : > { %v2442_v59 = vpop.f32.mrf.mxu0  ;;  %3430 = vmatprep.subr.bf16.mxu0 %v7508_v7  ;;  %v2485_v24 = vpop.f32.mrf.mxu1  ;;  %3473 = vmatprep.subr.bf16.mxu1 %v7510_v42  ;;  %v7512_v7 = vld [vmem:[#allocation46_spill] sm:$0xff] }
 0x250   : > { %v2586_v2 = vmax.f32 %v2441_v6, 0.0  ;;  %v2443_v26 = vadd.f32 %v2442_v59, %v7509_v45  ;;  %3460 = vmatprep.mubr.bf16.mxu0 %v7060_v33  ;;  %v2588_v3 = vmax.f32 %v2484_v32, 0.0  ;;  %v2486_v44 = vadd.f32 %v2485_v24, %v7511_v4  ;;  %3503 = vmatprep.mubr.bf16.mxu1 %v7060_v33 }
 0x251   : > { %v2444_v52 = vpop.f32.mrf.mxu0  ;;  %v2487_v6 = vpop.f32.mrf.mxu1 }
 0x252   : > { %v2627_v30 = vsel %vm5929_vm4, %v2586_v2, 0.0  ;;  %v2587_v21 = vmax.f32 %v2443_v26, 0.0  ;;  %v2445_v47 = vadd.f32 %v2444_v52, %v7504_v55  ;;  %3431 = vmatpush1.bf16.msra.mxu0 %v7512_v7  ;;  %v2629_v59 = vsel %vm5929_vm4, %v2588_v3, 0.0  ;;  %3474 = vmatpush1.bf16.msra.mxu1 %v7513_v60 }
 0x253   : > { %v2589_v42 = vmax.f32 %v2486_v44, 0.0  ;;  %v2488_v32 = vadd.f32 %v2487_v6, %v7506_v56  ;;  %v2446_v24 = vpop.f32.mrf.mxu0  ;;  %3432 = vmatprep.subr.bf16.mxu0 %v7514_v18  ;;  %v2489_v58 = vpop.f32.mrf.mxu1  ;;  %3475 = vmatprep.subr.bf16.mxu1 %v7515_v54  ;;  %v7516_v18 = vld [vmem:[#allocation50_spill] sm:$0xff]  ;;  %v7518_v54 = vld [vmem:[#allocation52_spill] sm:$0xff] }
 0x254   : > { %v2628_v2 = vsel %vm5929_vm4, %v2587_v21, 0.0  ;;  %v2602_v26 = vmax.f32 %v2445_v47, 0.0  ;;  %v2447_v52 = vadd.f32 %v2446_v24, %v7509_v45  ;;  %v2490_v6 = vadd.f32 %v2489_v58, %v7511_v4  ;;  %v7517_v24 = vld [vmem:[#allocation51_spill] sm:$0xff]  ;;  %v7519_v58 = vld [vmem:[#allocation53_spill] sm:$0xff]  ;;  %v7523_v4 = vld [vmem:[#allocation58_spill] sm:$0xff] }
 0x255   : > { %v2630_v3 = vsel %vm5929_vm4, %v2589_v42, 0.0  ;;  %v2604_v44 = vmax.f32 %v2488_v32, 0.0 }
 0x256   : > { %v2643_v60 = vsel %vm5934_vm5, %v2602_v26, 0.0  ;;  %v2603_v7 = vmax.f32 %v2447_v52, 0.0  ;;  %3433 = vmatpush1.bf16.msra.mxu0 %v7516_v18  ;;  %v2605_v47 = vmax.f32 %v2490_v6, 0.0  ;;  %3476 = vmatpush1.bf16.msra.mxu1 %v7517_v24  ;;  %v7520_v18 = vld [vmem:[#allocation55_spill] sm:$0xff]  ;;  %v7521_v24 = vld [vmem:[#allocation56_spill] sm:$0xff] }
 0x257   : > { %v2707_v10 = vadd.f32 %v2643_v60, %v2627_v30  ;;  %v2645_v21 = vsel %vm5934_vm5, %v2604_v44, 0.0  ;;  %3434 = vmatprep.subr.bf16.mxu0 %v7518_v54  ;;  %3477 = vmatprep.subr.bf16.mxu1 %v7519_v58 }
 0x258   : > { %v2721_v45 = vadd.f32 %v2645_v21, %v2629_v59  ;;  %v2644_v42 = vsel %vm5934_vm5, %v2603_v7, 0.0  ;;  %v2646_v52 = vsel %vm5934_vm5, %v2605_v47, 0.0  ;;  %v7522_v7 = vld [vmem:[#allocation57_spill] sm:$0xff] }
 0x259   : > { %v2708_v32 = vrot.slane %v2707_v10, 4  ;;  %v2714_v26 = vadd.f32 %v2644_v42, %v2628_v2  ;;  %v2728_v60 = vadd.f32 %v2646_v52, %v2630_v3  ;;  %v7524_v52 = vld [vmem:[#allocation59_spill] sm:$0xff] }
 0x25a   : > { %v2722_v30 = vrot.slane %v2721_v45, 4  ;;  %3435 = vmatpush1.bf16.msra.mxu0 %v7374_v25  ;;  %3478 = vmatpush1.bf16.msra.mxu1 %v7520_v18  ;;  %v7525_v25 = vld [vmem:[#allocation60_spill] sm:$0xff]  ;;  %v7526_v18 = vld [vmem:[#allocation61_spill] sm:$0xff] }
 0x25b   : > { %v2709_v44 = vadd.f32 %v2708_v32, %v2707_v10  ;;  %v2715_v6 = vrot.slane %v2714_v26, 4  ;;  %3436 = vmatprep.subr.bf16.mxu0 %v7521_v24  ;;  %v2729_v21 = vrot.slane %v2728_v60, 4  ;;  %3479 = vmatprep.subr.bf16.mxu1 %v7522_v7 }
 0x25c   : > { %v2723_v59 = vadd.f32 %v2722_v30, %v2721_v45 }
 0x25d   : > { %v2710_v54 = vrot.slane %v2709_v44, 2  ;;  %v2716_v58 = vadd.f32 %v2715_v6, %v2714_v26  ;;  %v2730_v42 = vadd.f32 %v2729_v21, %v2728_v60  ;;  %v7527_v6 = vld [vmem:[#allocation63_spill] sm:$0xff] }
 0x25e   : > { %v2724_v2 = vrot.slane %v2723_v59, 2  ;;  %3437 = vmatpush1.bf16.msra.mxu0 %v7523_v4  ;;  %3480 = vmatpush1.bf16.msra.mxu1 %v7524_v52  ;;  %v7528_v4 = vld [vmem:[#allocation64_spill] sm:$0xff] }
 0x25f   : > { %v2711_v47 = vadd.f32 %v2710_v54, %v2709_v44  ;;  %v2717_v3 = vrot.slane %v2716_v58, 2  ;;  %3438 = vmatprep.subr.bf16.mxu0 %v7525_v25  ;;  %v2731_v32 = vrot.slane %v2730_v42, 2  ;;  %3481 = vmatprep.subr.bf16.mxu1 %v7526_v18  ;;  %v7529_v54 = vld [vmem:[#allocation65_spill] sm:$0xff]  ;;  %v7531_v25 = vld [vmem:[#allocation120_spill] sm:$0xff] }
 0x260   : > { %v2725_v10 = vadd.f32 %v2724_v2, %v2723_v59  ;;  %v7530_v59 = vld [vmem:[#allocation126_spill] sm:$0xff]  ;;  %v7536_v18 = vld [vmem:[#allocation68_spill] sm:$0xff] }
 0x261   : > { %v2712_v45 = vrot.slane %v2711_v47, 1  ;;  %v2718_v30 = vadd.f32 %v2717_v3, %v2716_v58  ;;  %v2732_v7 = vadd.f32 %v2731_v32, %v2730_v42  ;;  %v7532_v3 = vld [vmem:[#allocation66_spill] sm:$0xff]  ;;  %v7535_v32 = vld [vmem:[#allocation67_spill] sm:$0xff] }
 0x262   : > { %v2726_v24 = vrot.slane %v2725_v10, 1  ;;  %3439 = vmatpush1.bf16.msra.mxu0 %v7382_v29  ;;  %3482 = vmatpush1.bf16.msra.mxu1 %v7527_v6  ;;  %v7533_v29 = vld [vmem:[#allocation122_spill] sm:$0xff] }
 0x263   : > { %v2713_v26 = vadd.f32 %v2712_v45, %v2711_v47  ;;  %v2719_v60 = vrot.slane %v2718_v30, 1  ;;  %3440 = vmatprep.subr.bf16.mxu0 %v7528_v4  ;;  %v2733_v21 = vrot.slane %v2732_v7, 1  ;;  %3483 = vmatprep.subr.bf16.mxu1 %v7529_v54  ;;  %v7544_v4 = vld [vmem:[#allocation133_spill] sm:$0xff]  ;;  %v7545_v54 = vld [vmem:[#allocation74_spill] sm:$0xff] }
 0x264   : > { %v2727_v44 = vadd.f32 %v2726_v24, %v2725_v10  ;;  %v7537_v10 = vld [vmem:[#allocation143_spill] sm:$0xff]  ;;  %v7539_v24 = vld [vmem:[#allocation69_spill] sm:$0xff] }
 0x265   : > { %v6124_v2 = vadd.f32 %v2713_v26, %v7530_v59  ;;  %v2720_v52 = vadd.f32 %v2719_v60, %v2718_v30  ;;  %v2734_v42 = vadd.f32 %v2733_v21, %v2732_v7  ;;  %v7540_v26 = vld [vmem:[#allocation70_spill] sm:$0xff]  ;;  %v7541_v30 = vld [vmem:[#allocation71_spill] sm:$0xff]  ;;  %v7542_v60 = vld [vmem:[#allocation72_spill] sm:$0xff] }
 0x266   : > { %v6127_v58 = vadd.f32 %v2727_v44, %v7531_v25  ;;  %3441 = vmatpush1.bf16.msra.mxu0 %v7532_v3  ;;  %3484 = vmatpush1.bf16.msra.mxu1 %v7535_v32  ;;  %v7543_v7 = vld [vmem:[#allocation73_spill] sm:$0xff]  ;;  %v7546_v59 = vld [vmem:[#allocation134_spill] sm:$0xff]  ;;  %v7547_v25 = vld [vmem:[#allocation75_spill] sm:$0xff] }
 0x267   : > { %v6131_v47 = vadd.f32 %v2720_v52, %v7533_v29  ;;  %3442 = vmatprep.subr.bf16.mxu0 %v7536_v18  ;;  %v6136_v45 = vadd.f32 %v2734_v42, %v7537_v10  ;;  %3485 = vmatprep.subr.bf16.mxu1 %v7539_v24  ;;  %v7548_v3 = vld [vmem:[#allocation76_spill] sm:$0xff]  ;;  %v7549_v32 = vld [vmem:[#allocation135_spill] sm:$0xff]  ;;  %v7550_v24 = vld [vmem:[#allocation77_spill] sm:$0xff] }
 0x269   : > { %7534 = vst [vmem:[#allocation94_spill] sm:$0xff] %v6131_v47  ;;  %7538 = vst [vmem:[#allocation95_spill] sm:$0xff] %v6136_v45  ;;  %v7554_v45 = vld [vmem:[#allocation80_spill] sm:$0xff]  ;;  %v7555_v47 = vld [vmem:[#allocation81_spill] sm:$0xff] }
 0x26a   : > { %3443 = vmatpush1.bf16.msra.mxu0 %v7540_v26  ;;  %3486 = vmatpush1.bf16.msra.mxu1 %v7541_v30  ;;  %v7551_v30 = vld [vmem:[#allocation136_spill] sm:$0xff] }
 0x26b   : > { %3514 = vmatprep.subr.bf16.mxu0 %v7542_v60  ;;  %3557 = vmatprep.subr.bf16.mxu1 %v7543_v7 }
 0x26d   : > { %v2526_v6 = vpop.f32.mrf.mxu0  ;;  %3461 = vmatmul.mubr.bf16.vlgmr.msra.gmra.mxu0 %v6065_v8  ;;  %v2569_v21 = vpop.f32.mrf.mxu1  ;;  %3504 = vmatmul.mubr.bf16.vlgmr.msra.gmra.mxu1 %v6065_v8 }
 0x26e   : > { %v2527_v44 = vadd.f32 %v2526_v6, %v7544_v4  ;;  %3515 = vmatpush1.bf16.msra.mxu0 %v7545_v54  ;;  %v2570_v52 = vadd.f32 %v2569_v21, %v7546_v59  ;;  %3558 = vmatpush1.bf16.msra.mxu1 %v7547_v25  ;;  %v7552_v25 = vld [vmem:[#allocation78_spill] sm:$0xff] }
 0x26f   : > { %v2528_v42 = vpop.f32.mrf.mxu0  ;;  %3516 = vmatprep.subr.bf16.mxu0 %v7548_v3  ;;  %v2571_v10 = vpop.f32.mrf.mxu1  ;;  %3559 = vmatprep.subr.bf16.mxu1 %v7550_v24  ;;  %v7553_v24 = vld [vmem:[#allocation79_spill] sm:$0xff] }
 0x270   : > { %v2590_v29 = vmax.f32 %v2527_v44, 0.0  ;;  %v2529_v18 = vadd.f32 %v2528_v42, %v7549_v32  ;;  %3546 = vmatprep.mubr.bf16.mxu0 %v7060_v33  ;;  %v2592_v26 = vmax.f32 %v2570_v52, 0.0  ;;  %v2572_v60 = vadd.f32 %v2571_v10, %v7551_v30  ;;  %3589 = vmatprep.mubr.bf16.mxu1 %v7060_v33 }
 0x271   : > { %v2530_v7 = vpop.f32.mrf.mxu0  ;;  %v2573_v44 = vpop.f32.mrf.mxu1 }
 0x272   : > { %v2631_v6 = vsel %vm5929_vm4, %v2590_v29, 0.0  ;;  %v2591_v21 = vmax.f32 %v2529_v18, 0.0  ;;  %v2531_v54 = vadd.f32 %v2530_v7, %v7544_v4  ;;  %3517 = vmatpush1.bf16.msra.mxu0 %v7552_v25  ;;  %v2633_v42 = vsel %vm5929_vm4, %v2592_v26, 0.0  ;;  %3560 = vmatpush1.bf16.msra.mxu1 %v7553_v24 }
 0x273   : > { %v2593_v3 = vmax.f32 %v2572_v60, 0.0  ;;  %v2574_v52 = vadd.f32 %v2573_v44, %v7546_v59  ;;  %v2532_v10 = vpop.f32.mrf.mxu0  ;;  %3518 = vmatprep.subr.bf16.mxu0 %v7554_v45  ;;  %v2575_v4 = vpop.f32.mrf.mxu1  ;;  %3561 = vmatprep.subr.bf16.mxu1 %v7555_v47  ;;  %v7556_v45 = vld [vmem:[#allocation82_spill] sm:$0xff]  ;;  %v7558_v47 = vld [vmem:[#allocation84_spill] sm:$0xff] }
 0x274   : > { %v2632_v29 = vsel %vm5929_vm4, %v2591_v21, 0.0  ;;  %v2606_v18 = vmax.f32 %v2531_v54, 0.0  ;;  %v2533_v7 = vadd.f32 %v2532_v10, %v7549_v32  ;;  %v2576_v44 = vadd.f32 %v2575_v4, %v7551_v30  ;;  %v7557_v10 = vld [vmem:[#allocation83_spill] sm:$0xff]  ;;  %v7559_v4 = vld [vmem:[#allocation85_spill] sm:$0xff] }
 0x275   : > { %v2634_v26 = vsel %vm5929_vm4, %v2593_v3, 0.0  ;;  %v2608_v60 = vmax.f32 %v2574_v52, 0.0 }
 0x276   : > { %v2647_v25 = vsel %vm5934_vm5, %v2606_v18, 0.0  ;;  %v2607_v24 = vmax.f32 %v2533_v7, 0.0  ;;  %3519 = vmatpush1.bf16.msra.mxu0 %v7556_v45  ;;  %v2609_v54 = vmax.f32 %v2576_v44, 0.0  ;;  %3562 = vmatpush1.bf16.msra.mxu1 %v7557_v10  ;;  %v7560_v45 = vld [vmem:[#allocation87_spill] sm:$0xff]  ;;  %v7561_v10 = vld [vmem:[#allocation88_spill] sm:$0xff] }
 0x277   : > { %v2735_v59 = vadd.f32 %v2647_v25, %v2631_v6  ;;  %v2649_v21 = vsel %vm5934_vm5, %v2608_v60, 0.0  ;;  %3520 = vmatprep.subr.bf16.mxu0 %v7558_v47  ;;  %3563 = vmatprep.subr.bf16.mxu1 %v7559_v4 }
 0x278   : > { %v2749_v13 = vadd.f32 %v2649_v21, %v2633_v42  ;;  %v2648_v3 = vsel %vm5934_vm5, %v2607_v24, 0.0  ;;  %v2650_v7 = vsel %vm5934_vm5, %v2609_v54, 0.0  ;;  %v7562_v24 = vld [vmem:[#allocation89_spill] sm:$0xff] }
 0x279   : > { %v2736_v52 = vrot.slane %v2735_v59, 4  ;;  %v2742_v18 = vadd.f32 %v2648_v3, %v2632_v29  ;;  %v2756_v25 = vadd.f32 %v2650_v7, %v2634_v26  ;;  %v7564_v7 = vld [vmem:[#allocation91_spill] sm:$0xff] }
 0x27a   : > { %v2750_v6 = vrot.slane %v2749_v13, 4  ;;  %3521 = vmatpush1.bf16.msra.mxu0 %v7418_v16  ;;  %3564 = vmatpush1.bf16.msra.mxu1 %v7560_v45  ;;  %v7565_v16 = vld [vmem:[#allocation92_spill] sm:$0xff]  ;;  %v7566_v45 = vld [vmem:[#allocation93_spill] sm:$0xff] }
 0x27b   : > { %v2737_v60 = vadd.f32 %v2736_v52, %v2735_v59  ;;  %v2743_v44 = vrot.slane %v2742_v18, 4  ;;  %3522 = vmatprep.subr.bf16.mxu0 %v7561_v10  ;;  %v2757_v21 = vrot.slane %v2756_v25, 4  ;;  %3565 = vmatprep.subr.bf16.mxu1 %v7562_v24 }
 0x27c   : > { %v2751_v42 = vadd.f32 %v2750_v6, %v2749_v13 }
 0x27d   : > { %v2738_v47 = vrot.slane %v2737_v60, 2  ;;  %v2744_v4 = vadd.f32 %v2743_v44, %v2742_v18  ;;  %v2758_v3 = vadd.f32 %v2757_v21, %v2756_v25 }
 0x27e   : > { %v2752_v29 = vrot.slane %v2751_v42, 2  ;;  %3523 = vmatpush1.bf16.msra.mxu0 %v7563_v37  ;;  %3566 = vmatpush1.bf16.msra.mxu1 %v7564_v7  ;;  %v7580_v37 = vld [vmem:[#allocation131_spill] sm:$0xff]  ;;  %v7581_v7 = vld [vmem:[#allocation142_spill] sm:$0xff] }
 0x27f   : > { %v2739_v54 = vadd.f32 %v2738_v47, %v2737_v60  ;;  %v2745_v26 = vrot.slane %v2744_v4, 2  ;;  %3524 = vmatprep.subr.bf16.mxu0 %v7565_v16  ;;  %v2759_v52 = vrot.slane %v2758_v3, 2  ;;  %3567 = vmatprep.subr.bf16.mxu1 %v7566_v45 }
 0x280   : > { %v2753_v59 = vadd.f32 %v2752_v29, %v2751_v42  ;;  %v7571_v29 = vld [vmem:[#allocation105_spill] sm:$0xff] }
 0x281   : > { %v2740_v13 = vrot.slane %v2739_v54, 1  ;;  %v2746_v6 = vadd.f32 %v2745_v26, %v2744_v4  ;;  %v2760_v24 = vadd.f32 %v2759_v52, %v2758_v3  ;;  %v7577_v3 = vld [vmem:[#allocation116_spill] sm:$0xff] }
 0x282   : > { %v2754_v10 = vrot.slane %v2753_v59, 1  ;;  %3525 = vmatpush1.bf16.msra.mxu0 %v7426_v35  ;;  %3568 = vmatpush1.bf16.msra.mxu1 %v7427_v12 }
 0x283   : > { %v2741_v18 = vadd.f32 %v2740_v13, %v2739_v54  ;;  %v2747_v25 = vrot.slane %v2746_v6, 1  ;;  %3526 = vmatprep.subr.bf16.mxu0 %v7428_v28  ;;  %v2761_v44 = vrot.slane %v2760_v24, 1  ;;  %3569 = vmatprep.subr.bf16.mxu1 %v7429_v27  ;;  %v7567_v27 = vld [vmem:[#allocation101_spill] sm:$0xff]  ;;  %v7569_v28 = vld [vmem:[#allocation103_spill] sm:$0xff]  ;;  %v7585_v13 = vld [vmem:[#allocation132_spill] sm:$0xff] }
 0x284   : > { %v2755_v60 = vadd.f32 %v2754_v10, %v2753_v59  ;;  %v7584_v59 = vld [vmem:[#allocation141_spill] sm:$0xff] }
 0x285   : > { %v6196_v42 = vadd.f32 %v2741_v18, %v5896_v11  ;;  %v2748_v21 = vadd.f32 %v2747_v25, %v2746_v6  ;;  %v2762_v4 = vadd.f32 %v2761_v44, %v2760_v24  ;;  %v7568_v11 = vld [vmem:[#allocation102_spill] sm:$0xff]  ;;  %v3166_v52 = vadd.s32 48, %v7584_v59 }
 0x286   : > { %v6199_v47 = vadd.f32 %v2755_v60, %v5898_v19  ;;  %3527 = vmatpush1.bf16.msra.mxu0 %v7430_v43  ;;  %3570 = vmatpush1.bf16.msra.mxu1 %v7431_v22  ;;  %v7570_v19 = vld [vmem:[#allocation104_spill] sm:$0xff]  ;;  %v7572_v43 = vld [vmem:[#allocation106_spill] sm:$0xff] }
 0x287   : > { %v6203_v35 = vadd.f32 %v2748_v21, %v5901_v14  ;;  %3528 = vmatprep.subr.bf16.mxu0 %v7432_v51  ;;  %v6208_v12 = vadd.f32 %v2762_v4, %v5905_v46  ;;  %3571 = vmatprep.subr.bf16.mxu1 %v7567_v27  ;;  %v7573_v14 = vld [vmem:[#allocation107_spill] sm:$0xff]  ;;  %v7574_v22 = vld [vmem:[#allocation108_spill] sm:$0xff]  ;;  %v7575_v51 = vld [vmem:[#allocation109_spill] sm:$0xff]  ;;  %vm6304_vm7 = vcmp.lt.s32.totalorder %v3166_v52, %v7581_v7 }
 0x288   : > { %v7576_v46 = vld [vmem:[#allocation110_spill] sm:$0xff] }
 0x28a   : > { %3529 = vmatpush1.bf16.msra.mxu0 %v7568_v11  ;;  %3572 = vmatpush1.bf16.msra.mxu1 %v7569_v28 }
 0x28b   : > { %3600 = vmatprep.subr.bf16.mxu0 %v7570_v19  ;;  %3643 = vmatprep.subr.bf16.mxu1 %v7571_v29 }
 0x28d   : > { %3547 = vmatmul.mubr.bf16.vlgmr.msra.gmra.mxu0 %v6065_v8  ;;  %3590 = vmatmul.mubr.bf16.vlgmr.msra.gmra.mxu1 %v6065_v8 }
 0x28e   : > { %3601 = vmatpush1.bf16.msra.mxu0 %v7572_v43  ;;  %3644 = vmatpush1.bf16.msra.mxu1 %v7573_v14 }
 0x28f   : > { %3602 = vmatprep.subr.bf16.mxu0 %v7574_v22  ;;  %3645 = vmatprep.subr.bf16.mxu1 %v7575_v51 }
 0x290   : > { %3632 = vmatprep.mubr.bf16.mxu0 %v7060_v33  ;;  %3675 = vmatprep.mubr.bf16.mxu1 %v7060_v33  ;;  %v7578_v33 = vld [vmem:[#allocation121_spill] sm:$0xff] }
 0x292   : > { %3603 = vmatpush1.bf16.msra.mxu0 %v7576_v46  ;;  %3646 = vmatpush1.bf16.msra.mxu1 %v7451_v31 }
 0x293   : > { %3604 = vmatprep.subr.bf16.mxu0 %v7192_v50  ;;  %3647 = vmatprep.subr.bf16.mxu1 %v7193_v53  ;;  %v6251_v53 = vpop.f32.mrf.mxu0 }
 0x296   : > { %3605 = vmatpush1.bf16.msra.mxu0 %v7316_v38  ;;  %3648 = vmatpush1.bf16.msra.mxu1 %v7452_v9 }
 0x297   : > { %3606 = vmatprep.subr.bf16.mxu0 %v7577_v3  ;;  %3649 = vmatprep.subr.bf16.mxu1 %v7454_v41 }
 0x29a   : > { %3607 = vmatpush1.bf16.msra.mxu0 %v7198_v62  ;;  %3650 = vmatpush1.bf16.msra.mxu1 %v7199_v61 }
 0x29b   : > { %3608 = vmatprep.subr.bf16.mxu0 %v7200_v5  ;;  %3651 = vmatprep.subr.bf16.mxu1 %v7578_v33 }
 0x29e   : > { %3609 = vmatpush1.bf16.msra.mxu0 %v5039_v49  ;;  %3652 = vmatpush1.bf16.msra.mxu1 %v5043_v48  ;;  %v6253_v49 = vpop.f32.mrf.mxu1 }
 0x29f   : > { %3610 = vmatprep.subr.bf16.mxu0 %v5045_v34  ;;  %3653 = vmatprep.subr.bf16.mxu1 %v7202_v23 }
 0x2a2   : > { %3611 = vmatpush1.bf16.msra.mxu0 %v5055_v17  ;;  %3654 = vmatpush1.bf16.msra.mxu1 %v5059_v57  ;;  %v6257_v17 = vpop.f32.mrf.mxu1 }
 0x2a3   : > { %3612 = vmatprep.subr.bf16.mxu0 %v5061_v63  ;;  %3655 = vmatprep.subr.bf16.mxu1 %v5064_v0  ;;  %v6255_v0 = vpop.f32.mrf.mxu0 }
 0x2a4   : > { %v6261_v34 = vpop.f32.mrf.mxu1 }
 0x2a5   : > { %v6259_v48 = vpop.f32.mrf.mxu0 }
 0x2a6   : > { %3613 = vmatpush1.bf16.msra.mxu0 %v5071_v1  ;;  %3656 = vmatpush1.bf16.msra.mxu1 %v7317_v15  ;;  %v6265_v63 = vpop.f32.mrf.mxu1 }
 0x2a7   : > { %3614 = vmatprep.subr.bf16.mxu0 %v7318_v20  ;;  %3657 = vmatprep.subr.bf16.mxu1 %v7319_v39  ;;  %v6263_v57 = vpop.f32.mrf.mxu0  ;;  %v7579_v20 = vld [vmem:[#allocation128_spill] sm:$0xff] }
 0x2a8   : > { %v3165_v39 = vadd.s32 48, %v7579_v20 }
 0x2aa   : > { %3615 = vmatpush1.bf16.msra.mxu0 %v7320_v36  ;;  %3658 = vmatpush1.bf16.msra.mxu1 %v7459_v40  ;;  %vm6288_vm6 = vcmp.lt.s32.totalorder %v3165_v39, %v7581_v7 }
 0x2ad   : > { %3633 = vmatmul.mubr.bf16.vlgmr.msra.gmra.mxu0 %v6065_v8  ;;  %3676 = vmatmul.mubr.bf16.vlgmr.msra.gmra.mxu1 %v6065_v8  ;;  %v6267_v1 = vpop.f32.mrf.mxu0  ;;  %v6269_v50 = vpop.f32.mrf.mxu1 }
 0x2af   : > { %v6271_v62 = vpop.f32.mrf.mxu0  ;;  %v6273_v61 = vpop.f32.mrf.mxu1 }
 0x2b1   : > { %v6275_v5 = vpop.f32.mrf.mxu0  ;;  %v6277_v23 = vpop.f32.mrf.mxu1 }
 0x2b3   : > { %v6279_v38 = vpop.f32.mrf.mxu0  ;;  %v6281_v15 = vpop.f32.mrf.mxu1 }
 0x2cd   : > { %v2994_v36 = vpop.f32.mrf.mxu0  ;;  %v3037_v9 = vpop.f32.mrf.mxu1 }
 0x2ce   : > { %v2995_v31 = vadd.f32 %v2994_v36, %v7504_v55  ;;  %v3038_v41 = vadd.f32 %v3037_v9, %v7506_v56 }
 0x2cf   : > { %v2996_v40 = vpop.f32.mrf.mxu0  ;;  %v3039_v26 = vpop.f32.mrf.mxu1 }
 0x2d0   : > { %v3140_v8 = vmax.f32 %v2995_v31, 0.0  ;;  %v2997_v54 = vadd.f32 %v2996_v40, %v7580_v37  ;;  %v3142_v45 = vmax.f32 %v3038_v41, 0.0  ;;  %v3040_v6 = vadd.f32 %v3039_v26, %v7585_v13 }
 0x2d1   : > { %v2998_v10 = vpop.f32.mrf.mxu0  ;;  %v3041_v60 = vpop.f32.mrf.mxu1 }
 0x2d2   : > { %v3181_v24 = vsel %vm6288_vm6, %v3140_v8, 0.0  ;;  %v3141_v18 = vmax.f32 %v2997_v54, 0.0  ;;  %v2999_v25 = vadd.f32 %v2998_v10, %v7504_v55  ;;  %v3183_v44 = vsel %vm6288_vm6, %v3142_v45, 0.0 }
 0x2d3   : > { %v3143_v21 = vmax.f32 %v3040_v6, 0.0  ;;  %v3042_v4 = vadd.f32 %v3041_v60, %v7506_v56  ;;  %v3000_v27 = vpop.f32.mrf.mxu0  ;;  %v3043_v29 = vpop.f32.mrf.mxu1 }
 0x2d4   : > { %v3182_v11 = vsel %vm6288_vm6, %v3141_v18, 0.0  ;;  %v3156_v28 = vmax.f32 %v2999_v25, 0.0  ;;  %v3001_v19 = vadd.f32 %v3000_v27, %v7580_v37  ;;  %v3044_v51 = vadd.f32 %v3043_v29, %v7585_v13 }
 0x2d5   : > { %v3184_v14 = vsel %vm6288_vm6, %v3143_v21, 0.0  ;;  %v3158_v22 = vmax.f32 %v3042_v4, 0.0 }
 0x2d6   : > { %v3197_v46 = vsel %vm6304_vm7, %v3156_v28, 0.0  ;;  %v3157_v3 = vmax.f32 %v3001_v19, 0.0  ;;  %v3159_v36 = vmax.f32 %v3044_v51, 0.0 }
 0x2d7   : > { %v3261_v33 = vadd.f32 %v3197_v46, %v3181_v24  ;;  %v3199_v39 = vsel %vm6304_vm7, %v3158_v22, 0.0 }
 0x2d8   : > { %v3275_v31 = vadd.f32 %v3199_v39, %v3183_v44  ;;  %v3198_v9 = vsel %vm6304_vm7, %v3157_v3, 0.0  ;;  %v3200_v8 = vsel %vm6304_vm7, %v3159_v36, 0.0 }
 0x2d9   : > { %v3262_v41 = vrot.slane %v3261_v33, 4  ;;  %v3268_v40 = vadd.f32 %v3198_v9, %v3182_v11  ;;  %v3282_v26 = vadd.f32 %v3200_v8, %v3184_v14  ;;  %v7590_v8 = vld [vmem:[#allocation95_spill] sm:$0xff] }
 0x2da   : > { %v3276_v54 = vrot.slane %v3275_v31, 4 }
 0x2db   : > { %v3263_v52 = vadd.f32 %v3262_v41, %v3261_v33  ;;  %v3269_v45 = vrot.slane %v3268_v40, 4  ;;  %v3283_v10 = vrot.slane %v3282_v26, 4  ;;  %v7589_v41 = vld [vmem:[#allocation137_spill] sm:$0xff] }
 0x2dc   : > { %v3277_v6 = vadd.f32 %v3276_v54, %v3275_v31  ;;  %v7588_v31 = vld [vmem:[#allocation94_spill] sm:$0xff] }
 0x2dd   : > { %v3264_v24 = vrot.slane %v3263_v52, 2  ;;  %v3270_v18 = vadd.f32 %v3269_v45, %v3268_v40  ;;  %v3284_v60 = vadd.f32 %v3283_v10, %v3282_v26  ;;  %v2823_v40 = vadd.f32 %v6251_v53, %v7589_v41  ;;  %v7591_v26 = vld [vmem:[#allocation138_spill] sm:$0xff] }
 0x2de   : > { %v3278_v25 = vrot.slane %v3277_v6, 2  ;;  %v2870_v10 = vadd.f32 %v6261_v34, %v7591_v26 }
 0x2df   : > { %v3265_v21 = vadd.f32 %v3264_v24, %v3263_v52  ;;  %v3271_v44 = vrot.slane %v3270_v18, 2  ;;  %v3285_v27 = vrot.slane %v3284_v60, 2  ;;  %v2866_v52 = vadd.f32 %v6253_v49, %v7591_v26  ;;  %v7595_v49 = vld [vmem:[#allocation134_spill] sm:$0xff] }
 0x2e0   : > { %v3279_v4 = vadd.f32 %v3278_v25, %v3277_v6  ;;  %v3132_v45 = vmax.f32 %v2823_v40, 0.0  ;;  %v7592_v6 = vld [vmem:[#allocation139_spill] sm:$0xff] }
 0x2e1   : > { %v3266_v28 = vrot.slane %v3265_v21, 1  ;;  %v3272_v19 = vadd.f32 %v3271_v44, %v3270_v18  ;;  %v3286_v29 = vadd.f32 %v3285_v27, %v3284_v60  ;;  %v7593_v18 = vld [vmem:[#allocation133_spill] sm:$0xff]  ;;  %v3134_v60 = vmax.f32 %v2866_v52, 0.0 }
 0x2e2   : > { %v3280_v11 = vrot.slane %v3279_v4, 1 }
 0x2e3   : > { %v3267_v22 = vadd.f32 %v3266_v28, %v3265_v21  ;;  %v3273_v51 = vrot.slane %v3272_v19, 1  ;;  %v3287_v14 = vrot.slane %v3286_v29, 1  ;;  %v7594_v21 = vld [vmem:[#allocation140_spill] sm:$0xff] }
 0x2e4   : > { %v3281_v46 = vadd.f32 %v3280_v11, %v3279_v4  ;;  %v2868_v44 = vadd.f32 %v6257_v17, %v7594_v21 }
 0x2e5   : > { %v6320_v3 = vadd.f32 %v3267_v22, %v6124_v2  ;;  %v3274_v33 = vadd.f32 %v3273_v51, %v3272_v19  ;;  %v3288_v36 = vadd.f32 %v3287_v14, %v3286_v29  ;;  %v2827_v2 = vadd.f32 %v6259_v48, %v7589_v41 }
 0x2e6   : > { %v6323_v39 = vadd.f32 %v3281_v46, %v6127_v58  ;;  %v2825_v58 = vadd.f32 %v6255_v0, %v7592_v6  ;;  %v3173_v48 = vsel %vm6288_vm6, %v3132_v45, 0.0  ;;  %v2829_v0 = vadd.f32 %v6263_v57, %v7592_v6 }
 0x2e7   : > { %v6326_v9 = vadd.f32 %v3274_v33, %v7588_v31  ;;  %v6331_v54 = vadd.f32 %v3288_v36, %v7590_v8  ;;  %v3148_v4 = vmax.f32 %v2827_v2, 0.0  ;;  %v3150_v22 = vmax.f32 %v2870_v10, 0.0 }
 0x2e8   : > { %v3133_v29 = vmax.f32 %v2825_v58, 0.0  ;;  %v2872_v14 = vadd.f32 %v6265_v63, %v7594_v21  ;;  %v3149_v58 = vmax.f32 %v2829_v0, 0.0 }
 0x2e9   : > { %v3189_v40 = vsel %vm6304_vm7, %v3148_v4, 0.0 }
 0x2ea   : > { %v3205_v0 = vadd.f32 %v3189_v40, %v3173_v48 }
 0x2ed   : > { %v3080_v24 = vpop.f32.mrf.mxu0  ;;  %v3123_v53 = vpop.f32.mrf.mxu1 }
 0x2ee   : > { %v3081_v25 = vadd.f32 %v3080_v24, %v7593_v18  ;;  %v3124_v27 = vadd.f32 %v3123_v53, %v7595_v49  ;;  %v3191_v53 = vsel %vm6304_vm7, %v3150_v22, 0.0 }
 0x2ef   : > { %v3082_v28 = vpop.f32.mrf.mxu0  ;;  %v3125_v11 = vpop.f32.mrf.mxu1 }
 0x2f0   : > { %v3144_v19 = vmax.f32 %v3081_v25, 0.0  ;;  %v3083_v34 = vadd.f32 %v3082_v28, %v7549_v32  ;;  %v3146_v51 = vmax.f32 %v3124_v27, 0.0  ;;  %v3126_v46 = vadd.f32 %v3125_v11, %v7551_v30 }
 0x2f1   : > { %v3084_v17 = vpop.f32.mrf.mxu0  ;;  %v3127_v57 = vpop.f32.mrf.mxu1 }
 0x2f2   : > { %v3185_v33 = vsel %vm6288_vm6, %v3144_v19, 0.0  ;;  %v3145_v36 = vmax.f32 %v3083_v34, 0.0  ;;  %v3085_v31 = vadd.f32 %v3084_v17, %v7593_v18  ;;  %v3187_v8 = vsel %vm6288_vm6, %v3146_v51, 0.0 }
 0x2f3   : > { %v3147_v52 = vmax.f32 %v3126_v46, 0.0  ;;  %v3128_v2 = vadd.f32 %v3127_v57, %v7595_v49  ;;  %v3086_v45 = vpop.f32.mrf.mxu0  ;;  %v3129_v25 = vpop.f32.mrf.mxu1  ;;  %v3175_v19 = vsel %vm6288_vm6, %v3134_v60, 0.0  ;;  %v3151_v51 = vmax.f32 %v2872_v14, 0.0 }
 0x2f4   : > { %v3186_v63 = vsel %vm6288_vm6, %v3145_v36, 0.0  ;;  %v3160_v10 = vmax.f32 %v3085_v31, 0.0  ;;  %v3087_v24 = vadd.f32 %v3086_v45, %v7549_v32  ;;  %v3130_v28 = vadd.f32 %v3129_v25, %v7551_v30 }
 0x2f5   : > { %v3188_v4 = vsel %vm6288_vm6, %v3147_v52, 0.0  ;;  %v3162_v27 = vmax.f32 %v3128_v2, 0.0  ;;  %v3219_v36 = vadd.f32 %v3191_v53, %v3175_v19  ;;  %v3190_v31 = vsel %vm6304_vm7, %v3149_v58, 0.0 }
 0x2f6   : > { %v3201_v34 = vsel %vm6304_vm7, %v3160_v10, 0.0  ;;  %v3161_v11 = vmax.f32 %v3087_v24, 0.0  ;;  %v3163_v22 = vmax.f32 %v3130_v28, 0.0  ;;  %v3135_v60 = vmax.f32 %v2868_v44, 0.0 }
 0x2f7   : > { %v3289_v46 = vadd.f32 %v3201_v34, %v3185_v33  ;;  %v3203_v17 = vsel %vm6304_vm7, %v3162_v27, 0.0  ;;  %v3174_v14 = vsel %vm6288_vm6, %v3133_v29, 0.0  ;;  %v3206_v33 = vrot.slane %v3205_v0, 4 }
 0x2f8   : > { %v3303_v57 = vadd.f32 %v3203_v17, %v3187_v8  ;;  %v3202_v52 = vsel %vm6304_vm7, %v3161_v11, 0.0  ;;  %v3204_v2 = vsel %vm6304_vm7, %v3163_v22, 0.0  ;;  %v3212_v24 = vadd.f32 %v3190_v31, %v3174_v14 }
 0x2f9   : > { %v3290_v48 = vrot.slane %v3289_v46, 4  ;;  %v3296_v40 = vadd.f32 %v3202_v52, %v3186_v63  ;;  %v3310_v10 = vadd.f32 %v3204_v2, %v3188_v4  ;;  %v3192_v58 = vsel %vm6304_vm7, %v3151_v51, 0.0 }
 0x2fa   : > { %v3304_v45 = vrot.slane %v3303_v57, 4  ;;  %v3220_v53 = vrot.slane %v3219_v36, 4  ;;  %v3176_v63 = vsel %vm6288_vm6, %v3135_v60, 0.0  ;;  %v3207_v17 = vadd.f32 %v3206_v33, %v3205_v0 }
 0x2fb   : > { %v3291_v8 = vadd.f32 %v3290_v48, %v3289_v46  ;;  %v3297_v25 = vrot.slane %v3296_v40, 4  ;;  %v3311_v44 = vrot.slane %v3310_v10, 4  ;;  %v3226_v34 = vadd.f32 %v3192_v58, %v3176_v63 }
 0x2fc   : > { %v3305_v27 = vadd.f32 %v3304_v45, %v3303_v57  ;;  %v3213_v22 = vrot.slane %v3212_v24, 4  ;;  %v3221_v52 = vadd.f32 %v3220_v53, %v3219_v36  ;;  %v3208_v30 = vrot.slane %v3207_v17, 2 }
 0x2fd   : > { %v3292_v28 = vrot.slane %v3291_v8, 2  ;;  %v3298_v19 = vadd.f32 %v3297_v25, %v3296_v40  ;;  %v3312_v29 = vadd.f32 %v3311_v44, %v3310_v10  ;;  %v3227_v14 = vrot.slane %v3226_v34, 4 }
 0x2fe   : > { %v3306_v11 = vrot.slane %v3305_v27, 2  ;;  %v3214_v32 = vadd.f32 %v3213_v22, %v3212_v24  ;;  %v3222_v58 = vrot.slane %v3221_v52, 2 }
 0x2ff   : > { %v3293_v4 = vadd.f32 %v3292_v28, %v3291_v8  ;;  %v3299_v31 = vrot.slane %v3298_v19, 2  ;;  %v3313_v51 = vrot.slane %v3312_v29, 2  ;;  %v3228_v36 = vadd.f32 %v3227_v14, %v3226_v34 }
 0x300   : > { %v3307_v2 = vadd.f32 %v3306_v11, %v3305_v27  ;;  %v3209_v27 = vadd.f32 %v3208_v30, %v3207_v17  ;;  %v3215_v44 = vrot.slane %v3214_v32, 2  ;;  %v3223_v24 = vadd.f32 %v3222_v58, %v3221_v52 }
 0x301   : > { %v3294_v46 = vrot.slane %v3293_v4, 1  ;;  %v3300_v48 = vadd.f32 %v3299_v31, %v3298_v19  ;;  %v3314_v45 = vadd.f32 %v3313_v51, %v3312_v29  ;;  %v3229_v19 = vrot.slane %v3228_v36, 2 }
 0x302   : > { %v3308_v57 = vrot.slane %v3307_v2, 1  ;;  %v3210_v11 = vrot.slane %v3209_v27, 1  ;;  %v3224_v29 = vrot.slane %v3223_v24, 1  ;;  %v3719_v34 = vadd.s32 64, %v7579_v20 }
 0x303   : > { %v3295_v60 = vadd.f32 %v3294_v46, %v3293_v4  ;;  %v3301_v40 = vrot.slane %v3300_v48, 1  ;;  %v3315_v10 = vrot.slane %v3314_v45, 1  ;;  %v3230_v4 = vadd.f32 %v3229_v19, %v3228_v36 }
 0x304   : > { %v3309_v25 = vadd.f32 %v3308_v57, %v3307_v2  ;;  %v3211_v31 = vadd.f32 %v3210_v11, %v3209_v27  ;;  %v3225_v51 = vadd.f32 %v3224_v29, %v3223_v24  ;;  %vm6406_vm8 = vcmp.lt.s32.totalorder %v3719_v34, %v7581_v7 }
 0x305   : > { %v6388_v0 = vadd.f32 %v3295_v60, %v6196_v42  ;;  %v3302_v33 = vadd.f32 %v3301_v40, %v3300_v48  ;;  %v3316_v53 = vadd.f32 %v3315_v10, %v3314_v45  ;;  %v3216_v42 = vadd.f32 %v3215_v44, %v3214_v32  ;;  %v7601_v44 = vld [vmem:[#allocation54_spill] sm:$0xff] }
 0x306   : > { %v6391_v8 = vadd.f32 %v3309_v25, %v6199_v47  ;;  %v3720_v47 = vadd.s32 64, %v7584_v59  ;;  %v3231_v45 = vrot.slane %v3230_v4, 1  ;;  %v7600_v25 = vld [vmem:[#allocation144_spill] sm:$0xff]  ;;  %v6422_v24 = vadd.f32 %v3225_v51, %v7601_v44 }
 0x307   : > { %v6394_v63 = vadd.f32 %v3302_v33, %v6203_v35  ;;  %v6397_v28 = vadd.f32 %v3316_v53, %v6208_v12  ;;  %v3888_v35 = vstv %s3887_s26  ;;  %v3217_v52 = vrot.slane %v3216_v42, 1 }
 0x308   : > { %4366 = vrcp.f32 %v3888_v35  ;;  %vm6412_vm9 = vcmp.lt.s32.totalorder %v3720_v47, %v7581_v7  ;;  %v6418_v10 = vadd.f32 %v3211_v31, %v7600_v25  ;;  %v4462_v47 = vmov 1966171168  }
 0x309   : > { %v3218_v33 = vadd.f32 %v3217_v52, %v3216_v42  ;;  %v7602_v42 = vld [vmem:[#allocation112_spill] sm:$0xff] }
 0x30d   : > { %v3376_v22 = vpop.f32.mrf.mxu0  ;;  %v3419_v17 = vpop.f32.mrf.mxu1 }
 0x30e   : > { %v3377_v30 = vadd.f32 %v3376_v22, %v7589_v41  ;;  %v3420_v12 = vadd.f32 %v3419_v17, %v7591_v26  ;;  %v2909_v17 = vadd.f32 %v6267_v1, %v7602_v42 }
 0x30f   : > { %v3378_v2 = vpop.f32.mrf.mxu0  ;;  %v3421_v32 = vpop.f32.mrf.mxu1 }
 0x310   : > { %v3379_v46 = vadd.f32 %v3378_v2, %v7592_v6  ;;  %v3422_v59 = vadd.f32 %v3421_v32, %v7594_v21  ;;  %v3686_v60 = vmax.f32 %v3377_v30, 0.0  ;;  %v3688_v36 = vmax.f32 %v3420_v12, 0.0 }
 0x311   : > { %v3380_v14 = vpop.f32.mrf.mxu0  ;;  %v3423_v58 = vpop.f32.mrf.mxu1  ;;  %v6426_v30 = vunpack.c.l.s4 %v4462_v47  ;;  %v2913_v2 = vadd.f32 %v6275_v5, %v7602_v42  ;;  %v7605_v47 = vld [vmem:[#allocation118_spill] sm:$0xff] }
 0x312   : > { %v3381_v40 = vadd.f32 %v3380_v14, %v7589_v41  ;;  %v3424_v53 = vadd.f32 %v3423_v58, %v7591_v26  ;;  %v3687_v7 = vmax.f32 %v3379_v46, 0.0  ;;  %v3689_v22 = vmax.f32 %v3422_v59, 0.0  ;;  %v7603_v58 = vld [vmem:[#allocation113_spill] sm:$0xff] }
 0x313   : > { %v3382_v27 = vpop.f32.mrf.mxu0  ;;  %v3425_v29 = vpop.f32.mrf.mxu1  ;;  %v3727_v26 = vsel %vm6406_vm8, %v3686_v60, 0.0  ;;  %v2956_v25 = vadd.f32 %v6277_v23, %v7603_v58  ;;  %v2952_v44 = vadd.f32 %v6269_v50, %v7603_v58 }
 0x314   : > { %v3702_v19 = vmax.f32 %v3381_v40, 0.0  ;;  %v3383_v11 = vadd.f32 %v3382_v27, %v7592_v6  ;;  %v3704_v34 = vmax.f32 %v3424_v53, 0.0  ;;  %v3426_v41 = vadd.f32 %v3425_v29, %v7594_v21  ;;  %v7604_v53 = vld [vmem:[#allocation62_spill] sm:$0xff] }
 0x315   : > { %v3729_v6 = vsel %vm6406_vm8, %v3688_v36, 0.0  ;;  %v3728_v1 = vsel %vm6406_vm8, %v3687_v7, 0.0  ;;  %v3730_v32 = vsel %vm6406_vm8, %v3689_v22, 0.0  ;;  %v3232_v40 = vadd.f32 %v3231_v45, %v3230_v4 }
 0x316   : > { %v3743_v35 = vsel %vm6412_vm9, %v3702_v19, 0.0  ;;  %v3703_v31 = vmax.f32 %v3383_v11, 0.0  ;;  %v3745_v21 = vsel %vm6412_vm9, %v3704_v34, 0.0  ;;  %v3705_v12 = vmax.f32 %v3426_v41, 0.0 }
 0x317   : > { %v3759_v52 = vadd.f32 %v3743_v35, %v3727_v26  ;;  %v3773_v51 = vadd.f32 %v3745_v21, %v3729_v6  ;;  %v3318_v27 = vadd.f32 %v3218_v33, %v7604_v53  ;;  %v3152_v11 = vmax.f32 %v2913_v2, 0.0  ;;  %v6456_v26 = vpop.eup %4366 }
 0x318   : > { %v3744_v46 = vsel %vm6412_vm9, %v3703_v31, 0.0  ;;  %v3746_v60 = vsel %vm6412_vm9, %v3705_v12, 0.0  ;;  %v3928_v34 = vunpack.c.0.s8 %v6426_v30  ;;  %v3136_v41 = vmax.f32 %v2909_v17, 0.0 }
 0x319   : > { %v3760_v59 = vrot.slane %v3759_v52, 4  ;;  %v3766_v14 = vadd.f32 %v3744_v46, %v3728_v1  ;;  %v3774_v5 = vrot.slane %v3773_v51, 4  ;;  %v3780_v36 = vadd.f32 %v3746_v60, %v3730_v32 }
 0x31a   : > { %v2915_v4 = vadd.f32 %v6279_v38, %v7605_v47  ;;  %v2911_v33 = vadd.f32 %v6271_v62, %v7605_v47  ;;  %v3154_v35 = vmax.f32 %v2956_v25, 0.0  ;;  %v3138_v6 = vmax.f32 %v2952_v44, 0.0 }
 0x31b   : > { %v3761_v7 = vadd.f32 %v3760_v59, %v3759_v52  ;;  %v3767_v19 = vrot.slane %v3766_v14, 4  ;;  %v3775_v29 = vadd.f32 %v3774_v5, %v3773_v51  ;;  %v3781_v22 = vrot.slane %v3780_v36, 4  ;;  %v7606_v52 = vld [vmem:[#allocation119_spill] sm:$0xff] }
 0x31c   : > { %v2958_v21 = vadd.f32 %v6281_v15, %v7606_v52  ;;  %v2954_v17 = vadd.f32 %v6273_v61, %v7606_v52  ;;  %v3193_v38 = vsel %vm6304_vm7, %v3152_v11, 0.0  ;;  %v3177_v62 = vsel %vm6288_vm6, %v3136_v41, 0.0 }
 0x31d   : > { %v3762_v45 = vrot.slane %v3761_v7, 2  ;;  %v3768_v23 = vadd.f32 %v3767_v19, %v3766_v14  ;;  %v3776_v50 = vrot.slane %v3775_v29, 2  ;;  %v3782_v31 = vadd.f32 %v3781_v22, %v3780_v36 }
 0x31e   : > { %v3153_v51 = vmax.f32 %v2915_v4, 0.0  ;;  %v3137_v59 = vmax.f32 %v2911_v33, 0.0  ;;  %v3195_v15 = vsel %vm6304_vm7, %v3154_v35, 0.0  ;;  %v3233_v25 = vadd.f32 %v3193_v38, %v3177_v62  ;;  %v7607_v4 = vld [vmem:[#allocation145_spill] sm:$0xff] }
 0x31f   : > { %v3763_v12 = vadd.f32 %v3762_v45, %v3761_v7  ;;  %v3769_v30 = vrot.slane %v3768_v23, 2  ;;  %v3777_v2 = vadd.f32 %v3776_v50, %v3775_v29  ;;  %v3783_v1 = vrot.slane %v3782_v31, 2 }
 0x320   : > { %v3155_v5 = vmax.f32 %v2958_v21, 0.0  ;;  %v3179_v53 = vsel %vm6288_vm6, %v3138_v6, 0.0  ;;  %v3139_v44 = vmax.f32 %v2954_v17, 0.0  ;;  %v3194_v29 = vsel %vm6304_vm7, %v3153_v51, 0.0 }
 0x321   : > { %v3764_v46 = vrot.slane %v3763_v12, 1  ;;  %v3770_v32 = vadd.f32 %v3769_v30, %v3768_v23  ;;  %v3778_v14 = vrot.slane %v3777_v2, 1  ;;  %v3784_v60 = vadd.f32 %v3783_v1, %v3782_v31 }
 0x322   : > { %v3247_v11 = vadd.f32 %v3195_v15, %v3179_v53  ;;  %v3320_v45 = vadd.f32 %v3232_v40, %v7607_v4  ;;  %v3178_v35 = vsel %vm6288_vm6, %v3137_v59, 0.0  ;;  %v3234_v50 = vrot.slane %v3233_v25, 4 }
 0x323   : > { %v3765_v61 = vadd.f32 %v3764_v46, %v3763_v12  ;;  %v3771_v36 = vrot.slane %v3770_v32, 1  ;;  %v3779_v7 = vadd.f32 %v3778_v14, %v3777_v2  ;;  %v3785_v19 = vrot.slane %v3784_v60, 1 }
 0x324   : > { %v3196_v31 = vsel %vm6304_vm7, %v3155_v5, 0.0  ;;  %v3240_v21 = vadd.f32 %v3194_v29, %v3178_v35  ;;  %v6482_v30 = vsub.s32 %v3928_v34, %v7579_v20  ;;  %v3248_v40 = vrot.slane %v3247_v11, 4 }
 0x325   : > { %v3871_v22 = vadd.f32 %v3765_v61, %v6418_v10  ;;  %v3772_v41 = vadd.f32 %v3771_v36, %v3770_v32  ;;  %v3873_v23 = vadd.f32 %v3779_v7, %v6422_v24  ;;  %v3786_v33 = vadd.f32 %v3785_v19, %v3784_v60 }
 0x326   : > { %v3180_v10 = vsel %vm6288_vm6, %v3139_v44, 0.0  ;;  %v3235_v1 = vadd.f32 %v3234_v50, %v3233_v25  ;;  %v3241_v62 = vrot.slane %v3240_v21, 4  ;;  %v3249_v46 = vadd.f32 %v3248_v40, %v3247_v11 }
 0x327   : > { %v3872_v6 = vadd.f32 %v3772_v41, %v3318_v27  ;;  %v3874_v12 = vadd.f32 %v3786_v33, %v3320_v45  ;;  %v3890_v24 = vmul.f32 %v6456_v26, %v3871_v22  ;;  %v3254_v38 = vadd.f32 %v3196_v31, %v3180_v10 }
 0x328   : > { %v3892_v2 = vmul.f32 %v6456_v26, %v3873_v23  ;;  %v3236_v14 = vrot.slane %v3235_v1, 2  ;;  %v3242_v25 = vadd.f32 %v3241_v62, %v3240_v21  ;;  %v3250_v44 = vrot.slane %v3249_v46, 2 }
 0x329   : > { %v3891_v17 = vmul.f32 %v6456_v26, %v3872_v6  ;;  %v3893_v43 = vmul.f32 %v6456_v26, %v3874_v12  ;;  %v3255_v16 = vrot.slane %v3254_v38, 4 }
 0x32a   : > { %v3237_v4 = vadd.f32 %v3236_v14, %v3235_v1  ;;  %v3243_v35 = vrot.slane %v3242_v25, 2  ;;  %v3251_v12 = vadd.f32 %v3250_v44, %v3249_v46 }
 0x32b   : > { %v3922_v27 = vcombine.low %v3890_v24, %v3891_v17  ;;  %v3923_v51 = vcombine.low %v3892_v2, %v3893_v43  ;;  %v3256_v11 = vadd.f32 %v3255_v16, %v3254_v38 }
 0x32d   : > { %v3462_v20 = vpop.f32.mrf.mxu0  ;;  %v6491_v34 = vrot.slane %v3922_v27, %v6482_v30  ;;  %v3505_v59 = vpop.f32.mrf.mxu1  ;;  %v6495_v15 = vrot.slane %v3923_v51, %v6482_v30  ;;  %v3257_v17 = vrot.slane %v3256_v11, 2  ;;  %v3244_v27 = vadd.f32 %v3243_v35, %v3242_v25 }
 0x32e   : > { %v3463_v32 = vadd.f32 %v3462_v20, %v7602_v42  ;;  %v3506_v60 = vadd.f32 %v3505_v59, %v7603_v58 }
 0x32f   : > { %v3464_v5 = vpop.f32.mrf.mxu0  ;;  %v3507_v36 = vpop.f32.mrf.mxu1  ;;  %v3954_v53 = vcombine.low %v6491_v34, %v6495_v15  ;;  %v3258_v59 = vadd.f32 %v3257_v17, %v3256_v11 }
 0x330   : > { %v3465_v61 = vadd.f32 %v3464_v5, %v7605_v47  ;;  %v3508_v7 = vadd.f32 %v3507_v36, %v7606_v52  ;;  %v3690_v29 = vmax.f32 %v3463_v32, 0.0  ;;  %v3692_v45 = vmax.f32 %v3506_v60, 0.0 }
 0x331   : > { %v3466_v19 = vpop.f32.mrf.mxu0  ;;  %v3509_v41 = vpop.f32.mrf.mxu1  ;;  %v3238_v5 = vrot.slane %v3237_v4, 1  ;;  %v3252_v36 = vrot.slane %v3251_v12, 1 }
 0x332   : > { %v3467_v22 = vadd.f32 %v3466_v19, %v7602_v42  ;;  %v3510_v23 = vadd.f32 %v3509_v41, %v7603_v58  ;;  %v3691_v50 = vmax.f32 %v3465_v61, 0.0  ;;  %v3693_v10 = vmax.f32 %v3508_v7, 0.0 }
 0x333   : > { %v3468_v33 = vpop.f32.mrf.mxu0  ;;  %v3511_v21 = vpop.f32.mrf.mxu1  ;;  %v3731_v42 = vsel %vm6406_vm8, %v3690_v29, 0.0  ;;  %v3733_v2 = vsel %vm6406_vm8, %v3692_v45, 0.0  ;;  %v3245_v19 = vrot.slane %v3244_v27, 1  ;;  %v3259_v41 = vrot.slane %v3258_v59, 1 }
 0x334   : > { %v3706_v31 = vmax.f32 %v3467_v22, 0.0  ;;  %v3469_v6 = vadd.f32 %v3468_v33, %v7605_v47  ;;  %v3708_v40 = vmax.f32 %v3510_v23, 0.0  ;;  %v3512_v24 = vadd.f32 %v3511_v21, %v7606_v52 }
 0x335   : > { %v3732_v52 = vsel %vm6406_vm8, %v3691_v50, 0.0  ;;  %v3734_v46 = vsel %vm6406_vm8, %v3693_v10, 0.0  ;;  %v3239_v33 = vadd.f32 %v3238_v5, %v3237_v4  ;;  %v3246_v21 = vadd.f32 %v3245_v19, %v3244_v27  ;;  %v7610_v4 = vld [vmem:[#allocation148_spill] sm:$0xff] }
 0x336   : > { %v3747_v38 = vsel %vm6412_vm9, %v3706_v31, 0.0  ;;  %v3707_v58 = vmax.f32 %v3469_v6, 0.0  ;;  %v3749_v47 = vsel %vm6412_vm9, %v3708_v40, 0.0  ;;  %v3709_v1 = vmax.f32 %v3512_v24, 0.0 }
 0x337   : > { %v3787_v43 = vadd.f32 %v3747_v38, %v3731_v42  ;;  %v3801_v62 = vadd.f32 %v3749_v47, %v3733_v2  ;;  %v3253_v31 = vadd.f32 %v3252_v36, %v3251_v12  ;;  %v3260_v24 = vadd.f32 %v3259_v41, %v3258_v59  ;;  %v7608_v38 = vld [vmem:[#allocation146_spill] sm:$0xff]  ;;  %v7609_v47 = vld [vmem:[#allocation147_spill] sm:$0xff] }
 0x338   : > { %v3748_v51 = vsel %vm6412_vm9, %v3707_v58, 0.0  ;;  %v3750_v32 = vsel %vm6412_vm9, %v3709_v1, 0.0  ;;  %v3321_v58 = vadd.f32 %v3239_v33, %v7608_v38 }
 0x339   : > { %v3788_v20 = vrot.slane %v3787_v43, 4  ;;  %v3794_v16 = vadd.f32 %v3748_v51, %v3732_v52  ;;  %v3802_v14 = vrot.slane %v3801_v62, 4  ;;  %v3808_v60 = vadd.f32 %v3750_v32, %v3734_v46 }
 0x33a   : > { %v3323_v1 = vadd.f32 %v3253_v31, %v7609_v47  ;;  %v3322_v51 = vadd.f32 %v3246_v21, %v7610_v4 }
 0x33b   : > { %v3789_v25 = vadd.f32 %v3788_v20, %v3787_v43  ;;  %v3795_v61 = vrot.slane %v3794_v16, 4  ;;  %v3803_v44 = vadd.f32 %v3802_v14, %v3801_v62  ;;  %v3809_v7 = vrot.slane %v3808_v60, 4  ;;  %v7611_v20 = vld [vmem:[#allocation86_spill] sm:$0xff] }
 0x33c   : > { %v3324_v27 = vadd.f32 %v3260_v24, %v7611_v20 }
 0x33d   : > { %v3790_v29 = vrot.slane %v3789_v25, 2  ;;  %v3796_v22 = vadd.f32 %v3795_v61, %v3794_v16  ;;  %v3804_v45 = vrot.slane %v3803_v44, 2  ;;  %v3810_v23 = vadd.f32 %v3809_v7, %v3808_v60 }
 0x33f   : > { %v3791_v35 = vadd.f32 %v3790_v29, %v3789_v25  ;;  %v3797_v50 = vrot.slane %v3796_v22, 2  ;;  %v3805_v6 = vadd.f32 %v3804_v45, %v3803_v44  ;;  %v3811_v11 = vrot.slane %v3810_v23, 2 }
 0x341   : > { %v3792_v10 = vrot.slane %v3791_v35, 1  ;;  %v3798_v40 = vadd.f32 %v3797_v50, %v3796_v22  ;;  %v3806_v17 = vrot.slane %v3805_v6, 1  ;;  %v3812_v42 = vadd.f32 %v3811_v11, %v3810_v23 }
 0x343   : > { %v3793_v2 = vadd.f32 %v3792_v10, %v3791_v35  ;;  %v3799_v43 = vrot.slane %v3798_v40, 1  ;;  %v3807_v52 = vadd.f32 %v3806_v17, %v3805_v6  ;;  %v3813_v62 = vrot.slane %v3812_v42, 1 }
 0x344   : > { %v3962_v10 = vrot.slane %v3954_v53, %v6482_v30 }
 0x345   : > { %v3875_v12 = vadd.f32 %v3793_v2, %v3321_v58  ;;  %v3800_v46 = vadd.f32 %v3799_v43, %v3798_v40  ;;  %v3877_v16 = vadd.f32 %v3807_v52, %v3323_v1  ;;  %v3814_v32 = vadd.f32 %v3813_v62, %v3812_v42 }
 0x347   : > { %v3876_v59 = vadd.f32 %v3800_v46, %v3322_v51  ;;  %v3878_v14 = vadd.f32 %v3814_v32, %v3324_v27  ;;  %v3894_v60 = vmul.f32 %v6456_v26, %v3875_v12  ;;  %v3896_v25 = vmul.f32 %v6456_v26, %v3877_v16 }
 0x349   : > { %v3895_v5 = vmul.f32 %v6456_v26, %v3876_v59  ;;  %v3897_v61 = vmul.f32 %v6456_v26, %v3878_v14 }
 0x34b   : > { %v3924_v36 = vcombine.low %v3894_v60, %v3895_v5  ;;  %v3925_v44 = vcombine.low %v3896_v25, %v3897_v61 }
 0x34d   : > { %v3548_v7 = vpop.f32.mrf.mxu0  ;;  %v3946_v19 = vrot.slane %v3924_v36, %v6482_v30  ;;  %v3591_v22 = vpop.f32.mrf.mxu1  ;;  %v3953_v41 = vrot.slane %v3925_v44, %v6482_v30 }
 0x34e   : > { %v3549_v29 = vadd.f32 %v3548_v7, %v7504_v55  ;;  %v3592_v45 = vadd.f32 %v3591_v22, %v7506_v56 }
 0x34f   : > { %v3550_v23 = vpop.f32.mrf.mxu0  ;;  %v3593_v50 = vpop.f32.mrf.mxu1  ;;  %v3955_v31 = vcombine.low %v3946_v19, %v3953_v41 }
 0x350   : > { %v3694_v33 = vmax.f32 %v3549_v29, 0.0  ;;  %v3551_v35 = vadd.f32 %v3550_v23, %v7580_v37  ;;  %v3696_v6 = vmax.f32 %v3592_v45, 0.0  ;;  %v3594_v11 = vadd.f32 %v3593_v50, %v7585_v13 }
 0x351   : > { %v3552_v21 = vpop.f32.mrf.mxu0  ;;  %v3595_v42 = vpop.f32.mrf.mxu1  ;;  %v3969_v38 = vrot.slane %v3955_v31, %v6482_v30 }
 0x352   : > { %v3735_v40 = vsel %vm6406_vm8, %v3694_v33, 0.0  ;;  %v3695_v24 = vmax.f32 %v3551_v35, 0.0  ;;  %v3553_v17 = vadd.f32 %v3552_v21, %v7504_v55  ;;  %v3737_v58 = vsel %vm6406_vm8, %v3696_v6, 0.0 }
 0x353   : > { %v3697_v2 = vmax.f32 %v3594_v11, 0.0  ;;  %v3596_v43 = vadd.f32 %v3595_v42, %v7506_v56  ;;  %v3554_v47 = vpop.f32.mrf.mxu0  ;;  %v3597_v1 = vpop.f32.mrf.mxu1  ;;  %v3970_v52 = vcombine.low %v3962_v10, %v3969_v38 }
 0x354   : > { %v3736_v34 = vsel %vm6406_vm8, %v3695_v24, 0.0  ;;  %v3710_v15 = vmax.f32 %v3553_v17, 0.0  ;;  %v3555_v53 = vadd.f32 %v3554_v47, %v7580_v37  ;;  %v3598_v4 = vadd.f32 %v3597_v1, %v7585_v13 }
 0x355   : > { %v3738_v55 = vsel %vm6406_vm8, %v3697_v2, 0.0  ;;  %v3712_v62 = vmax.f32 %v3596_v43, 0.0  ;;  %4022 = vst [vmem:[%s6558_s7] sm:$0xff] %v3970_v52 }
 0x356   : > { %v3751_v51 = vsel %vm6412_vm9, %v3710_v15, 0.0  ;;  %v3711_v12 = vmax.f32 %v3555_v53, 0.0  ;;  %v3713_v46 = vmax.f32 %v3598_v4, 0.0 }
 0x357   : > { %v3815_v56 = vadd.f32 %v3751_v51, %v3735_v40  ;;  %v3753_v37 = vsel %vm6412_vm9, %v3712_v62, 0.0  ;;  %v7612_v62 = vld [vmem:[#allocation135_spill] sm:$0xff] }
 0x358   : > { %v3829_v20 = vadd.f32 %v3753_v37, %v3737_v58  ;;  %v3752_v27 = vsel %vm6412_vm9, %v3711_v12, 0.0  ;;  %v3754_v13 = vsel %vm6412_vm9, %v3713_v46, 0.0  ;;  %v7613_v37 = vld [vmem:[#allocation136_spill] sm:$0xff] }
 0x359   : > { %v3816_v16 = vrot.slane %v3815_v56, 4  ;;  %v3822_v32 = vadd.f32 %v3752_v27, %v3736_v34  ;;  %v3836_v14 = vadd.f32 %v3754_v13, %v3738_v55 }
 0x35a   : > { %v3830_v59 = vrot.slane %v3829_v20, 4 }
 0x35b   : > { %v3817_v60 = vadd.f32 %v3816_v16, %v3815_v56  ;;  %v3823_v5 = vrot.slane %v3822_v32, 4  ;;  %v3837_v61 = vrot.slane %v3836_v14, 4 }
 0x35c   : > { %v3831_v25 = vadd.f32 %v3830_v59, %v3829_v20 }
 0x35d   : > { %v3818_v36 = vrot.slane %v3817_v60, 2  ;;  %v3824_v44 = vadd.f32 %v3823_v5, %v3822_v32  ;;  %v3838_v19 = vadd.f32 %v3837_v61, %v3836_v14 }
 0x35e   : > { %v3832_v7 = vrot.slane %v3831_v25, 2 }
 0x35f   : > { %v3819_v29 = vadd.f32 %v3818_v36, %v3817_v60  ;;  %v3825_v22 = vrot.slane %v3824_v44, 2  ;;  %v3839_v45 = vrot.slane %v3838_v19, 2 }
 0x360   : > { %v3833_v41 = vadd.f32 %v3832_v7, %v3831_v25 }
 0x361   : > { %v3820_v23 = vrot.slane %v3819_v29, 1  ;;  %v3826_v33 = vadd.f32 %v3825_v22, %v3824_v44  ;;  %v3840_v50 = vadd.f32 %v3839_v45, %v3838_v19 }
 0x362   : > { %v3834_v35 = vrot.slane %v3833_v41, 1 }
 0x363   : > { %v3821_v31 = vadd.f32 %v3820_v23, %v3819_v29  ;;  %v3827_v6 = vrot.slane %v3826_v33, 1  ;;  %v3841_v21 = vrot.slane %v3840_v50, 1 }
 0x364   : > { %v3835_v11 = vadd.f32 %v3834_v35, %v3833_v41 }
 0x365   : > { %v3879_v10 = vadd.f32 %v3821_v31, %v6320_v3  ;;  %v3828_v40 = vadd.f32 %v3827_v6, %v3826_v33  ;;  %v3842_v17 = vadd.f32 %v3841_v21, %v3840_v50 }
 0x366   : > { %v3881_v24 = vadd.f32 %v3835_v11, %v6323_v39 }
 0x367   : > { %v3898_v42 = vmul.f32 %v6456_v26, %v3879_v10  ;;  %v3880_v38 = vadd.f32 %v3828_v40, %v6326_v9  ;;  %v3882_v2 = vadd.f32 %v3842_v17, %v6331_v54 }
 0x368   : > { %v3900_v58 = vmul.f32 %v6456_v26, %v3881_v24 }
 0x369   : > { %v3899_v43 = vmul.f32 %v6456_v26, %v3880_v38  ;;  %v3901_v47 = vmul.f32 %v6456_v26, %v3882_v2 }
 0x36b   : > { %v3971_v34 = vcombine.low %v3898_v42, %v3899_v43  ;;  %v3972_v15 = vcombine.low %v3900_v58, %v3901_v47 }
 0x36d   : > { %v3634_v53 = vpop.f32.mrf.mxu0  ;;  %v6576_v3 = vrot.slane %v3971_v34, %v6482_v30  ;;  %v3677_v1 = vpop.f32.mrf.mxu1  ;;  %v6580_v52 = vrot.slane %v3972_v15, %v6482_v30 }
 0x36e   : > { %v3635_v39 = vadd.f32 %v3634_v53, %v7593_v18  ;;  %v3678_v9 = vadd.f32 %v3677_v1, %v7595_v49 }
 0x36f   : > { %v3636_v55 = vpop.f32.mrf.mxu0  ;;  %v3679_v51 = vpop.f32.mrf.mxu1  ;;  %v4003_v12 = vcombine.low %v6576_v3, %v6580_v52 }
 0x370   : > { %v3698_v54 = vmax.f32 %v3635_v39, 0.0  ;;  %v3637_v4 = vadd.f32 %v3636_v55, %v7612_v62  ;;  %v3700_v56 = vmax.f32 %v3678_v9, 0.0  ;;  %v3680_v46 = vadd.f32 %v3679_v51, %v7613_v37 }
 0x371   : > { %v3638_v20 = vpop.f32.mrf.mxu0  ;;  %v3681_v13 = vpop.f32.mrf.mxu1 }
 0x372   : > { %v3739_v27 = vsel %vm6406_vm8, %v3698_v54, 0.0  ;;  %v3699_v16 = vmax.f32 %v3637_v4, 0.0  ;;  %v3639_v32 = vadd.f32 %v3638_v20, %v7593_v18  ;;  %v3741_v59 = vsel %vm6406_vm8, %v3700_v56, 0.0 }
 0x373   : > { %v3701_v14 = vmax.f32 %v3680_v46, 0.0  ;;  %v3682_v60 = vadd.f32 %v3681_v13, %v7595_v49  ;;  %v3640_v5 = vpop.f32.mrf.mxu0  ;;  %v3683_v44 = vpop.f32.mrf.mxu1 }
 0x374   : > { %v3740_v25 = vsel %vm6406_vm8, %v3699_v16, 0.0  ;;  %v3714_v61 = vmax.f32 %v3639_v32, 0.0  ;;  %v3641_v36 = vadd.f32 %v3640_v5, %v7612_v62  ;;  %v3684_v18 = vadd.f32 %v3683_v44, %v7613_v37 }
 0x375   : > { %v3742_v7 = vsel %vm6406_vm8, %v3701_v14, 0.0  ;;  %v3716_v19 = vmax.f32 %v3682_v60, 0.0 }
 0x376   : > { %v3755_v29 = vsel %vm6412_vm9, %v3714_v61, 0.0  ;;  %v3715_v22 = vmax.f32 %v3641_v36, 0.0  ;;  %v3717_v45 = vmax.f32 %v3684_v18, 0.0 }
 0x377   : > { %v3843_v41 = vadd.f32 %v3755_v29, %v3739_v27  ;;  %v3757_v49 = vsel %vm6412_vm9, %v3716_v19, 0.0 }
 0x378   : > { %v3857_v23 = vadd.f32 %v3757_v49, %v3741_v59  ;;  %v3756_v33 = vsel %vm6412_vm9, %v3715_v22, 0.0  ;;  %v3758_v48 = vsel %vm6412_vm9, %v3717_v45, 0.0 }
 0x379   : > { %v3844_v35 = vrot.slane %v3843_v41, 4  ;;  %v3850_v50 = vadd.f32 %v3756_v33, %v3740_v25  ;;  %v3864_v6 = vadd.f32 %v3758_v48, %v3742_v7 }
 0x37a   : > { %v3858_v31 = vrot.slane %v3857_v23, 4 }
 0x37b   : > { %v3845_v11 = vadd.f32 %v3844_v35, %v3843_v41  ;;  %v3851_v21 = vrot.slane %v3850_v50, 4  ;;  %v3865_v40 = vrot.slane %v3864_v6, 4 }
 0x37c   : > { %v3859_v10 = vadd.f32 %v3858_v31, %v3857_v23 }
 0x37d   : > { %v3846_v24 = vrot.slane %v3845_v11, 2  ;;  %v3852_v17 = vadd.f32 %v3851_v21, %v3850_v50  ;;  %v3866_v38 = vadd.f32 %v3865_v40, %v3864_v6 }
 0x37e   : > { %v3860_v42 = vrot.slane %v3859_v10, 2 }
 0x37f   : > { %v3847_v58 = vadd.f32 %v3846_v24, %v3845_v11  ;;  %v3853_v2 = vrot.slane %v3852_v17, 2  ;;  %v3867_v47 = vrot.slane %v3866_v38, 2 }
 0x380   : > { %v3861_v43 = vadd.f32 %v3860_v42, %v3859_v10 }
 0x381   : > { %v3848_v34 = vrot.slane %v3847_v58, 1  ;;  %v3854_v15 = vadd.f32 %v3853_v2, %v3852_v17  ;;  %v3868_v39 = vadd.f32 %v3867_v47, %v3866_v38 }
 0x382   : > { %v3862_v53 = vrot.slane %v3861_v43, 1 }
 0x383   : > { %v3849_v57 = vadd.f32 %v3848_v34, %v3847_v58  ;;  %v3855_v1 = vrot.slane %v3854_v15, 1  ;;  %v3869_v55 = vrot.slane %v3868_v39, 1 }
 0x384   : > { %v3863_v9 = vadd.f32 %v3862_v53, %v3861_v43 }
 0x385   : > { %v3883_v54 = vadd.f32 %v3849_v57, %v6388_v0  ;;  %v3856_v62 = vadd.f32 %v3855_v1, %v3854_v15  ;;  %v3870_v51 = vadd.f32 %v3869_v55, %v3868_v39 }
 0x386   : > { %v3885_v4 = vadd.f32 %v3863_v9, %v6391_v8 }
 0x387   : > { %v3902_v56 = vmul.f32 %v6456_v26, %v3883_v54  ;;  %v3884_v37 = vadd.f32 %v3856_v62, %v6394_v63  ;;  %v3886_v20 = vadd.f32 %v3870_v51, %v6397_v28  ;;  %v4011_v63 = vrot.slane %v4003_v12, %v6482_v30 }
 0x388   : > { %v3904_v46 = vmul.f32 %v6456_v26, %v3885_v4 }
 0x389   : > { %v3903_v27 = vmul.f32 %v6456_v26, %v3884_v37  ;;  %v3905_v16 = vmul.f32 %v6456_v26, %v3886_v20 }
 0x38b   : > { %v3973_v0 = vcombine.low %v3902_v56, %v3903_v27  ;;  %v3974_v32 = vcombine.low %v3904_v46, %v3905_v16 }
 0x38d   : > { %v3995_v8 = vrot.slane %v3973_v0, %v6482_v30  ;;  %v4002_v13 = vrot.slane %v3974_v32, %v6482_v30 }
 0x38f   : > { %v4004_v59 = vcombine.low %v3995_v8, %v4002_v13 }
 0x391   : > { %v4018_v28 = vrot.slane %v4004_v59, %v6482_v30 }
 0x393   : > { %v4019_v14 = vcombine.low %v4011_v63, %v4018_v28 }
 0x395   : > { %4023 = vst [vmem:[%s6558_s7 + $0x8] sm:$0xff] %v4019_v14 }
 0x396   : > { %4393 = shalt.err (!%p4390_p10)
}
 0x397   : > { %s4394_s17 = scalar_lea.hbm %s4039_s12, 256  ;;  %s4398_s25 = scalar_lea.hbm %s6668_s4, 512 }
 0x398   : > { %p4395_p11 = scmp.ne.s32.totalorder %s4039_s12, %s4394_s17  ;;  %p4399_p1 = scmp.lt.s32.totalorder %s4039_s12, %s6668_s4 }
 0x399   : > { %p4400_p2 = scmp.lt.s32.totalorder %s4398_s25, %s4394_s17 }
 0x39a   : > { %p4396_p12 = pnand %p4395_p11, %p4532_p9 }
 0x39b   : > { %p4401_p3 = por %p4400_p2, %p4399_p1 }
 0x39c   : > { %p4397_p0 = pneg %p4396_p12 }
 0x39e   : > { %p4402_p4 = pnand %p4401_p3, %p4397_p0 }
 0x3a0   : > { %4405 = shalt.err (!%p4402_p4)
}
 0x3a1   : > { %4303 = dma.vmem_to_hbm [thread:$0]  (%p4532_p9), %s4042_s9, 256, %s4039_s12, %s4025_s13  }
 0x3a2 PF: > { %p4309_p5 = scmp.ge.s32.totalorder %s4458_s24, 2  ;;  %s4053_s30 = sand.u32 1, %s4438_s20  }
 0x3a3   : > { %s4054_s7 = scalar_lea.sflag [#allocation5], %s4053_s30 }
 0x3a4   : > { %p4306_p6 = pnand %p4309_p5, %p4539_p13 }
 0x3a6   : > { %p4307_p7 = pneg %p4306_p6 }
 0x3a8   : > { %4433 = dma.done.wait (%p4307_p7), %s4054_s7, 256  }
 0x3a9   : > { %4435 = vsyncadd (%p4307_p7), %s4054_s7, 4294967040  ;;  %s23_s24 = sadd.s32 1, %s4458_s24   ;;  %s7614_s20 = smov %s4442_s21 }
 0x3aa   : > { %p20_p8 = scmp.ge.s32.totalorder %s23_s24, 4   ;;  %s7615_s21 = smov %s4446_s0 }
 0x3ab   : > { %s7616_s0 = smov %s4545_s6  ;;  %s7617_s22 = smov %s4454_s23 }
 0x3ac   : > { %s7618_s23 = smov %s7620_s27  ;;  %22 = sbr.rel (!%p20_p8) target bundleno = 19 (0x13), region = 77 }
 0x3b1   :  { %4059 = vsyncpa [#allocation5], 1 }
 0x3b2   :  { %4061 = vsyncpa [#allocation5 + $0x1], 1 }

</bundles_post_ra>
